<compile_context>
chip_gen: v7x
topology: tpu7x:2x2x1
jax: 0.10.0
libtpu: 0.0.40
codegen_flags: <defaults>
</compile_context>

<pallas_src>
import jax
import jax.numpy as jnp
from jax.experimental import pallas as pl
from jax.experimental.pallas import tpu as pltpu

# ----------------------------- model config (small) -------------------------
VOCAB = 64
MAX_POS = 16
HIDDEN = 32
NUM_HEADS = 4
HEAD_DIM = HIDDEN // NUM_HEADS
INTERMEDIATE = 64
NUM_LAYERS = 2
N_CLASSES = 3
LN_EPS = 1e-5
LOGIT_PAD = 128  # lane-dense classifier output (3 real logits + zero padding)

CONST_NAMES = (
    "emb_g", "emb_b",
    "wq", "bq", "wk", "bk", "wv", "bv", "wo", "bo",
    "ln1g", "ln1b", "wi", "bi", "wf", "bf", "ln2g", "ln2b",
    "pw", "pb", "cw", "cb",
)


# ----------------------------- in-kernel helpers -----------------------------
def _ln(x, g, b):
    mean = jnp.mean(x, axis=-1, keepdims=True)
    c = x - mean
    var = jnp.mean(c * c, axis=-1, keepdims=True)
    return c * jax.lax.rsqrt(var + LN_EPS) * g + b


def _gelu(x):
    # TODO(synk): RoBERTa uses exact erf-based GELU; tanh approximation used here.
    c = 0.7978845608028654  # sqrt(2/pi)
    return 0.5 * x * (1.0 + jnp.tanh(c * (x + 0.044715 * x * x * x)))


# ----------------------------- fused forward kernel --------------------------
def _fused_forward_kernel(x_ref, mask_ref,
                          emb_g, emb_b,
                          wq, bq, wk, bk, wv, bv, wo, bo,
                          ln1g, ln1b, wi, bi, wf, bf, ln2g, ln2b,
                          pw, pb, cw, cb,
                          o_ref):
    """One grid step = one sequence of the batch; everything stays on-chip."""
    x = x_ref[0]                      # (S, H) fp32 token embeddings (pre-LN)
    amask = mask_ref[0]               # (1, S) additive key mask (0 / -1e9)

    # embedding layernorm
    x = _ln(x, emb_g[...], emb_b[...])

    for l in range(NUM_LAYERS):       # static unroll (2 layers)
        # ---- self attention (per-head weights selected by ref indexing) ----
        attn = None
        for h in range(NUM_HEADS):    # static unroll (4 heads)
            # 1/sqrt(Dh) is pre-folded into wq/bq in prepare_params().
            q = jnp.dot(x, wq[l, h], preferred_element_type=jnp.float32) + bq[l, h]
            k = jnp.dot(x, wk[l, h], preferred_element_type=jnp.float32) + bk[l, h]
            v = jnp.dot(x, wv[l, h], preferred_element_type=jnp.float32) + bv[l, h]

            s = jnp.dot(q, k.T, preferred_element_type=jnp.float32) + amask   # (S, S)
            s = s - jnp.max(s, axis=-1, keepdims=True)
            p = jnp.exp(s)
            p = p / jnp.sum(p, axis=-1, keepdims=True)
            ctx = jnp.dot(p, v, preferred_element_type=jnp.float32)           # (S, Dh)

            # per-head slice of the output projection: ctx_h @ Wo[h]
            ho = jnp.dot(ctx, wo[l, h], preferred_element_type=jnp.float32)   # (S, H)
            attn = ho if attn is None else attn + ho
        attn = attn + bo[l]

        x = _ln(attn + x, ln1g[l], ln1b[l])

        # ---- feed forward ----
        hmid = jnp.dot(x, wi[l], preferred_element_type=jnp.float32) + bi[l]
        hmid = _gelu(hmid)
        ffo = jnp.dot(hmid, wf[l], preferred_element_type=jnp.float32) + bf[l]
        x = _ln(ffo + x, ln2g[l], ln2b[l])

    # ---- pooler (computed for all tokens; wrapper reads the CLS row) ----
    pooled = jnp.tanh(jnp.dot(x, pw[...], preferred_element_type=jnp.float32) + pb[...])

    # TODO(synk): nn.Dropout(p=0.3) is identity in eval mode; training dropout omitted.

    # ---- classifier head, lane-dense (padded to 128 output lanes) ----
    logits = jnp.dot(pooled, cw[...], preferred_element_type=jnp.float32) + cb[...]
    o_ref[0] = logits.astype(o_ref.dtype)                                     # (S, 128)


def _const_spec(a):
    zeros = (0,) * a.ndim
    return pl.BlockSpec(a.shape, lambda i: zeros)


def sentiment_classifier_forward(kp, input_ids, attention_mask):
    """kp: kernel-ready params from prepare_params()."""
    B, S = input_ids.shape
    H = HIDDEN

    # --- embedding lookup (gather) + pos/type embeddings: XLA glue ---
    x = jnp.take(kp["word_emb"], input_ids, axis=0)                           # (B,S,H)
    x = x + kp["pos_emb"][:S][None, :, :] + kp["type_emb"][0][None, None, :]
    x = x.astype(jnp.float32)

    # additive attention mask: 0 where attended, -1e9 where masked
    add_mask = ((1.0 - attention_mask.astype(jnp.float32)) * -1e9).reshape(B, 1, S)

    out = pl.pallas_call(
        _fused_forward_kernel,
        out_shape=jax.ShapeDtypeStruct((B, S, LOGIT_PAD), jnp.float32),
        grid=(B,),
        in_specs=[
            pl.BlockSpec((1, S, H), lambda i: (i, 0, 0)),     # token embeddings
            pl.BlockSpec((1, 1, S), lambda i: (i, 0, 0)),     # additive mask
        ] + [_const_spec(kp[n]) for n in CONST_NAMES],
        out_specs=pl.BlockSpec((1, S, LOGIT_PAD), lambda i: (i, 0, 0)),
        compiler_params=pltpu.CompilerParams(dimension_semantics=("arbitrary",)),
    )(x, add_mask, *[kp[n] for n in CONST_NAMES])

    # CLS-token logits, drop the lane padding
    return out[:, 0, :N_CLASSES]


# ----------------------------- parameter init --------------------------------
def init_params(key):
    scale = 0.02

    def nrm(k, shape):
        return scale * jax.random.normal(k, shape, dtype=jnp.float32)

    keys = jax.random.split(key, 8 + NUM_LAYERS)
    params = {
        "word_emb": nrm(keys[0], (VOCAB, HIDDEN)),
        "pos_emb": nrm(keys[1], (MAX_POS, HIDDEN)),
        "type_emb": nrm(keys[2], (1, HIDDEN)),
        "emb_ln_g": jnp.ones((HIDDEN,), jnp.float32),
        "emb_ln_b": jnp.zeros((HIDDEN,), jnp.float32),
        "pooler_w": nrm(keys[3], (HIDDEN, HIDDEN)),
        "pooler_b": jnp.zeros((HIDDEN,), jnp.float32),
        "cls_w": nrm(keys[4], (HIDDEN, N_CLASSES)),
        "cls_b": jnp.zeros((N_CLASSES,), jnp.float32),
        "layers": [],
    }
    for l in range(NUM_LAYERS):
        lk = jax.random.split(keys[8 + l], 6)
        params["layers"].append({
            "wq": nrm(lk[0], (HIDDEN, HIDDEN)), "bq": jnp.zeros((HIDDEN,), jnp.float32),
            "wk": nrm(lk[1], (HIDDEN, HIDDEN)), "bk": jnp.zeros((HIDDEN,), jnp.float32),
            "wv": nrm(lk[2], (HIDDEN, HIDDEN)), "bv": jnp.zeros((HIDDEN,), jnp.float32),
            "wo": nrm(lk[3], (HIDDEN, HIDDEN)), "bo": jnp.zeros((HIDDEN,), jnp.float32),
            "attn_ln_g": jnp.ones((HIDDEN,), jnp.float32),
            "attn_ln_b": jnp.zeros((HIDDEN,), jnp.float32),
            "wi": nrm(lk[4], (HIDDEN, INTERMEDIATE)), "bi": jnp.zeros((INTERMEDIATE,), jnp.float32),
            "wf": nrm(lk[5], (INTERMEDIATE, HIDDEN)), "bf": jnp.zeros((HIDDEN,), jnp.float32),
            "ffn_ln_g": jnp.ones((HIDDEN,), jnp.float32),
            "ffn_ln_b": jnp.zeros((HIDDEN,), jnp.float32),
        })
    return params


def prepare_params(params):
    """One-time reshape/cast/stack of weights into kernel-ready layout."""
    scale = 1.0 / float(HEAD_DIM) ** 0.5

    def per_head_w(w):  # (H, H) -> (NH, H, DH); output features are head-major
        return jnp.transpose(w.reshape(HIDDEN, NUM_HEADS, HEAD_DIM), (1, 0, 2))

    def per_head_b(b):  # (H,) -> (NH, 1, DH)
        return b.reshape(NUM_HEADS, 1, HEAD_DIM)

    def stack(fn):
        return jnp.stack([fn(lp) for lp in params["layers"]]).astype(jnp.float32)

    kp = {
        "word_emb": params["word_emb"].astype(jnp.float32),
        "pos_emb": params["pos_emb"].astype(jnp.float32),
        "type_emb": params["type_emb"].astype(jnp.float32),
        "emb_g": params["emb_ln_g"].reshape(1, HIDDEN).astype(jnp.float32),
        "emb_b": params["emb_ln_b"].reshape(1, HIDDEN).astype(jnp.float32),
        # 1/sqrt(Dh) folded into the query projection (review suggestion)
        "wq": stack(lambda lp: per_head_w(lp["wq"]) * scale),
        "bq": stack(lambda lp: per_head_b(lp["bq"]) * scale),
        "wk": stack(lambda lp: per_head_w(lp["wk"])),
        "bk": stack(lambda lp: per_head_b(lp["bk"])),
        "wv": stack(lambda lp: per_head_w(lp["wv"])),
        "bv": stack(lambda lp: per_head_b(lp["bv"])),
        "wo": stack(lambda lp: lp["wo"].reshape(NUM_HEADS, HEAD_DIM, HIDDEN)),
        "bo": stack(lambda lp: lp["bo"].reshape(1, HIDDEN)),
        "ln1g": stack(lambda lp: lp["attn_ln_g"].reshape(1, HIDDEN)),
        "ln1b": stack(lambda lp: lp["attn_ln_b"].reshape(1, HIDDEN)),
        "wi": stack(lambda lp: lp["wi"]),
        "bi": stack(lambda lp: lp["bi"].reshape(1, INTERMEDIATE)),
        "wf": stack(lambda lp: lp["wf"]),
        "bf": stack(lambda lp: lp["bf"].reshape(1, HIDDEN)),
        "ln2g": stack(lambda lp: lp["ffn_ln_g"].reshape(1, HIDDEN)),
        "ln2b": stack(lambda lp: lp["ffn_ln_b"].reshape(1, HIDDEN)),
        "pw": params["pooler_w"].astype(jnp.float32),
        "pb": params["pooler_b"].reshape(1, HIDDEN).astype(jnp.float32),
        # lane-dense classifier head: pad N_CLASSES=3 -> 128
        "cw": jnp.pad(params["cls_w"],
                      ((0, 0), (0, LOGIT_PAD - N_CLASSES))).astype(jnp.float32),
        "cb": jnp.pad(params["cls_b"].reshape(1, N_CLASSES),
                      ((0, 0), (0, LOGIT_PAD - N_CLASSES))).astype(jnp.float32),
    }
    return kp


# ----------------------------- pure-JAX reference -----------------------------
def reference_forward(params, input_ids, attention_mask):
    B, S = input_ids.shape
    x = jnp.take(params["word_emb"], input_ids, axis=0)
    x = x + params["pos_emb"][:S][None, :, :] + params["type_emb"][0][None, None, :]

    def ln(t, g, b):
        m = jnp.mean(t, -1, keepdims=True)
        v = jnp.mean((t - m) ** 2, -1, keepdims=True)
        return (t - m) * jax.lax.rsqrt(v + LN_EPS) * g + b

    x = ln(x, params["emb_ln_g"], params["emb_ln_b"])
    mask = (1.0 - attention_mask.astype(jnp.float32)) * -1e9
    scale = 1.0 / float(HEAD_DIM) ** 0.5
    for lp in params["layers"]:
        q = x @ lp["wq"] + lp["bq"]
        k = x @ lp["wk"] + lp["bk"]
        v = x @ lp["wv"] + lp["bv"]

        def heads(t):
            return t.reshape(B, S, NUM_HEADS, HEAD_DIM).transpose(0, 2, 1, 3)

        qh, kh, vh = heads(q), heads(k), heads(v)
        s = jnp.einsum("bhqd,bhkd->bhqk", qh, kh) * scale + mask[:, None, None, :]
        p = jax.nn.softmax(s, axis=-1)
        ctx = jnp.einsum("bhqk,bhkd->bhqd", p, vh).transpose(0, 2, 1, 3).reshape(B, S, HIDDEN)
        attn = ctx @ lp["wo"] + lp["bo"]
        x = ln(attn + x, lp["attn_ln_g"], lp["attn_ln_b"])
        h = x @ lp["wi"] + lp["bi"]
        c = 0.7978845608028654
        h = 0.5 * h * (1.0 + jnp.tanh(c * (h + 0.044715 * h * h * h)))
        f = h @ lp["wf"] + lp["bf"]
        x = ln(f + x, lp["ffn_ln_g"], lp["ffn_ln_b"])
    cls = x[:, 0, :]
    pooled = jnp.tanh(cls @ params["pooler_w"] + params["pooler_b"])
    return pooled @ params["cls_w"] + params["cls_b"]


# ----------------------------- main ------------------------------------------
if __name__ == "__main__":
    key = jax.random.PRNGKey(0)
    pkey, idkey = jax.random.split(key)

    params = init_params(pkey)
    kp = prepare_params(params)          # one-time weight prep (outside forward)

    B, S = 2, 8
    input_ids = jax.random.randint(idkey, (B, S), 0, VOCAB, dtype=jnp.int32)
    # deterministic mask: first sequence fully attended, second has last 3 tokens padded
    attention_mask = jnp.array(
        [[1, 1, 1, 1, 1, 1, 1, 1],
         [1, 1, 1, 1, 1, 0, 0, 0]], dtype=jnp.int32)

    fwd = jax.jit(sentiment_classifier_forward)
    logits = fwd(kp, input_ids, attention_mask)
    jax.block_until_ready(logits)
    assert logits.shape == (B, N_CLASSES)

    ref = reference_forward(params, input_ids, attention_mask)
    assert jnp.allclose(logits, ref, atol=5e-3, rtol=5e-2), (logits, ref)
    print("KERNEL_OK")
</pallas_src>

<mosaic_0001>
module attributes {stable_mosaic.version = 11 : i64} {
  func.func @_fused_forward_kernel(%arg0: i32, %arg1: memref<1x8x32xf32, #tpu.memory_space<vmem>>, %arg2: memref<1x1x8xf32, #tpu.memory_space<vmem>>, %arg3: memref<1x32xf32, #tpu.memory_space<vmem>>, %arg4: memref<1x32xf32, #tpu.memory_space<vmem>>, %arg5: memref<2x4x32x8xf32, #tpu.memory_space<vmem>>, %arg6: memref<2x4x1x8xf32, #tpu.memory_space<vmem>>, %arg7: memref<2x4x32x8xf32, #tpu.memory_space<vmem>>, %arg8: memref<2x4x1x8xf32, #tpu.memory_space<vmem>>, %arg9: memref<2x4x32x8xf32, #tpu.memory_space<vmem>>, %arg10: memref<2x4x1x8xf32, #tpu.memory_space<vmem>>, %arg11: memref<2x4x8x32xf32, #tpu.memory_space<vmem>>, %arg12: memref<2x1x32xf32, #tpu.memory_space<vmem>>, %arg13: memref<2x1x32xf32, #tpu.memory_space<vmem>>, %arg14: memref<2x1x32xf32, #tpu.memory_space<vmem>>, %arg15: memref<2x32x64xf32, #tpu.memory_space<vmem>>, %arg16: memref<2x1x64xf32, #tpu.memory_space<vmem>>, %arg17: memref<2x64x32xf32, #tpu.memory_space<vmem>>, %arg18: memref<2x1x32xf32, #tpu.memory_space<vmem>>, %arg19: memref<2x1x32xf32, #tpu.memory_space<vmem>>, %arg20: memref<2x1x32xf32, #tpu.memory_space<vmem>>, %arg21: memref<32x32xf32, #tpu.memory_space<vmem>>, %arg22: memref<1x32xf32, #tpu.memory_space<vmem>>, %arg23: memref<32x128xf32, #tpu.memory_space<vmem>>, %arg24: memref<1x128xf32, #tpu.memory_space<vmem>>, %arg25: memref<1x8x128xf32, #tpu.memory_space<vmem>>) attributes {dimension_semantics = [#tpu.dimension_semantics<arbitrary>], iteration_bounds = array<i64: 2>, scalar_prefetch = 0 : i64, scratch_operands = 0 : i64, tpu.core_type = #tpu.core_type<tc>, window_params = [{transform_indices = @transform_0, window_bounds = array<i64: 1, 8, 32>}, {transform_indices = @transform_1, window_bounds = array<i64: 1, 1, 8>}, {pipeline_mode = #tpu.pipeline_mode<synchronous>, transform_indices = @transform_2, window_bounds = array<i64: 1, 32>}, {pipeline_mode = #tpu.pipeline_mode<synchronous>, transform_indices = @transform_3, window_bounds = array<i64: 1, 32>}, {pipeline_mode = #tpu.pipeline_mode<synchronous>, transform_indices = @transform_4, window_bounds = array<i64: 2, 4, 32, 8>}, {pipeline_mode = #tpu.pipeline_mode<synchronous>, transform_indices = @transform_5, window_bounds = array<i64: 2, 4, 1, 8>}, {pipeline_mode = #tpu.pipeline_mode<synchronous>, transform_indices = @transform_6, window_bounds = array<i64: 2, 4, 32, 8>}, {pipeline_mode = #tpu.pipeline_mode<synchronous>, transform_indices = @transform_7, window_bounds = array<i64: 2, 4, 1, 8>}, {pipeline_mode = #tpu.pipeline_mode<synchronous>, transform_indices = @transform_8, window_bounds = array<i64: 2, 4, 32, 8>}, {pipeline_mode = #tpu.pipeline_mode<synchronous>, transform_indices = @transform_9, window_bounds = array<i64: 2, 4, 1, 8>}, {pipeline_mode = #tpu.pipeline_mode<synchronous>, transform_indices = @transform_10, window_bounds = array<i64: 2, 4, 8, 32>}, {pipeline_mode = #tpu.pipeline_mode<synchronous>, transform_indices = @transform_11, window_bounds = array<i64: 2, 1, 32>}, {pipeline_mode = #tpu.pipeline_mode<synchronous>, transform_indices = @transform_12, window_bounds = array<i64: 2, 1, 32>}, {pipeline_mode = #tpu.pipeline_mode<synchronous>, transform_indices = @transform_13, window_bounds = array<i64: 2, 1, 32>}, {pipeline_mode = #tpu.pipeline_mode<synchronous>, transform_indices = @transform_14, window_bounds = array<i64: 2, 32, 64>}, {pipeline_mode = #tpu.pipeline_mode<synchronous>, transform_indices = @transform_15, window_bounds = array<i64: 2, 1, 64>}, {pipeline_mode = #tpu.pipeline_mode<synchronous>, transform_indices = @transform_16, window_bounds = array<i64: 2, 64, 32>}, {pipeline_mode = #tpu.pipeline_mode<synchronous>, transform_indices = @transform_17, window_bounds = array<i64: 2, 1, 32>}, {pipeline_mode = #tpu.pipeline_mode<synchronous>, transform_indices = @transform_18, window_bounds = array<i64: 2, 1, 32>}, {pipeline_mode = #tpu.pipeline_mode<synchronous>, transform_indices = @transform_19, window_bounds = array<i64: 2, 1, 32>}, {pipeline_mode = #tpu.pipeline_mode<synchronous>, transform_indices = @transform_20, window_bounds = array<i64: 32, 32>}, {pipeline_mode = #tpu.pipeline_mode<synchronous>, transform_indices = @transform_21, window_bounds = array<i64: 1, 32>}, {pipeline_mode = #tpu.pipeline_mode<synchronous>, transform_indices = @transform_22, window_bounds = array<i64: 32, 128>}, {pipeline_mode = #tpu.pipeline_mode<synchronous>, transform_indices = @transform_23, window_bounds = array<i64: 1, 128>}, {transform_indices = @transform_24, window_bounds = array<i64: 1, 8, 128>}]} {
    %c0 = arith.constant 0 : index
    %c0_0 = arith.constant 0 : index
    %c0_1 = arith.constant 0 : index
    %0 = vector.load %arg1[%c0, %c0_0, %c0_1] : memref<1x8x32xf32, #tpu.memory_space<vmem>>, vector<1x8x32xf32>
    %1 = vector.shape_cast %0 : vector<1x8x32xf32> to vector<8x32xf32>
    %c0_2 = arith.constant 0 : index
    %c0_3 = arith.constant 0 : index
    %c0_4 = arith.constant 0 : index
    %2 = vector.load %arg2[%c0_2, %c0_3, %c0_4] : memref<1x1x8xf32, #tpu.memory_space<vmem>>, vector<1x1x8xf32>
    %3 = vector.shape_cast %2 : vector<1x1x8xf32> to vector<1x8xf32>
    %c0_5 = arith.constant 0 : index
    %c0_6 = arith.constant 0 : index
    %4 = vector.load %arg3[%c0_5, %c0_6] : memref<1x32xf32, #tpu.memory_space<vmem>>, vector<1x32xf32>
    %c0_7 = arith.constant 0 : index
    %c0_8 = arith.constant 0 : index
    %5 = vector.load %arg4[%c0_7, %c0_8] : memref<1x32xf32, #tpu.memory_space<vmem>>, vector<1x32xf32>
    %cst = arith.constant dense<0.000000e+00> : vector<8xf32>
    %6 = vector.multi_reduction <add>, %1, %cst [1] : vector<8x32xf32> to vector<8xf32>
    %7 = vector.shape_cast %6 : vector<8xf32> to vector<8x1xf32>
    %cst_9 = arith.constant 3.200000e+01 : f32
    %8 = vector.broadcast %cst_9 : f32 to vector<8x1xf32>
    %9 = arith.divf %7, %8 : vector<8x1xf32>
    %10 = vector.broadcast %9 : vector<8x1xf32> to vector<8x32xf32>
    %11 = arith.subf %1, %10 : vector<8x32xf32>
    %12 = arith.mulf %11, %11 : vector<8x32xf32>
    %cst_10 = arith.constant dense<0.000000e+00> : vector<8xf32>
    %13 = vector.multi_reduction <add>, %12, %cst_10 [1] : vector<8x32xf32> to vector<8xf32>
    %14 = vector.shape_cast %13 : vector<8xf32> to vector<8x1xf32>
    %cst_11 = arith.constant 3.200000e+01 : f32
    %15 = vector.broadcast %cst_11 : f32 to vector<8x1xf32>
    %16 = arith.divf %14, %15 : vector<8x1xf32>
    %cst_12 = arith.constant 9.99999974E-6 : f32
    %17 = vector.broadcast %cst_12 : f32 to vector<8x1xf32>
    %18 = arith.addf %16, %17 : vector<8x1xf32>
    %19 = math.rsqrt %18 : vector<8x1xf32>
    %20 = vector.broadcast %19 : vector<8x1xf32> to vector<8x32xf32>
    %21 = arith.mulf %11, %20 : vector<8x32xf32>
    %22 = vector.broadcast %4 : vector<1x32xf32> to vector<8x32xf32>
    %23 = arith.mulf %21, %22 : vector<8x32xf32>
    %24 = vector.broadcast %5 : vector<1x32xf32> to vector<8x32xf32>
    %25 = arith.addf %23, %24 : vector<8x32xf32>
    %c0_13 = arith.constant 0 : index
    %c0_14 = arith.constant 0 : index
    %c0_15 = arith.constant 0 : index
    %c0_16 = arith.constant 0 : index
    %26 = vector.load %arg5[%c0_13, %c0_14, %c0_15, %c0_16] : memref<2x4x32x8xf32, #tpu.memory_space<vmem>>, vector<1x1x32x8xf32>
    %27 = vector.shape_cast %26 : vector<1x1x32x8xf32> to vector<32x8xf32>
    %cst_17 = arith.constant dense<0.000000e+00> : vector<8x8xf32>
    %28 = tpu.matmul %25, %27, %cst_17 {dimension_numbers = #tpu.dot_dimension_numbers<[1], [0], [0], [1], [0, 0, 1, 1], [], []>} : vector<8x32xf32>, vector<32x8xf32>, vector<8x8xf32> -> vector<8x8xf32>
    %c0_18 = arith.constant 0 : index
    %c0_19 = arith.constant 0 : index
    %c0_20 = arith.constant 0 : index
    %c0_21 = arith.constant 0 : index
    %29 = vector.load %arg6[%c0_18, %c0_19, %c0_20, %c0_21] : memref<2x4x1x8xf32, #tpu.memory_space<vmem>>, vector<1x1x1x8xf32>
    %30 = vector.shape_cast %29 : vector<1x1x1x8xf32> to vector<1x8xf32>
    %31 = vector.broadcast %30 : vector<1x8xf32> to vector<8x8xf32>
    %32 = arith.addf %28, %31 : vector<8x8xf32>
    %c0_22 = arith.constant 0 : index
    %c0_23 = arith.constant 0 : index
    %c0_24 = arith.constant 0 : index
    %c0_25 = arith.constant 0 : index
    %33 = vector.load %arg7[%c0_22, %c0_23, %c0_24, %c0_25] : memref<2x4x32x8xf32, #tpu.memory_space<vmem>>, vector<1x1x32x8xf32>
    %34 = vector.shape_cast %33 : vector<1x1x32x8xf32> to vector<32x8xf32>
    %cst_26 = arith.constant dense<0.000000e+00> : vector<8x8xf32>
    %35 = tpu.matmul %25, %34, %cst_26 {dimension_numbers = #tpu.dot_dimension_numbers<[1], [0], [0], [1], [0, 0, 1, 1], [], []>} : vector<8x32xf32>, vector<32x8xf32>, vector<8x8xf32> -> vector<8x8xf32>
    %c0_27 = arith.constant 0 : index
    %c0_28 = arith.constant 0 : index
    %c0_29 = arith.constant 0 : index
    %c0_30 = arith.constant 0 : index
    %36 = vector.load %arg8[%c0_27, %c0_28, %c0_29, %c0_30] : memref<2x4x1x8xf32, #tpu.memory_space<vmem>>, vector<1x1x1x8xf32>
    %37 = vector.shape_cast %36 : vector<1x1x1x8xf32> to vector<1x8xf32>
    %38 = vector.broadcast %37 : vector<1x8xf32> to vector<8x8xf32>
    %39 = arith.addf %35, %38 : vector<8x8xf32>
    %c0_31 = arith.constant 0 : index
    %c0_32 = arith.constant 0 : index
    %c0_33 = arith.constant 0 : index
    %c0_34 = arith.constant 0 : index
    %40 = vector.load %arg9[%c0_31, %c0_32, %c0_33, %c0_34] : memref<2x4x32x8xf32, #tpu.memory_space<vmem>>, vector<1x1x32x8xf32>
    %41 = vector.shape_cast %40 : vector<1x1x32x8xf32> to vector<32x8xf32>
    %cst_35 = arith.constant dense<0.000000e+00> : vector<8x8xf32>
    %42 = tpu.matmul %25, %41, %cst_35 {dimension_numbers = #tpu.dot_dimension_numbers<[1], [0], [0], [1], [0, 0, 1, 1], [], []>} : vector<8x32xf32>, vector<32x8xf32>, vector<8x8xf32> -> vector<8x8xf32>
    %c0_36 = arith.constant 0 : index
    %c0_37 = arith.constant 0 : index
    %c0_38 = arith.constant 0 : index
    %c0_39 = arith.constant 0 : index
    %43 = vector.load %arg10[%c0_36, %c0_37, %c0_38, %c0_39] : memref<2x4x1x8xf32, #tpu.memory_space<vmem>>, vector<1x1x1x8xf32>
    %44 = vector.shape_cast %43 : vector<1x1x1x8xf32> to vector<1x8xf32>
    %45 = vector.broadcast %44 : vector<1x8xf32> to vector<8x8xf32>
    %46 = arith.addf %42, %45 : vector<8x8xf32>
    %47 = tpu.transpose %39, [1, 0] : vector<8x8xf32> -> vector<8x8xf32>
    %cst_40 = arith.constant dense<0.000000e+00> : vector<8x8xf32>
    %48 = tpu.matmul %32, %47, %cst_40 {dimension_numbers = #tpu.dot_dimension_numbers<[1], [0], [0], [1], [0, 0, 1, 1], [], []>} : vector<8x8xf32>, vector<8x8xf32>, vector<8x8xf32> -> vector<8x8xf32>
    %49 = vector.broadcast %3 : vector<1x8xf32> to vector<8x8xf32>
    %50 = arith.addf %48, %49 : vector<8x8xf32>
    %cst_41 = arith.constant dense<0xFF800000> : vector<8xf32>
    %51 = vector.multi_reduction <maximumf>, %50, %cst_41 [1] : vector<8x8xf32> to vector<8xf32>
    %52 = vector.shape_cast %51 : vector<8xf32> to vector<8x1xf32>
    %53 = vector.broadcast %52 : vector<8x1xf32> to vector<8x8xf32>
    %54 = arith.subf %50, %53 : vector<8x8xf32>
    %55 = math.exp %54 : vector<8x8xf32>
    %cst_42 = arith.constant dense<0.000000e+00> : vector<8xf32>
    %56 = vector.multi_reduction <add>, %55, %cst_42 [1] : vector<8x8xf32> to vector<8xf32>
    %57 = vector.shape_cast %56 : vector<8xf32> to vector<8x1xf32>
    %58 = vector.broadcast %57 : vector<8x1xf32> to vector<8x8xf32>
    %59 = arith.divf %55, %58 : vector<8x8xf32>
    %cst_43 = arith.constant dense<0.000000e+00> : vector<8x8xf32>
    %60 = tpu.matmul %59, %46, %cst_43 {dimension_numbers = #tpu.dot_dimension_numbers<[1], [0], [0], [1], [0, 0, 1, 1], [], []>} : vector<8x8xf32>, vector<8x8xf32>, vector<8x8xf32> -> vector<8x8xf32>
    %c0_44 = arith.constant 0 : index
    %c0_45 = arith.constant 0 : index
    %c0_46 = arith.constant 0 : index
    %c0_47 = arith.constant 0 : index
    %61 = vector.load %arg11[%c0_44, %c0_45, %c0_46, %c0_47] : memref<2x4x8x32xf32, #tpu.memory_space<vmem>>, vector<1x1x8x32xf32>
    %62 = vector.shape_cast %61 : vector<1x1x8x32xf32> to vector<8x32xf32>
    %cst_48 = arith.constant dense<0.000000e+00> : vector<8x32xf32>
    %63 = tpu.matmul %60, %62, %cst_48 {dimension_numbers = #tpu.dot_dimension_numbers<[1], [0], [0], [1], [0, 0, 1, 1], [], []>} : vector<8x8xf32>, vector<8x32xf32>, vector<8x32xf32> -> vector<8x32xf32>
    %c0_49 = arith.constant 0 : index
    %c1 = arith.constant 1 : index
    %c0_50 = arith.constant 0 : index
    %c0_51 = arith.constant 0 : index
    %64 = vector.load %arg5[%c0_49, %c1, %c0_50, %c0_51] : memref<2x4x32x8xf32, #tpu.memory_space<vmem>>, vector<1x1x32x8xf32>
    %65 = vector.shape_cast %64 : vector<1x1x32x8xf32> to vector<32x8xf32>
    %cst_52 = arith.constant dense<0.000000e+00> : vector<8x8xf32>
    %66 = tpu.matmul %25, %65, %cst_52 {dimension_numbers = #tpu.dot_dimension_numbers<[1], [0], [0], [1], [0, 0, 1, 1], [], []>} : vector<8x32xf32>, vector<32x8xf32>, vector<8x8xf32> -> vector<8x8xf32>
    %c0_53 = arith.constant 0 : index
    %c1_54 = arith.constant 1 : index
    %c0_55 = arith.constant 0 : index
    %c0_56 = arith.constant 0 : index
    %67 = vector.load %arg6[%c0_53, %c1_54, %c0_55, %c0_56] : memref<2x4x1x8xf32, #tpu.memory_space<vmem>>, vector<1x1x1x8xf32>
    %68 = vector.shape_cast %67 : vector<1x1x1x8xf32> to vector<1x8xf32>
    %69 = vector.broadcast %68 : vector<1x8xf32> to vector<8x8xf32>
    %70 = arith.addf %66, %69 : vector<8x8xf32>
    %c0_57 = arith.constant 0 : index
    %c1_58 = arith.constant 1 : index
    %c0_59 = arith.constant 0 : index
    %c0_60 = arith.constant 0 : index
    %71 = vector.load %arg7[%c0_57, %c1_58, %c0_59, %c0_60] : memref<2x4x32x8xf32, #tpu.memory_space<vmem>>, vector<1x1x32x8xf32>
    %72 = vector.shape_cast %71 : vector<1x1x32x8xf32> to vector<32x8xf32>
    %cst_61 = arith.constant dense<0.000000e+00> : vector<8x8xf32>
    %73 = tpu.matmul %25, %72, %cst_61 {dimension_numbers = #tpu.dot_dimension_numbers<[1], [0], [0], [1], [0, 0, 1, 1], [], []>} : vector<8x32xf32>, vector<32x8xf32>, vector<8x8xf32> -> vector<8x8xf32>
    %c0_62 = arith.constant 0 : index
    %c1_63 = arith.constant 1 : index
    %c0_64 = arith.constant 0 : index
    %c0_65 = arith.constant 0 : index
    %74 = vector.load %arg8[%c0_62, %c1_63, %c0_64, %c0_65] : memref<2x4x1x8xf32, #tpu.memory_space<vmem>>, vector<1x1x1x8xf32>
    %75 = vector.shape_cast %74 : vector<1x1x1x8xf32> to vector<1x8xf32>
    %76 = vector.broadcast %75 : vector<1x8xf32> to vector<8x8xf32>
    %77 = arith.addf %73, %76 : vector<8x8xf32>
    %c0_66 = arith.constant 0 : index
    %c1_67 = arith.constant 1 : index
    %c0_68 = arith.constant 0 : index
    %c0_69 = arith.constant 0 : index
    %78 = vector.load %arg9[%c0_66, %c1_67, %c0_68, %c0_69] : memref<2x4x32x8xf32, #tpu.memory_space<vmem>>, vector<1x1x32x8xf32>
    %79 = vector.shape_cast %78 : vector<1x1x32x8xf32> to vector<32x8xf32>
    %cst_70 = arith.constant dense<0.000000e+00> : vector<8x8xf32>
    %80 = tpu.matmul %25, %79, %cst_70 {dimension_numbers = #tpu.dot_dimension_numbers<[1], [0], [0], [1], [0, 0, 1, 1], [], []>} : vector<8x32xf32>, vector<32x8xf32>, vector<8x8xf32> -> vector<8x8xf32>
    %c0_71 = arith.constant 0 : index
    %c1_72 = arith.constant 1 : index
    %c0_73 = arith.constant 0 : index
    %c0_74 = arith.constant 0 : index
    %81 = vector.load %arg10[%c0_71, %c1_72, %c0_73, %c0_74] : memref<2x4x1x8xf32, #tpu.memory_space<vmem>>, vector<1x1x1x8xf32>
    %82 = vector.shape_cast %81 : vector<1x1x1x8xf32> to vector<1x8xf32>
    %83 = vector.broadcast %82 : vector<1x8xf32> to vector<8x8xf32>
    %84 = arith.addf %80, %83 : vector<8x8xf32>
    %85 = tpu.transpose %77, [1, 0] : vector<8x8xf32> -> vector<8x8xf32>
    %cst_75 = arith.constant dense<0.000000e+00> : vector<8x8xf32>
    %86 = tpu.matmul %70, %85, %cst_75 {dimension_numbers = #tpu.dot_dimension_numbers<[1], [0], [0], [1], [0, 0, 1, 1], [], []>} : vector<8x8xf32>, vector<8x8xf32>, vector<8x8xf32> -> vector<8x8xf32>
    %87 = vector.broadcast %3 : vector<1x8xf32> to vector<8x8xf32>
    %88 = arith.addf %86, %87 : vector<8x8xf32>
    %cst_76 = arith.constant dense<0xFF800000> : vector<8xf32>
    %89 = vector.multi_reduction <maximumf>, %88, %cst_76 [1] : vector<8x8xf32> to vector<8xf32>
    %90 = vector.shape_cast %89 : vector<8xf32> to vector<8x1xf32>
    %91 = vector.broadcast %90 : vector<8x1xf32> to vector<8x8xf32>
    %92 = arith.subf %88, %91 : vector<8x8xf32>
    %93 = math.exp %92 : vector<8x8xf32>
    %cst_77 = arith.constant dense<0.000000e+00> : vector<8xf32>
    %94 = vector.multi_reduction <add>, %93, %cst_77 [1] : vector<8x8xf32> to vector<8xf32>
    %95 = vector.shape_cast %94 : vector<8xf32> to vector<8x1xf32>
    %96 = vector.broadcast %95 : vector<8x1xf32> to vector<8x8xf32>
    %97 = arith.divf %93, %96 : vector<8x8xf32>
    %cst_78 = arith.constant dense<0.000000e+00> : vector<8x8xf32>
    %98 = tpu.matmul %97, %84, %cst_78 {dimension_numbers = #tpu.dot_dimension_numbers<[1], [0], [0], [1], [0, 0, 1, 1], [], []>} : vector<8x8xf32>, vector<8x8xf32>, vector<8x8xf32> -> vector<8x8xf32>
    %c0_79 = arith.constant 0 : index
    %c1_80 = arith.constant 1 : index
    %c0_81 = arith.constant 0 : index
    %c0_82 = arith.constant 0 : index
    %99 = vector.load %arg11[%c0_79, %c1_80, %c0_81, %c0_82] : memref<2x4x8x32xf32, #tpu.memory_space<vmem>>, vector<1x1x8x32xf32>
    %100 = vector.shape_cast %99 : vector<1x1x8x32xf32> to vector<8x32xf32>
    %cst_83 = arith.constant dense<0.000000e+00> : vector<8x32xf32>
    %101 = tpu.matmul %98, %100, %cst_83 {dimension_numbers = #tpu.dot_dimension_numbers<[1], [0], [0], [1], [0, 0, 1, 1], [], []>} : vector<8x8xf32>, vector<8x32xf32>, vector<8x32xf32> -> vector<8x32xf32>
    %102 = arith.addf %63, %101 : vector<8x32xf32>
    %c0_84 = arith.constant 0 : index
    %c2 = arith.constant 2 : index
    %c0_85 = arith.constant 0 : index
    %c0_86 = arith.constant 0 : index
    %103 = vector.load %arg5[%c0_84, %c2, %c0_85, %c0_86] : memref<2x4x32x8xf32, #tpu.memory_space<vmem>>, vector<1x1x32x8xf32>
    %104 = vector.shape_cast %103 : vector<1x1x32x8xf32> to vector<32x8xf32>
    %cst_87 = arith.constant dense<0.000000e+00> : vector<8x8xf32>
    %105 = tpu.matmul %25, %104, %cst_87 {dimension_numbers = #tpu.dot_dimension_numbers<[1], [0], [0], [1], [0, 0, 1, 1], [], []>} : vector<8x32xf32>, vector<32x8xf32>, vector<8x8xf32> -> vector<8x8xf32>
    %c0_88 = arith.constant 0 : index
    %c2_89 = arith.constant 2 : index
    %c0_90 = arith.constant 0 : index
    %c0_91 = arith.constant 0 : index
    %106 = vector.load %arg6[%c0_88, %c2_89, %c0_90, %c0_91] : memref<2x4x1x8xf32, #tpu.memory_space<vmem>>, vector<1x1x1x8xf32>
    %107 = vector.shape_cast %106 : vector<1x1x1x8xf32> to vector<1x8xf32>
    %108 = vector.broadcast %107 : vector<1x8xf32> to vector<8x8xf32>
    %109 = arith.addf %105, %108 : vector<8x8xf32>
    %c0_92 = arith.constant 0 : index
    %c2_93 = arith.constant 2 : index
    %c0_94 = arith.constant 0 : index
    %c0_95 = arith.constant 0 : index
    %110 = vector.load %arg7[%c0_92, %c2_93, %c0_94, %c0_95] : memref<2x4x32x8xf32, #tpu.memory_space<vmem>>, vector<1x1x32x8xf32>
    %111 = vector.shape_cast %110 : vector<1x1x32x8xf32> to vector<32x8xf32>
    %cst_96 = arith.constant dense<0.000000e+00> : vector<8x8xf32>
    %112 = tpu.matmul %25, %111, %cst_96 {dimension_numbers = #tpu.dot_dimension_numbers<[1], [0], [0], [1], [0, 0, 1, 1], [], []>} : vector<8x32xf32>, vector<32x8xf32>, vector<8x8xf32> -> vector<8x8xf32>
    %c0_97 = arith.constant 0 : index
    %c2_98 = arith.constant 2 : index
    %c0_99 = arith.constant 0 : index
    %c0_100 = arith.constant 0 : index
    %113 = vector.load %arg8[%c0_97, %c2_98, %c0_99, %c0_100] : memref<2x4x1x8xf32, #tpu.memory_space<vmem>>, vector<1x1x1x8xf32>
    %114 = vector.shape_cast %113 : vector<1x1x1x8xf32> to vector<1x8xf32>
    %115 = vector.broadcast %114 : vector<1x8xf32> to vector<8x8xf32>
    %116 = arith.addf %112, %115 : vector<8x8xf32>
    %c0_101 = arith.constant 0 : index
    %c2_102 = arith.constant 2 : index
    %c0_103 = arith.constant 0 : index
    %c0_104 = arith.constant 0 : index
    %117 = vector.load %arg9[%c0_101, %c2_102, %c0_103, %c0_104] : memref<2x4x32x8xf32, #tpu.memory_space<vmem>>, vector<1x1x32x8xf32>
    %118 = vector.shape_cast %117 : vector<1x1x32x8xf32> to vector<32x8xf32>
    %cst_105 = arith.constant dense<0.000000e+00> : vector<8x8xf32>
    %119 = tpu.matmul %25, %118, %cst_105 {dimension_numbers = #tpu.dot_dimension_numbers<[1], [0], [0], [1], [0, 0, 1, 1], [], []>} : vector<8x32xf32>, vector<32x8xf32>, vector<8x8xf32> -> vector<8x8xf32>
    %c0_106 = arith.constant 0 : index
    %c2_107 = arith.constant 2 : index
    %c0_108 = arith.constant 0 : index
    %c0_109 = arith.constant 0 : index
    %120 = vector.load %arg10[%c0_106, %c2_107, %c0_108, %c0_109] : memref<2x4x1x8xf32, #tpu.memory_space<vmem>>, vector<1x1x1x8xf32>
    %121 = vector.shape_cast %120 : vector<1x1x1x8xf32> to vector<1x8xf32>
    %122 = vector.broadcast %121 : vector<1x8xf32> to vector<8x8xf32>
    %123 = arith.addf %119, %122 : vector<8x8xf32>
    %124 = tpu.transpose %116, [1, 0] : vector<8x8xf32> -> vector<8x8xf32>
    %cst_110 = arith.constant dense<0.000000e+00> : vector<8x8xf32>
    %125 = tpu.matmul %109, %124, %cst_110 {dimension_numbers = #tpu.dot_dimension_numbers<[1], [0], [0], [1], [0, 0, 1, 1], [], []>} : vector<8x8xf32>, vector<8x8xf32>, vector<8x8xf32> -> vector<8x8xf32>
    %126 = vector.broadcast %3 : vector<1x8xf32> to vector<8x8xf32>
    %127 = arith.addf %125, %126 : vector<8x8xf32>
    %cst_111 = arith.constant dense<0xFF800000> : vector<8xf32>
    %128 = vector.multi_reduction <maximumf>, %127, %cst_111 [1] : vector<8x8xf32> to vector<8xf32>
    %129 = vector.shape_cast %128 : vector<8xf32> to vector<8x1xf32>
    %130 = vector.broadcast %129 : vector<8x1xf32> to vector<8x8xf32>
    %131 = arith.subf %127, %130 : vector<8x8xf32>
    %132 = math.exp %131 : vector<8x8xf32>
    %cst_112 = arith.constant dense<0.000000e+00> : vector<8xf32>
    %133 = vector.multi_reduction <add>, %132, %cst_112 [1] : vector<8x8xf32> to vector<8xf32>
    %134 = vector.shape_cast %133 : vector<8xf32> to vector<8x1xf32>
    %135 = vector.broadcast %134 : vector<8x1xf32> to vector<8x8xf32>
    %136 = arith.divf %132, %135 : vector<8x8xf32>
    %cst_113 = arith.constant dense<0.000000e+00> : vector<8x8xf32>
    %137 = tpu.matmul %136, %123, %cst_113 {dimension_numbers = #tpu.dot_dimension_numbers<[1], [0], [0], [1], [0, 0, 1, 1], [], []>} : vector<8x8xf32>, vector<8x8xf32>, vector<8x8xf32> -> vector<8x8xf32>
    %c0_114 = arith.constant 0 : index
    %c2_115 = arith.constant 2 : index
    %c0_116 = arith.constant 0 : index
    %c0_117 = arith.constant 0 : index
    %138 = vector.load %arg11[%c0_114, %c2_115, %c0_116, %c0_117] : memref<2x4x8x32xf32, #tpu.memory_space<vmem>>, vector<1x1x8x32xf32>
    %139 = vector.shape_cast %138 : vector<1x1x8x32xf32> to vector<8x32xf32>
    %cst_118 = arith.constant dense<0.000000e+00> : vector<8x32xf32>
    %140 = tpu.matmul %137, %139, %cst_118 {dimension_numbers = #tpu.dot_dimension_numbers<[1], [0], [0], [1], [0, 0, 1, 1], [], []>} : vector<8x8xf32>, vector<8x32xf32>, vector<8x32xf32> -> vector<8x32xf32>
    %141 = arith.addf %102, %140 : vector<8x32xf32>
    %c0_119 = arith.constant 0 : index
    %c3 = arith.constant 3 : index
    %c0_120 = arith.constant 0 : index
    %c0_121 = arith.constant 0 : index
    %142 = vector.load %arg5[%c0_119, %c3, %c0_120, %c0_121] : memref<2x4x32x8xf32, #tpu.memory_space<vmem>>, vector<1x1x32x8xf32>
    %143 = vector.shape_cast %142 : vector<1x1x32x8xf32> to vector<32x8xf32>
    %cst_122 = arith.constant dense<0.000000e+00> : vector<8x8xf32>
    %144 = tpu.matmul %25, %143, %cst_122 {dimension_numbers = #tpu.dot_dimension_numbers<[1], [0], [0], [1], [0, 0, 1, 1], [], []>} : vector<8x32xf32>, vector<32x8xf32>, vector<8x8xf32> -> vector<8x8xf32>
    %c0_123 = arith.constant 0 : index
    %c3_124 = arith.constant 3 : index
    %c0_125 = arith.constant 0 : index
    %c0_126 = arith.constant 0 : index
    %145 = vector.load %arg6[%c0_123, %c3_124, %c0_125, %c0_126] : memref<2x4x1x8xf32, #tpu.memory_space<vmem>>, vector<1x1x1x8xf32>
    %146 = vector.shape_cast %145 : vector<1x1x1x8xf32> to vector<1x8xf32>
    %147 = vector.broadcast %146 : vector<1x8xf32> to vector<8x8xf32>
    %148 = arith.addf %144, %147 : vector<8x8xf32>
    %c0_127 = arith.constant 0 : index
    %c3_128 = arith.constant 3 : index
    %c0_129 = arith.constant 0 : index
    %c0_130 = arith.constant 0 : index
    %149 = vector.load %arg7[%c0_127, %c3_128, %c0_129, %c0_130] : memref<2x4x32x8xf32, #tpu.memory_space<vmem>>, vector<1x1x32x8xf32>
    %150 = vector.shape_cast %149 : vector<1x1x32x8xf32> to vector<32x8xf32>
    %cst_131 = arith.constant dense<0.000000e+00> : vector<8x8xf32>
    %151 = tpu.matmul %25, %150, %cst_131 {dimension_numbers = #tpu.dot_dimension_numbers<[1], [0], [0], [1], [0, 0, 1, 1], [], []>} : vector<8x32xf32>, vector<32x8xf32>, vector<8x8xf32> -> vector<8x8xf32>
    %c0_132 = arith.constant 0 : index
    %c3_133 = arith.constant 3 : index
    %c0_134 = arith.constant 0 : index
    %c0_135 = arith.constant 0 : index
    %152 = vector.load %arg8[%c0_132, %c3_133, %c0_134, %c0_135] : memref<2x4x1x8xf32, #tpu.memory_space<vmem>>, vector<1x1x1x8xf32>
    %153 = vector.shape_cast %152 : vector<1x1x1x8xf32> to vector<1x8xf32>
    %154 = vector.broadcast %153 : vector<1x8xf32> to vector<8x8xf32>
    %155 = arith.addf %151, %154 : vector<8x8xf32>
    %c0_136 = arith.constant 0 : index
    %c3_137 = arith.constant 3 : index
    %c0_138 = arith.constant 0 : index
    %c0_139 = arith.constant 0 : index
    %156 = vector.load %arg9[%c0_136, %c3_137, %c0_138, %c0_139] : memref<2x4x32x8xf32, #tpu.memory_space<vmem>>, vector<1x1x32x8xf32>
    %157 = vector.shape_cast %156 : vector<1x1x32x8xf32> to vector<32x8xf32>
    %cst_140 = arith.constant dense<0.000000e+00> : vector<8x8xf32>
    %158 = tpu.matmul %25, %157, %cst_140 {dimension_numbers = #tpu.dot_dimension_numbers<[1], [0], [0], [1], [0, 0, 1, 1], [], []>} : vector<8x32xf32>, vector<32x8xf32>, vector<8x8xf32> -> vector<8x8xf32>
    %c0_141 = arith.constant 0 : index
    %c3_142 = arith.constant 3 : index
    %c0_143 = arith.constant 0 : index
    %c0_144 = arith.constant 0 : index
    %159 = vector.load %arg10[%c0_141, %c3_142, %c0_143, %c0_144] : memref<2x4x1x8xf32, #tpu.memory_space<vmem>>, vector<1x1x1x8xf32>
    %160 = vector.shape_cast %159 : vector<1x1x1x8xf32> to vector<1x8xf32>
    %161 = vector.broadcast %160 : vector<1x8xf32> to vector<8x8xf32>
    %162 = arith.addf %158, %161 : vector<8x8xf32>
    %163 = tpu.transpose %155, [1, 0] : vector<8x8xf32> -> vector<8x8xf32>
    %cst_145 = arith.constant dense<0.000000e+00> : vector<8x8xf32>
    %164 = tpu.matmul %148, %163, %cst_145 {dimension_numbers = #tpu.dot_dimension_numbers<[1], [0], [0], [1], [0, 0, 1, 1], [], []>} : vector<8x8xf32>, vector<8x8xf32>, vector<8x8xf32> -> vector<8x8xf32>
    %165 = vector.broadcast %3 : vector<1x8xf32> to vector<8x8xf32>
    %166 = arith.addf %164, %165 : vector<8x8xf32>
    %cst_146 = arith.constant dense<0xFF800000> : vector<8xf32>
    %167 = vector.multi_reduction <maximumf>, %166, %cst_146 [1] : vector<8x8xf32> to vector<8xf32>
    %168 = vector.shape_cast %167 : vector<8xf32> to vector<8x1xf32>
    %169 = vector.broadcast %168 : vector<8x1xf32> to vector<8x8xf32>
    %170 = arith.subf %166, %169 : vector<8x8xf32>
    %171 = math.exp %170 : vector<8x8xf32>
    %cst_147 = arith.constant dense<0.000000e+00> : vector<8xf32>
    %172 = vector.multi_reduction <add>, %171, %cst_147 [1] : vector<8x8xf32> to vector<8xf32>
    %173 = vector.shape_cast %172 : vector<8xf32> to vector<8x1xf32>
    %174 = vector.broadcast %173 : vector<8x1xf32> to vector<8x8xf32>
    %175 = arith.divf %171, %174 : vector<8x8xf32>
    %cst_148 = arith.constant dense<0.000000e+00> : vector<8x8xf32>
    %176 = tpu.matmul %175, %162, %cst_148 {dimension_numbers = #tpu.dot_dimension_numbers<[1], [0], [0], [1], [0, 0, 1, 1], [], []>} : vector<8x8xf32>, vector<8x8xf32>, vector<8x8xf32> -> vector<8x8xf32>
    %c0_149 = arith.constant 0 : index
    %c3_150 = arith.constant 3 : index
    %c0_151 = arith.constant 0 : index
    %c0_152 = arith.constant 0 : index
    %177 = vector.load %arg11[%c0_149, %c3_150, %c0_151, %c0_152] : memref<2x4x8x32xf32, #tpu.memory_space<vmem>>, vector<1x1x8x32xf32>
    %178 = vector.shape_cast %177 : vector<1x1x8x32xf32> to vector<8x32xf32>
    %cst_153 = arith.constant dense<0.000000e+00> : vector<8x32xf32>
    %179 = tpu.matmul %176, %178, %cst_153 {dimension_numbers = #tpu.dot_dimension_numbers<[1], [0], [0], [1], [0, 0, 1, 1], [], []>} : vector<8x8xf32>, vector<8x32xf32>, vector<8x32xf32> -> vector<8x32xf32>
    %180 = arith.addf %141, %179 : vector<8x32xf32>
    %c0_154 = arith.constant 0 : index
    %c0_155 = arith.constant 0 : index
    %c0_156 = arith.constant 0 : index
    %181 = vector.load %arg12[%c0_154, %c0_155, %c0_156] : memref<2x1x32xf32, #tpu.memory_space<vmem>>, vector<1x1x32xf32>
    %182 = vector.shape_cast %181 : vector<1x1x32xf32> to vector<1x32xf32>
    %183 = vector.broadcast %182 : vector<1x32xf32> to vector<8x32xf32>
    %184 = arith.addf %180, %183 : vector<8x32xf32>
    %185 = arith.addf %184, %25 : vector<8x32xf32>
    %c0_157 = arith.constant 0 : index
    %c0_158 = arith.constant 0 : index
    %c0_159 = arith.constant 0 : index
    %186 = vector.load %arg13[%c0_157, %c0_158, %c0_159] : memref<2x1x32xf32, #tpu.memory_space<vmem>>, vector<1x1x32xf32>
    %187 = vector.shape_cast %186 : vector<1x1x32xf32> to vector<1x32xf32>
    %c0_160 = arith.constant 0 : index
    %c0_161 = arith.constant 0 : index
    %c0_162 = arith.constant 0 : index
    %188 = vector.load %arg14[%c0_160, %c0_161, %c0_162] : memref<2x1x32xf32, #tpu.memory_space<vmem>>, vector<1x1x32xf32>
    %189 = vector.shape_cast %188 : vector<1x1x32xf32> to vector<1x32xf32>
    %cst_163 = arith.constant dense<0.000000e+00> : vector<8xf32>
    %190 = vector.multi_reduction <add>, %185, %cst_163 [1] : vector<8x32xf32> to vector<8xf32>
    %191 = vector.shape_cast %190 : vector<8xf32> to vector<8x1xf32>
    %cst_164 = arith.constant 3.200000e+01 : f32
    %192 = vector.broadcast %cst_164 : f32 to vector<8x1xf32>
    %193 = arith.divf %191, %192 : vector<8x1xf32>
    %194 = vector.broadcast %193 : vector<8x1xf32> to vector<8x32xf32>
    %195 = arith.subf %185, %194 : vector<8x32xf32>
    %196 = arith.mulf %195, %195 : vector<8x32xf32>
    %cst_165 = arith.constant dense<0.000000e+00> : vector<8xf32>
    %197 = vector.multi_reduction <add>, %196, %cst_165 [1] : vector<8x32xf32> to vector<8xf32>
    %198 = vector.shape_cast %197 : vector<8xf32> to vector<8x1xf32>
    %cst_166 = arith.constant 3.200000e+01 : f32
    %199 = vector.broadcast %cst_166 : f32 to vector<8x1xf32>
    %200 = arith.divf %198, %199 : vector<8x1xf32>
    %cst_167 = arith.constant 9.99999974E-6 : f32
    %201 = vector.broadcast %cst_167 : f32 to vector<8x1xf32>
    %202 = arith.addf %200, %201 : vector<8x1xf32>
    %203 = math.rsqrt %202 : vector<8x1xf32>
    %204 = vector.broadcast %203 : vector<8x1xf32> to vector<8x32xf32>
    %205 = arith.mulf %195, %204 : vector<8x32xf32>
    %206 = vector.broadcast %187 : vector<1x32xf32> to vector<8x32xf32>
    %207 = arith.mulf %205, %206 : vector<8x32xf32>
    %208 = vector.broadcast %189 : vector<1x32xf32> to vector<8x32xf32>
    %209 = arith.addf %207, %208 : vector<8x32xf32>
    %c0_168 = arith.constant 0 : index
    %c0_169 = arith.constant 0 : index
    %c0_170 = arith.constant 0 : index
    %210 = vector.load %arg15[%c0_168, %c0_169, %c0_170] : memref<2x32x64xf32, #tpu.memory_space<vmem>>, vector<1x32x64xf32>
    %211 = vector.shape_cast %210 : vector<1x32x64xf32> to vector<32x64xf32>
    %cst_171 = arith.constant dense<0.000000e+00> : vector<8x64xf32>
    %212 = tpu.matmul %209, %211, %cst_171 {dimension_numbers = #tpu.dot_dimension_numbers<[1], [0], [0], [1], [0, 0, 1, 1], [], []>} : vector<8x32xf32>, vector<32x64xf32>, vector<8x64xf32> -> vector<8x64xf32>
    %c0_172 = arith.constant 0 : index
    %c0_173 = arith.constant 0 : index
    %c0_174 = arith.constant 0 : index
    %213 = vector.load %arg16[%c0_172, %c0_173, %c0_174] : memref<2x1x64xf32, #tpu.memory_space<vmem>>, vector<1x1x64xf32>
    %214 = vector.shape_cast %213 : vector<1x1x64xf32> to vector<1x64xf32>
    %215 = vector.broadcast %214 : vector<1x64xf32> to vector<8x64xf32>
    %216 = arith.addf %212, %215 : vector<8x64xf32>
    %cst_175 = arith.constant 5.000000e-01 : f32
    %217 = vector.broadcast %cst_175 : f32 to vector<8x64xf32>
    %218 = arith.mulf %217, %216 : vector<8x64xf32>
    %cst_176 = arith.constant 4.471500e-02 : f32
    %219 = vector.broadcast %cst_176 : f32 to vector<8x64xf32>
    %220 = arith.mulf %219, %216 : vector<8x64xf32>
    %221 = arith.mulf %220, %216 : vector<8x64xf32>
    %222 = arith.mulf %221, %216 : vector<8x64xf32>
    %223 = arith.addf %216, %222 : vector<8x64xf32>
    %cst_177 = arith.constant 0.797884583 : f32
    %224 = vector.broadcast %cst_177 : f32 to vector<8x64xf32>
    %225 = arith.mulf %224, %223 : vector<8x64xf32>
    %226 = math.tanh %225 : vector<8x64xf32>
    %cst_178 = arith.constant 1.000000e+00 : f32
    %227 = vector.broadcast %cst_178 : f32 to vector<8x64xf32>
    %228 = arith.addf %227, %226 : vector<8x64xf32>
    %229 = arith.mulf %218, %228 : vector<8x64xf32>
    %c0_179 = arith.constant 0 : index
    %c0_180 = arith.constant 0 : index
    %c0_181 = arith.constant 0 : index
    %230 = vector.load %arg17[%c0_179, %c0_180, %c0_181] : memref<2x64x32xf32, #tpu.memory_space<vmem>>, vector<1x64x32xf32>
    %231 = vector.shape_cast %230 : vector<1x64x32xf32> to vector<64x32xf32>
    %cst_182 = arith.constant dense<0.000000e+00> : vector<8x32xf32>
    %232 = tpu.matmul %229, %231, %cst_182 {dimension_numbers = #tpu.dot_dimension_numbers<[1], [0], [0], [1], [0, 0, 1, 1], [], []>} : vector<8x64xf32>, vector<64x32xf32>, vector<8x32xf32> -> vector<8x32xf32>
    %c0_183 = arith.constant 0 : index
    %c0_184 = arith.constant 0 : index
    %c0_185 = arith.constant 0 : index
    %233 = vector.load %arg18[%c0_183, %c0_184, %c0_185] : memref<2x1x32xf32, #tpu.memory_space<vmem>>, vector<1x1x32xf32>
    %234 = vector.shape_cast %233 : vector<1x1x32xf32> to vector<1x32xf32>
    %235 = vector.broadcast %234 : vector<1x32xf32> to vector<8x32xf32>
    %236 = arith.addf %232, %235 : vector<8x32xf32>
    %237 = arith.addf %236, %209 : vector<8x32xf32>
    %c0_186 = arith.constant 0 : index
    %c0_187 = arith.constant 0 : index
    %c0_188 = arith.constant 0 : index
    %238 = vector.load %arg19[%c0_186, %c0_187, %c0_188] : memref<2x1x32xf32, #tpu.memory_space<vmem>>, vector<1x1x32xf32>
    %239 = vector.shape_cast %238 : vector<1x1x32xf32> to vector<1x32xf32>
    %c0_189 = arith.constant 0 : index
    %c0_190 = arith.constant 0 : index
    %c0_191 = arith.constant 0 : index
    %240 = vector.load %arg20[%c0_189, %c0_190, %c0_191] : memref<2x1x32xf32, #tpu.memory_space<vmem>>, vector<1x1x32xf32>
    %241 = vector.shape_cast %240 : vector<1x1x32xf32> to vector<1x32xf32>
    %cst_192 = arith.constant dense<0.000000e+00> : vector<8xf32>
    %242 = vector.multi_reduction <add>, %237, %cst_192 [1] : vector<8x32xf32> to vector<8xf32>
    %243 = vector.shape_cast %242 : vector<8xf32> to vector<8x1xf32>
    %cst_193 = arith.constant 3.200000e+01 : f32
    %244 = vector.broadcast %cst_193 : f32 to vector<8x1xf32>
    %245 = arith.divf %243, %244 : vector<8x1xf32>
    %246 = vector.broadcast %245 : vector<8x1xf32> to vector<8x32xf32>
    %247 = arith.subf %237, %246 : vector<8x32xf32>
    %248 = arith.mulf %247, %247 : vector<8x32xf32>
    %cst_194 = arith.constant dense<0.000000e+00> : vector<8xf32>
    %249 = vector.multi_reduction <add>, %248, %cst_194 [1] : vector<8x32xf32> to vector<8xf32>
    %250 = vector.shape_cast %249 : vector<8xf32> to vector<8x1xf32>
    %cst_195 = arith.constant 3.200000e+01 : f32
    %251 = vector.broadcast %cst_195 : f32 to vector<8x1xf32>
    %252 = arith.divf %250, %251 : vector<8x1xf32>
    %cst_196 = arith.constant 9.99999974E-6 : f32
    %253 = vector.broadcast %cst_196 : f32 to vector<8x1xf32>
    %254 = arith.addf %252, %253 : vector<8x1xf32>
    %255 = math.rsqrt %254 : vector<8x1xf32>
    %256 = vector.broadcast %255 : vector<8x1xf32> to vector<8x32xf32>
    %257 = arith.mulf %247, %256 : vector<8x32xf32>
    %258 = vector.broadcast %239 : vector<1x32xf32> to vector<8x32xf32>
    %259 = arith.mulf %257, %258 : vector<8x32xf32>
    %260 = vector.broadcast %241 : vector<1x32xf32> to vector<8x32xf32>
    %261 = arith.addf %259, %260 : vector<8x32xf32>
    %c1_197 = arith.constant 1 : index
    %c0_198 = arith.constant 0 : index
    %c0_199 = arith.constant 0 : index
    %c0_200 = arith.constant 0 : index
    %262 = vector.load %arg5[%c1_197, %c0_198, %c0_199, %c0_200] : memref<2x4x32x8xf32, #tpu.memory_space<vmem>>, vector<1x1x32x8xf32>
    %263 = vector.shape_cast %262 : vector<1x1x32x8xf32> to vector<32x8xf32>
    %cst_201 = arith.constant dense<0.000000e+00> : vector<8x8xf32>
    %264 = tpu.matmul %261, %263, %cst_201 {dimension_numbers = #tpu.dot_dimension_numbers<[1], [0], [0], [1], [0, 0, 1, 1], [], []>} : vector<8x32xf32>, vector<32x8xf32>, vector<8x8xf32> -> vector<8x8xf32>
    %c1_202 = arith.constant 1 : index
    %c0_203 = arith.constant 0 : index
    %c0_204 = arith.constant 0 : index
    %c0_205 = arith.constant 0 : index
    %265 = vector.load %arg6[%c1_202, %c0_203, %c0_204, %c0_205] : memref<2x4x1x8xf32, #tpu.memory_space<vmem>>, vector<1x1x1x8xf32>
    %266 = vector.shape_cast %265 : vector<1x1x1x8xf32> to vector<1x8xf32>
    %267 = vector.broadcast %266 : vector<1x8xf32> to vector<8x8xf32>
    %268 = arith.addf %264, %267 : vector<8x8xf32>
    %c1_206 = arith.constant 1 : index
    %c0_207 = arith.constant 0 : index
    %c0_208 = arith.constant 0 : index
    %c0_209 = arith.constant 0 : index
    %269 = vector.load %arg7[%c1_206, %c0_207, %c0_208, %c0_209] : memref<2x4x32x8xf32, #tpu.memory_space<vmem>>, vector<1x1x32x8xf32>
    %270 = vector.shape_cast %269 : vector<1x1x32x8xf32> to vector<32x8xf32>
    %cst_210 = arith.constant dense<0.000000e+00> : vector<8x8xf32>
    %271 = tpu.matmul %261, %270, %cst_210 {dimension_numbers = #tpu.dot_dimension_numbers<[1], [0], [0], [1], [0, 0, 1, 1], [], []>} : vector<8x32xf32>, vector<32x8xf32>, vector<8x8xf32> -> vector<8x8xf32>
    %c1_211 = arith.constant 1 : index
    %c0_212 = arith.constant 0 : index
    %c0_213 = arith.constant 0 : index
    %c0_214 = arith.constant 0 : index
    %272 = vector.load %arg8[%c1_211, %c0_212, %c0_213, %c0_214] : memref<2x4x1x8xf32, #tpu.memory_space<vmem>>, vector<1x1x1x8xf32>
    %273 = vector.shape_cast %272 : vector<1x1x1x8xf32> to vector<1x8xf32>
    %274 = vector.broadcast %273 : vector<1x8xf32> to vector<8x8xf32>
    %275 = arith.addf %271, %274 : vector<8x8xf32>
    %c1_215 = arith.constant 1 : index
    %c0_216 = arith.constant 0 : index
    %c0_217 = arith.constant 0 : index
    %c0_218 = arith.constant 0 : index
    %276 = vector.load %arg9[%c1_215, %c0_216, %c0_217, %c0_218] : memref<2x4x32x8xf32, #tpu.memory_space<vmem>>, vector<1x1x32x8xf32>
    %277 = vector.shape_cast %276 : vector<1x1x32x8xf32> to vector<32x8xf32>
    %cst_219 = arith.constant dense<0.000000e+00> : vector<8x8xf32>
    %278 = tpu.matmul %261, %277, %cst_219 {dimension_numbers = #tpu.dot_dimension_numbers<[1], [0], [0], [1], [0, 0, 1, 1], [], []>} : vector<8x32xf32>, vector<32x8xf32>, vector<8x8xf32> -> vector<8x8xf32>
    %c1_220 = arith.constant 1 : index
    %c0_221 = arith.constant 0 : index
    %c0_222 = arith.constant 0 : index
    %c0_223 = arith.constant 0 : index
    %279 = vector.load %arg10[%c1_220, %c0_221, %c0_222, %c0_223] : memref<2x4x1x8xf32, #tpu.memory_space<vmem>>, vector<1x1x1x8xf32>
    %280 = vector.shape_cast %279 : vector<1x1x1x8xf32> to vector<1x8xf32>
    %281 = vector.broadcast %280 : vector<1x8xf32> to vector<8x8xf32>
    %282 = arith.addf %278, %281 : vector<8x8xf32>
    %283 = tpu.transpose %275, [1, 0] : vector<8x8xf32> -> vector<8x8xf32>
    %cst_224 = arith.constant dense<0.000000e+00> : vector<8x8xf32>
    %284 = tpu.matmul %268, %283, %cst_224 {dimension_numbers = #tpu.dot_dimension_numbers<[1], [0], [0], [1], [0, 0, 1, 1], [], []>} : vector<8x8xf32>, vector<8x8xf32>, vector<8x8xf32> -> vector<8x8xf32>
    %285 = vector.broadcast %3 : vector<1x8xf32> to vector<8x8xf32>
    %286 = arith.addf %284, %285 : vector<8x8xf32>
    %cst_225 = arith.constant dense<0xFF800000> : vector<8xf32>
    %287 = vector.multi_reduction <maximumf>, %286, %cst_225 [1] : vector<8x8xf32> to vector<8xf32>
    %288 = vector.shape_cast %287 : vector<8xf32> to vector<8x1xf32>
    %289 = vector.broadcast %288 : vector<8x1xf32> to vector<8x8xf32>
    %290 = arith.subf %286, %289 : vector<8x8xf32>
    %291 = math.exp %290 : vector<8x8xf32>
    %cst_226 = arith.constant dense<0.000000e+00> : vector<8xf32>
    %292 = vector.multi_reduction <add>, %291, %cst_226 [1] : vector<8x8xf32> to vector<8xf32>
    %293 = vector.shape_cast %292 : vector<8xf32> to vector<8x1xf32>
    %294 = vector.broadcast %293 : vector<8x1xf32> to vector<8x8xf32>
    %295 = arith.divf %291, %294 : vector<8x8xf32>
    %cst_227 = arith.constant dense<0.000000e+00> : vector<8x8xf32>
    %296 = tpu.matmul %295, %282, %cst_227 {dimension_numbers = #tpu.dot_dimension_numbers<[1], [0], [0], [1], [0, 0, 1, 1], [], []>} : vector<8x8xf32>, vector<8x8xf32>, vector<8x8xf32> -> vector<8x8xf32>
    %c1_228 = arith.constant 1 : index
    %c0_229 = arith.constant 0 : index
    %c0_230 = arith.constant 0 : index
    %c0_231 = arith.constant 0 : index
    %297 = vector.load %arg11[%c1_228, %c0_229, %c0_230, %c0_231] : memref<2x4x8x32xf32, #tpu.memory_space<vmem>>, vector<1x1x8x32xf32>
    %298 = vector.shape_cast %297 : vector<1x1x8x32xf32> to vector<8x32xf32>
    %cst_232 = arith.constant dense<0.000000e+00> : vector<8x32xf32>
    %299 = tpu.matmul %296, %298, %cst_232 {dimension_numbers = #tpu.dot_dimension_numbers<[1], [0], [0], [1], [0, 0, 1, 1], [], []>} : vector<8x8xf32>, vector<8x32xf32>, vector<8x32xf32> -> vector<8x32xf32>
    %c1_233 = arith.constant 1 : index
    %c1_234 = arith.constant 1 : index
    %c0_235 = arith.constant 0 : index
    %c0_236 = arith.constant 0 : index
    %300 = vector.load %arg5[%c1_233, %c1_234, %c0_235, %c0_236] : memref<2x4x32x8xf32, #tpu.memory_space<vmem>>, vector<1x1x32x8xf32>
    %301 = vector.shape_cast %300 : vector<1x1x32x8xf32> to vector<32x8xf32>
    %cst_237 = arith.constant dense<0.000000e+00> : vector<8x8xf32>
    %302 = tpu.matmul %261, %301, %cst_237 {dimension_numbers = #tpu.dot_dimension_numbers<[1], [0], [0], [1], [0, 0, 1, 1], [], []>} : vector<8x32xf32>, vector<32x8xf32>, vector<8x8xf32> -> vector<8x8xf32>
    %c1_238 = arith.constant 1 : index
    %c1_239 = arith.constant 1 : index
    %c0_240 = arith.constant 0 : index
    %c0_241 = arith.constant 0 : index
    %303 = vector.load %arg6[%c1_238, %c1_239, %c0_240, %c0_241] : memref<2x4x1x8xf32, #tpu.memory_space<vmem>>, vector<1x1x1x8xf32>
    %304 = vector.shape_cast %303 : vector<1x1x1x8xf32> to vector<1x8xf32>
    %305 = vector.broadcast %304 : vector<1x8xf32> to vector<8x8xf32>
    %306 = arith.addf %302, %305 : vector<8x8xf32>
    %c1_242 = arith.constant 1 : index
    %c1_243 = arith.constant 1 : index
    %c0_244 = arith.constant 0 : index
    %c0_245 = arith.constant 0 : index
    %307 = vector.load %arg7[%c1_242, %c1_243, %c0_244, %c0_245] : memref<2x4x32x8xf32, #tpu.memory_space<vmem>>, vector<1x1x32x8xf32>
    %308 = vector.shape_cast %307 : vector<1x1x32x8xf32> to vector<32x8xf32>
    %cst_246 = arith.constant dense<0.000000e+00> : vector<8x8xf32>
    %309 = tpu.matmul %261, %308, %cst_246 {dimension_numbers = #tpu.dot_dimension_numbers<[1], [0], [0], [1], [0, 0, 1, 1], [], []>} : vector<8x32xf32>, vector<32x8xf32>, vector<8x8xf32> -> vector<8x8xf32>
    %c1_247 = arith.constant 1 : index
    %c1_248 = arith.constant 1 : index
    %c0_249 = arith.constant 0 : index
    %c0_250 = arith.constant 0 : index
    %310 = vector.load %arg8[%c1_247, %c1_248, %c0_249, %c0_250] : memref<2x4x1x8xf32, #tpu.memory_space<vmem>>, vector<1x1x1x8xf32>
    %311 = vector.shape_cast %310 : vector<1x1x1x8xf32> to vector<1x8xf32>
    %312 = vector.broadcast %311 : vector<1x8xf32> to vector<8x8xf32>
    %313 = arith.addf %309, %312 : vector<8x8xf32>
    %c1_251 = arith.constant 1 : index
    %c1_252 = arith.constant 1 : index
    %c0_253 = arith.constant 0 : index
    %c0_254 = arith.constant 0 : index
    %314 = vector.load %arg9[%c1_251, %c1_252, %c0_253, %c0_254] : memref<2x4x32x8xf32, #tpu.memory_space<vmem>>, vector<1x1x32x8xf32>
    %315 = vector.shape_cast %314 : vector<1x1x32x8xf32> to vector<32x8xf32>
    %cst_255 = arith.constant dense<0.000000e+00> : vector<8x8xf32>
    %316 = tpu.matmul %261, %315, %cst_255 {dimension_numbers = #tpu.dot_dimension_numbers<[1], [0], [0], [1], [0, 0, 1, 1], [], []>} : vector<8x32xf32>, vector<32x8xf32>, vector<8x8xf32> -> vector<8x8xf32>
    %c1_256 = arith.constant 1 : index
    %c1_257 = arith.constant 1 : index
    %c0_258 = arith.constant 0 : index
    %c0_259 = arith.constant 0 : index
    %317 = vector.load %arg10[%c1_256, %c1_257, %c0_258, %c0_259] : memref<2x4x1x8xf32, #tpu.memory_space<vmem>>, vector<1x1x1x8xf32>
    %318 = vector.shape_cast %317 : vector<1x1x1x8xf32> to vector<1x8xf32>
    %319 = vector.broadcast %318 : vector<1x8xf32> to vector<8x8xf32>
    %320 = arith.addf %316, %319 : vector<8x8xf32>
    %321 = tpu.transpose %313, [1, 0] : vector<8x8xf32> -> vector<8x8xf32>
    %cst_260 = arith.constant dense<0.000000e+00> : vector<8x8xf32>
    %322 = tpu.matmul %306, %321, %cst_260 {dimension_numbers = #tpu.dot_dimension_numbers<[1], [0], [0], [1], [0, 0, 1, 1], [], []>} : vector<8x8xf32>, vector<8x8xf32>, vector<8x8xf32> -> vector<8x8xf32>
    %323 = vector.broadcast %3 : vector<1x8xf32> to vector<8x8xf32>
    %324 = arith.addf %322, %323 : vector<8x8xf32>
    %cst_261 = arith.constant dense<0xFF800000> : vector<8xf32>
    %325 = vector.multi_reduction <maximumf>, %324, %cst_261 [1] : vector<8x8xf32> to vector<8xf32>
    %326 = vector.shape_cast %325 : vector<8xf32> to vector<8x1xf32>
    %327 = vector.broadcast %326 : vector<8x1xf32> to vector<8x8xf32>
    %328 = arith.subf %324, %327 : vector<8x8xf32>
    %329 = math.exp %328 : vector<8x8xf32>
    %cst_262 = arith.constant dense<0.000000e+00> : vector<8xf32>
    %330 = vector.multi_reduction <add>, %329, %cst_262 [1] : vector<8x8xf32> to vector<8xf32>
    %331 = vector.shape_cast %330 : vector<8xf32> to vector<8x1xf32>
    %332 = vector.broadcast %331 : vector<8x1xf32> to vector<8x8xf32>
    %333 = arith.divf %329, %332 : vector<8x8xf32>
    %cst_263 = arith.constant dense<0.000000e+00> : vector<8x8xf32>
    %334 = tpu.matmul %333, %320, %cst_263 {dimension_numbers = #tpu.dot_dimension_numbers<[1], [0], [0], [1], [0, 0, 1, 1], [], []>} : vector<8x8xf32>, vector<8x8xf32>, vector<8x8xf32> -> vector<8x8xf32>
    %c1_264 = arith.constant 1 : index
    %c1_265 = arith.constant 1 : index
    %c0_266 = arith.constant 0 : index
    %c0_267 = arith.constant 0 : index
    %335 = vector.load %arg11[%c1_264, %c1_265, %c0_266, %c0_267] : memref<2x4x8x32xf32, #tpu.memory_space<vmem>>, vector<1x1x8x32xf32>
    %336 = vector.shape_cast %335 : vector<1x1x8x32xf32> to vector<8x32xf32>
    %cst_268 = arith.constant dense<0.000000e+00> : vector<8x32xf32>
    %337 = tpu.matmul %334, %336, %cst_268 {dimension_numbers = #tpu.dot_dimension_numbers<[1], [0], [0], [1], [0, 0, 1, 1], [], []>} : vector<8x8xf32>, vector<8x32xf32>, vector<8x32xf32> -> vector<8x32xf32>
    %338 = arith.addf %299, %337 : vector<8x32xf32>
    %c1_269 = arith.constant 1 : index
    %c2_270 = arith.constant 2 : index
    %c0_271 = arith.constant 0 : index
    %c0_272 = arith.constant 0 : index
    %339 = vector.load %arg5[%c1_269, %c2_270, %c0_271, %c0_272] : memref<2x4x32x8xf32, #tpu.memory_space<vmem>>, vector<1x1x32x8xf32>
    %340 = vector.shape_cast %339 : vector<1x1x32x8xf32> to vector<32x8xf32>
    %cst_273 = arith.constant dense<0.000000e+00> : vector<8x8xf32>
    %341 = tpu.matmul %261, %340, %cst_273 {dimension_numbers = #tpu.dot_dimension_numbers<[1], [0], [0], [1], [0, 0, 1, 1], [], []>} : vector<8x32xf32>, vector<32x8xf32>, vector<8x8xf32> -> vector<8x8xf32>
    %c1_274 = arith.constant 1 : index
    %c2_275 = arith.constant 2 : index
    %c0_276 = arith.constant 0 : index
    %c0_277 = arith.constant 0 : index
    %342 = vector.load %arg6[%c1_274, %c2_275, %c0_276, %c0_277] : memref<2x4x1x8xf32, #tpu.memory_space<vmem>>, vector<1x1x1x8xf32>
    %343 = vector.shape_cast %342 : vector<1x1x1x8xf32> to vector<1x8xf32>
    %344 = vector.broadcast %343 : vector<1x8xf32> to vector<8x8xf32>
    %345 = arith.addf %341, %344 : vector<8x8xf32>
    %c1_278 = arith.constant 1 : index
    %c2_279 = arith.constant 2 : index
    %c0_280 = arith.constant 0 : index
    %c0_281 = arith.constant 0 : index
    %346 = vector.load %arg7[%c1_278, %c2_279, %c0_280, %c0_281] : memref<2x4x32x8xf32, #tpu.memory_space<vmem>>, vector<1x1x32x8xf32>
    %347 = vector.shape_cast %346 : vector<1x1x32x8xf32> to vector<32x8xf32>
    %cst_282 = arith.constant dense<0.000000e+00> : vector<8x8xf32>
    %348 = tpu.matmul %261, %347, %cst_282 {dimension_numbers = #tpu.dot_dimension_numbers<[1], [0], [0], [1], [0, 0, 1, 1], [], []>} : vector<8x32xf32>, vector<32x8xf32>, vector<8x8xf32> -> vector<8x8xf32>
    %c1_283 = arith.constant 1 : index
    %c2_284 = arith.constant 2 : index
    %c0_285 = arith.constant 0 : index
    %c0_286 = arith.constant 0 : index
    %349 = vector.load %arg8[%c1_283, %c2_284, %c0_285, %c0_286] : memref<2x4x1x8xf32, #tpu.memory_space<vmem>>, vector<1x1x1x8xf32>
    %350 = vector.shape_cast %349 : vector<1x1x1x8xf32> to vector<1x8xf32>
    %351 = vector.broadcast %350 : vector<1x8xf32> to vector<8x8xf32>
    %352 = arith.addf %348, %351 : vector<8x8xf32>
    %c1_287 = arith.constant 1 : index
    %c2_288 = arith.constant 2 : index
    %c0_289 = arith.constant 0 : index
    %c0_290 = arith.constant 0 : index
    %353 = vector.load %arg9[%c1_287, %c2_288, %c0_289, %c0_290] : memref<2x4x32x8xf32, #tpu.memory_space<vmem>>, vector<1x1x32x8xf32>
    %354 = vector.shape_cast %353 : vector<1x1x32x8xf32> to vector<32x8xf32>
    %cst_291 = arith.constant dense<0.000000e+00> : vector<8x8xf32>
    %355 = tpu.matmul %261, %354, %cst_291 {dimension_numbers = #tpu.dot_dimension_numbers<[1], [0], [0], [1], [0, 0, 1, 1], [], []>} : vector<8x32xf32>, vector<32x8xf32>, vector<8x8xf32> -> vector<8x8xf32>
    %c1_292 = arith.constant 1 : index
    %c2_293 = arith.constant 2 : index
    %c0_294 = arith.constant 0 : index
    %c0_295 = arith.constant 0 : index
    %356 = vector.load %arg10[%c1_292, %c2_293, %c0_294, %c0_295] : memref<2x4x1x8xf32, #tpu.memory_space<vmem>>, vector<1x1x1x8xf32>
    %357 = vector.shape_cast %356 : vector<1x1x1x8xf32> to vector<1x8xf32>
    %358 = vector.broadcast %357 : vector<1x8xf32> to vector<8x8xf32>
    %359 = arith.addf %355, %358 : vector<8x8xf32>
    %360 = tpu.transpose %352, [1, 0] : vector<8x8xf32> -> vector<8x8xf32>
    %cst_296 = arith.constant dense<0.000000e+00> : vector<8x8xf32>
    %361 = tpu.matmul %345, %360, %cst_296 {dimension_numbers = #tpu.dot_dimension_numbers<[1], [0], [0], [1], [0, 0, 1, 1], [], []>} : vector<8x8xf32>, vector<8x8xf32>, vector<8x8xf32> -> vector<8x8xf32>
    %362 = vector.broadcast %3 : vector<1x8xf32> to vector<8x8xf32>
    %363 = arith.addf %361, %362 : vector<8x8xf32>
    %cst_297 = arith.constant dense<0xFF800000> : vector<8xf32>
    %364 = vector.multi_reduction <maximumf>, %363, %cst_297 [1] : vector<8x8xf32> to vector<8xf32>
    %365 = vector.shape_cast %364 : vector<8xf32> to vector<8x1xf32>
    %366 = vector.broadcast %365 : vector<8x1xf32> to vector<8x8xf32>
    %367 = arith.subf %363, %366 : vector<8x8xf32>
    %368 = math.exp %367 : vector<8x8xf32>
    %cst_298 = arith.constant dense<0.000000e+00> : vector<8xf32>
    %369 = vector.multi_reduction <add>, %368, %cst_298 [1] : vector<8x8xf32> to vector<8xf32>
    %370 = vector.shape_cast %369 : vector<8xf32> to vector<8x1xf32>
    %371 = vector.broadcast %370 : vector<8x1xf32> to vector<8x8xf32>
    %372 = arith.divf %368, %371 : vector<8x8xf32>
    %cst_299 = arith.constant dense<0.000000e+00> : vector<8x8xf32>
    %373 = tpu.matmul %372, %359, %cst_299 {dimension_numbers = #tpu.dot_dimension_numbers<[1], [0], [0], [1], [0, 0, 1, 1], [], []>} : vector<8x8xf32>, vector<8x8xf32>, vector<8x8xf32> -> vector<8x8xf32>
    %c1_300 = arith.constant 1 : index
    %c2_301 = arith.constant 2 : index
    %c0_302 = arith.constant 0 : index
    %c0_303 = arith.constant 0 : index
    %374 = vector.load %arg11[%c1_300, %c2_301, %c0_302, %c0_303] : memref<2x4x8x32xf32, #tpu.memory_space<vmem>>, vector<1x1x8x32xf32>
    %375 = vector.shape_cast %374 : vector<1x1x8x32xf32> to vector<8x32xf32>
    %cst_304 = arith.constant dense<0.000000e+00> : vector<8x32xf32>
    %376 = tpu.matmul %373, %375, %cst_304 {dimension_numbers = #tpu.dot_dimension_numbers<[1], [0], [0], [1], [0, 0, 1, 1], [], []>} : vector<8x8xf32>, vector<8x32xf32>, vector<8x32xf32> -> vector<8x32xf32>
    %377 = arith.addf %338, %376 : vector<8x32xf32>
    %c1_305 = arith.constant 1 : index
    %c3_306 = arith.constant 3 : index
    %c0_307 = arith.constant 0 : index
    %c0_308 = arith.constant 0 : index
    %378 = vector.load %arg5[%c1_305, %c3_306, %c0_307, %c0_308] : memref<2x4x32x8xf32, #tpu.memory_space<vmem>>, vector<1x1x32x8xf32>
    %379 = vector.shape_cast %378 : vector<1x1x32x8xf32> to vector<32x8xf32>
    %cst_309 = arith.constant dense<0.000000e+00> : vector<8x8xf32>
    %380 = tpu.matmul %261, %379, %cst_309 {dimension_numbers = #tpu.dot_dimension_numbers<[1], [0], [0], [1], [0, 0, 1, 1], [], []>} : vector<8x32xf32>, vector<32x8xf32>, vector<8x8xf32> -> vector<8x8xf32>
    %c1_310 = arith.constant 1 : index
    %c3_311 = arith.constant 3 : index
    %c0_312 = arith.constant 0 : index
    %c0_313 = arith.constant 0 : index
    %381 = vector.load %arg6[%c1_310, %c3_311, %c0_312, %c0_313] : memref<2x4x1x8xf32, #tpu.memory_space<vmem>>, vector<1x1x1x8xf32>
    %382 = vector.shape_cast %381 : vector<1x1x1x8xf32> to vector<1x8xf32>
    %383 = vector.broadcast %382 : vector<1x8xf32> to vector<8x8xf32>
    %384 = arith.addf %380, %383 : vector<8x8xf32>
    %c1_314 = arith.constant 1 : index
    %c3_315 = arith.constant 3 : index
    %c0_316 = arith.constant 0 : index
    %c0_317 = arith.constant 0 : index
    %385 = vector.load %arg7[%c1_314, %c3_315, %c0_316, %c0_317] : memref<2x4x32x8xf32, #tpu.memory_space<vmem>>, vector<1x1x32x8xf32>
    %386 = vector.shape_cast %385 : vector<1x1x32x8xf32> to vector<32x8xf32>
    %cst_318 = arith.constant dense<0.000000e+00> : vector<8x8xf32>
    %387 = tpu.matmul %261, %386, %cst_318 {dimension_numbers = #tpu.dot_dimension_numbers<[1], [0], [0], [1], [0, 0, 1, 1], [], []>} : vector<8x32xf32>, vector<32x8xf32>, vector<8x8xf32> -> vector<8x8xf32>
    %c1_319 = arith.constant 1 : index
    %c3_320 = arith.constant 3 : index
    %c0_321 = arith.constant 0 : index
    %c0_322 = arith.constant 0 : index
    %388 = vector.load %arg8[%c1_319, %c3_320, %c0_321, %c0_322] : memref<2x4x1x8xf32, #tpu.memory_space<vmem>>, vector<1x1x1x8xf32>
    %389 = vector.shape_cast %388 : vector<1x1x1x8xf32> to vector<1x8xf32>
    %390 = vector.broadcast %389 : vector<1x8xf32> to vector<8x8xf32>
    %391 = arith.addf %387, %390 : vector<8x8xf32>
    %c1_323 = arith.constant 1 : index
    %c3_324 = arith.constant 3 : index
    %c0_325 = arith.constant 0 : index
    %c0_326 = arith.constant 0 : index
    %392 = vector.load %arg9[%c1_323, %c3_324, %c0_325, %c0_326] : memref<2x4x32x8xf32, #tpu.memory_space<vmem>>, vector<1x1x32x8xf32>
    %393 = vector.shape_cast %392 : vector<1x1x32x8xf32> to vector<32x8xf32>
    %cst_327 = arith.constant dense<0.000000e+00> : vector<8x8xf32>
    %394 = tpu.matmul %261, %393, %cst_327 {dimension_numbers = #tpu.dot_dimension_numbers<[1], [0], [0], [1], [0, 0, 1, 1], [], []>} : vector<8x32xf32>, vector<32x8xf32>, vector<8x8xf32> -> vector<8x8xf32>
    %c1_328 = arith.constant 1 : index
    %c3_329 = arith.constant 3 : index
    %c0_330 = arith.constant 0 : index
    %c0_331 = arith.constant 0 : index
    %395 = vector.load %arg10[%c1_328, %c3_329, %c0_330, %c0_331] : memref<2x4x1x8xf32, #tpu.memory_space<vmem>>, vector<1x1x1x8xf32>
    %396 = vector.shape_cast %395 : vector<1x1x1x8xf32> to vector<1x8xf32>
    %397 = vector.broadcast %396 : vector<1x8xf32> to vector<8x8xf32>
    %398 = arith.addf %394, %397 : vector<8x8xf32>
    %399 = tpu.transpose %391, [1, 0] : vector<8x8xf32> -> vector<8x8xf32>
    %cst_332 = arith.constant dense<0.000000e+00> : vector<8x8xf32>
    %400 = tpu.matmul %384, %399, %cst_332 {dimension_numbers = #tpu.dot_dimension_numbers<[1], [0], [0], [1], [0, 0, 1, 1], [], []>} : vector<8x8xf32>, vector<8x8xf32>, vector<8x8xf32> -> vector<8x8xf32>
    %401 = vector.broadcast %3 : vector<1x8xf32> to vector<8x8xf32>
    %402 = arith.addf %400, %401 : vector<8x8xf32>
    %cst_333 = arith.constant dense<0xFF800000> : vector<8xf32>
    %403 = vector.multi_reduction <maximumf>, %402, %cst_333 [1] : vector<8x8xf32> to vector<8xf32>
    %404 = vector.shape_cast %403 : vector<8xf32> to vector<8x1xf32>
    %405 = vector.broadcast %404 : vector<8x1xf32> to vector<8x8xf32>
    %406 = arith.subf %402, %405 : vector<8x8xf32>
    %407 = math.exp %406 : vector<8x8xf32>
    %cst_334 = arith.constant dense<0.000000e+00> : vector<8xf32>
    %408 = vector.multi_reduction <add>, %407, %cst_334 [1] : vector<8x8xf32> to vector<8xf32>
    %409 = vector.shape_cast %408 : vector<8xf32> to vector<8x1xf32>
    %410 = vector.broadcast %409 : vector<8x1xf32> to vector<8x8xf32>
    %411 = arith.divf %407, %410 : vector<8x8xf32>
    %cst_335 = arith.constant dense<0.000000e+00> : vector<8x8xf32>
    %412 = tpu.matmul %411, %398, %cst_335 {dimension_numbers = #tpu.dot_dimension_numbers<[1], [0], [0], [1], [0, 0, 1, 1], [], []>} : vector<8x8xf32>, vector<8x8xf32>, vector<8x8xf32> -> vector<8x8xf32>
    %c1_336 = arith.constant 1 : index
    %c3_337 = arith.constant 3 : index
    %c0_338 = arith.constant 0 : index
    %c0_339 = arith.constant 0 : index
    %413 = vector.load %arg11[%c1_336, %c3_337, %c0_338, %c0_339] : memref<2x4x8x32xf32, #tpu.memory_space<vmem>>, vector<1x1x8x32xf32>
    %414 = vector.shape_cast %413 : vector<1x1x8x32xf32> to vector<8x32xf32>
    %cst_340 = arith.constant dense<0.000000e+00> : vector<8x32xf32>
    %415 = tpu.matmul %412, %414, %cst_340 {dimension_numbers = #tpu.dot_dimension_numbers<[1], [0], [0], [1], [0, 0, 1, 1], [], []>} : vector<8x8xf32>, vector<8x32xf32>, vector<8x32xf32> -> vector<8x32xf32>
    %416 = arith.addf %377, %415 : vector<8x32xf32>
    %c1_341 = arith.constant 1 : index
    %c0_342 = arith.constant 0 : index
    %c0_343 = arith.constant 0 : index
    %417 = vector.load %arg12[%c1_341, %c0_342, %c0_343] : memref<2x1x32xf32, #tpu.memory_space<vmem>>, vector<1x1x32xf32>
    %418 = vector.shape_cast %417 : vector<1x1x32xf32> to vector<1x32xf32>
    %419 = vector.broadcast %418 : vector<1x32xf32> to vector<8x32xf32>
    %420 = arith.addf %416, %419 : vector<8x32xf32>
    %421 = arith.addf %420, %261 : vector<8x32xf32>
    %c1_344 = arith.constant 1 : index
    %c0_345 = arith.constant 0 : index
    %c0_346 = arith.constant 0 : index
    %422 = vector.load %arg13[%c1_344, %c0_345, %c0_346] : memref<2x1x32xf32, #tpu.memory_space<vmem>>, vector<1x1x32xf32>
    %423 = vector.shape_cast %422 : vector<1x1x32xf32> to vector<1x32xf32>
    %c1_347 = arith.constant 1 : index
    %c0_348 = arith.constant 0 : index
    %c0_349 = arith.constant 0 : index
    %424 = vector.load %arg14[%c1_347, %c0_348, %c0_349] : memref<2x1x32xf32, #tpu.memory_space<vmem>>, vector<1x1x32xf32>
    %425 = vector.shape_cast %424 : vector<1x1x32xf32> to vector<1x32xf32>
    %cst_350 = arith.constant dense<0.000000e+00> : vector<8xf32>
    %426 = vector.multi_reduction <add>, %421, %cst_350 [1] : vector<8x32xf32> to vector<8xf32>
    %427 = vector.shape_cast %426 : vector<8xf32> to vector<8x1xf32>
    %cst_351 = arith.constant 3.200000e+01 : f32
    %428 = vector.broadcast %cst_351 : f32 to vector<8x1xf32>
    %429 = arith.divf %427, %428 : vector<8x1xf32>
    %430 = vector.broadcast %429 : vector<8x1xf32> to vector<8x32xf32>
    %431 = arith.subf %421, %430 : vector<8x32xf32>
    %432 = arith.mulf %431, %431 : vector<8x32xf32>
    %cst_352 = arith.constant dense<0.000000e+00> : vector<8xf32>
    %433 = vector.multi_reduction <add>, %432, %cst_352 [1] : vector<8x32xf32> to vector<8xf32>
    %434 = vector.shape_cast %433 : vector<8xf32> to vector<8x1xf32>
    %cst_353 = arith.constant 3.200000e+01 : f32
    %435 = vector.broadcast %cst_353 : f32 to vector<8x1xf32>
    %436 = arith.divf %434, %435 : vector<8x1xf32>
    %cst_354 = arith.constant 9.99999974E-6 : f32
    %437 = vector.broadcast %cst_354 : f32 to vector<8x1xf32>
    %438 = arith.addf %436, %437 : vector<8x1xf32>
    %439 = math.rsqrt %438 : vector<8x1xf32>
    %440 = vector.broadcast %439 : vector<8x1xf32> to vector<8x32xf32>
    %441 = arith.mulf %431, %440 : vector<8x32xf32>
    %442 = vector.broadcast %423 : vector<1x32xf32> to vector<8x32xf32>
    %443 = arith.mulf %441, %442 : vector<8x32xf32>
    %444 = vector.broadcast %425 : vector<1x32xf32> to vector<8x32xf32>
    %445 = arith.addf %443, %444 : vector<8x32xf32>
    %c1_355 = arith.constant 1 : index
    %c0_356 = arith.constant 0 : index
    %c0_357 = arith.constant 0 : index
    %446 = vector.load %arg15[%c1_355, %c0_356, %c0_357] : memref<2x32x64xf32, #tpu.memory_space<vmem>>, vector<1x32x64xf32>
    %447 = vector.shape_cast %446 : vector<1x32x64xf32> to vector<32x64xf32>
    %cst_358 = arith.constant dense<0.000000e+00> : vector<8x64xf32>
    %448 = tpu.matmul %445, %447, %cst_358 {dimension_numbers = #tpu.dot_dimension_numbers<[1], [0], [0], [1], [0, 0, 1, 1], [], []>} : vector<8x32xf32>, vector<32x64xf32>, vector<8x64xf32> -> vector<8x64xf32>
    %c1_359 = arith.constant 1 : index
    %c0_360 = arith.constant 0 : index
    %c0_361 = arith.constant 0 : index
    %449 = vector.load %arg16[%c1_359, %c0_360, %c0_361] : memref<2x1x64xf32, #tpu.memory_space<vmem>>, vector<1x1x64xf32>
    %450 = vector.shape_cast %449 : vector<1x1x64xf32> to vector<1x64xf32>
    %451 = vector.broadcast %450 : vector<1x64xf32> to vector<8x64xf32>
    %452 = arith.addf %448, %451 : vector<8x64xf32>
    %cst_362 = arith.constant 5.000000e-01 : f32
    %453 = vector.broadcast %cst_362 : f32 to vector<8x64xf32>
    %454 = arith.mulf %453, %452 : vector<8x64xf32>
    %cst_363 = arith.constant 4.471500e-02 : f32
    %455 = vector.broadcast %cst_363 : f32 to vector<8x64xf32>
    %456 = arith.mulf %455, %452 : vector<8x64xf32>
    %457 = arith.mulf %456, %452 : vector<8x64xf32>
    %458 = arith.mulf %457, %452 : vector<8x64xf32>
    %459 = arith.addf %452, %458 : vector<8x64xf32>
    %cst_364 = arith.constant 0.797884583 : f32
    %460 = vector.broadcast %cst_364 : f32 to vector<8x64xf32>
    %461 = arith.mulf %460, %459 : vector<8x64xf32>
    %462 = math.tanh %461 : vector<8x64xf32>
    %cst_365 = arith.constant 1.000000e+00 : f32
    %463 = vector.broadcast %cst_365 : f32 to vector<8x64xf32>
    %464 = arith.addf %463, %462 : vector<8x64xf32>
    %465 = arith.mulf %454, %464 : vector<8x64xf32>
    %c1_366 = arith.constant 1 : index
    %c0_367 = arith.constant 0 : index
    %c0_368 = arith.constant 0 : index
    %466 = vector.load %arg17[%c1_366, %c0_367, %c0_368] : memref<2x64x32xf32, #tpu.memory_space<vmem>>, vector<1x64x32xf32>
    %467 = vector.shape_cast %466 : vector<1x64x32xf32> to vector<64x32xf32>
    %cst_369 = arith.constant dense<0.000000e+00> : vector<8x32xf32>
    %468 = tpu.matmul %465, %467, %cst_369 {dimension_numbers = #tpu.dot_dimension_numbers<[1], [0], [0], [1], [0, 0, 1, 1], [], []>} : vector<8x64xf32>, vector<64x32xf32>, vector<8x32xf32> -> vector<8x32xf32>
    %c1_370 = arith.constant 1 : index
    %c0_371 = arith.constant 0 : index
    %c0_372 = arith.constant 0 : index
    %469 = vector.load %arg18[%c1_370, %c0_371, %c0_372] : memref<2x1x32xf32, #tpu.memory_space<vmem>>, vector<1x1x32xf32>
    %470 = vector.shape_cast %469 : vector<1x1x32xf32> to vector<1x32xf32>
    %471 = vector.broadcast %470 : vector<1x32xf32> to vector<8x32xf32>
    %472 = arith.addf %468, %471 : vector<8x32xf32>
    %473 = arith.addf %472, %445 : vector<8x32xf32>
    %c1_373 = arith.constant 1 : index
    %c0_374 = arith.constant 0 : index
    %c0_375 = arith.constant 0 : index
    %474 = vector.load %arg19[%c1_373, %c0_374, %c0_375] : memref<2x1x32xf32, #tpu.memory_space<vmem>>, vector<1x1x32xf32>
    %475 = vector.shape_cast %474 : vector<1x1x32xf32> to vector<1x32xf32>
    %c1_376 = arith.constant 1 : index
    %c0_377 = arith.constant 0 : index
    %c0_378 = arith.constant 0 : index
    %476 = vector.load %arg20[%c1_376, %c0_377, %c0_378] : memref<2x1x32xf32, #tpu.memory_space<vmem>>, vector<1x1x32xf32>
    %477 = vector.shape_cast %476 : vector<1x1x32xf32> to vector<1x32xf32>
    %cst_379 = arith.constant dense<0.000000e+00> : vector<8xf32>
    %478 = vector.multi_reduction <add>, %473, %cst_379 [1] : vector<8x32xf32> to vector<8xf32>
    %479 = vector.shape_cast %478 : vector<8xf32> to vector<8x1xf32>
    %cst_380 = arith.constant 3.200000e+01 : f32
    %480 = vector.broadcast %cst_380 : f32 to vector<8x1xf32>
    %481 = arith.divf %479, %480 : vector<8x1xf32>
    %482 = vector.broadcast %481 : vector<8x1xf32> to vector<8x32xf32>
    %483 = arith.subf %473, %482 : vector<8x32xf32>
    %484 = arith.mulf %483, %483 : vector<8x32xf32>
    %cst_381 = arith.constant dense<0.000000e+00> : vector<8xf32>
    %485 = vector.multi_reduction <add>, %484, %cst_381 [1] : vector<8x32xf32> to vector<8xf32>
    %486 = vector.shape_cast %485 : vector<8xf32> to vector<8x1xf32>
    %cst_382 = arith.constant 3.200000e+01 : f32
    %487 = vector.broadcast %cst_382 : f32 to vector<8x1xf32>
    %488 = arith.divf %486, %487 : vector<8x1xf32>
    %cst_383 = arith.constant 9.99999974E-6 : f32
    %489 = vector.broadcast %cst_383 : f32 to vector<8x1xf32>
    %490 = arith.addf %488, %489 : vector<8x1xf32>
    %491 = math.rsqrt %490 : vector<8x1xf32>
    %492 = vector.broadcast %491 : vector<8x1xf32> to vector<8x32xf32>
    %493 = arith.mulf %483, %492 : vector<8x32xf32>
    %494 = vector.broadcast %475 : vector<1x32xf32> to vector<8x32xf32>
    %495 = arith.mulf %493, %494 : vector<8x32xf32>
    %496 = vector.broadcast %477 : vector<1x32xf32> to vector<8x32xf32>
    %497 = arith.addf %495, %496 : vector<8x32xf32>
    %c0_384 = arith.constant 0 : index
    %c0_385 = arith.constant 0 : index
    %498 = vector.load %arg21[%c0_384, %c0_385] : memref<32x32xf32, #tpu.memory_space<vmem>>, vector<32x32xf32>
    %cst_386 = arith.constant dense<0.000000e+00> : vector<8x32xf32>
    %499 = tpu.matmul %497, %498, %cst_386 {dimension_numbers = #tpu.dot_dimension_numbers<[1], [0], [0], [1], [0, 0, 1, 1], [], []>} : vector<8x32xf32>, vector<32x32xf32>, vector<8x32xf32> -> vector<8x32xf32>
    %c0_387 = arith.constant 0 : index
    %c0_388 = arith.constant 0 : index
    %500 = vector.load %arg22[%c0_387, %c0_388] : memref<1x32xf32, #tpu.memory_space<vmem>>, vector<1x32xf32>
    %501 = vector.broadcast %500 : vector<1x32xf32> to vector<8x32xf32>
    %502 = arith.addf %499, %501 : vector<8x32xf32>
    %503 = math.tanh %502 : vector<8x32xf32>
    %c0_389 = arith.constant 0 : index
    %c0_390 = arith.constant 0 : index
    %504 = vector.load %arg23[%c0_389, %c0_390] : memref<32x128xf32, #tpu.memory_space<vmem>>, vector<32x128xf32>
    %cst_391 = arith.constant dense<0.000000e+00> : vector<8x128xf32>
    %505 = tpu.matmul %503, %504, %cst_391 {dimension_numbers = #tpu.dot_dimension_numbers<[1], [0], [0], [1], [0, 0, 1, 1], [], []>} : vector<8x32xf32>, vector<32x128xf32>, vector<8x128xf32> -> vector<8x128xf32>
    %c0_392 = arith.constant 0 : index
    %c0_393 = arith.constant 0 : index
    %506 = vector.load %arg24[%c0_392, %c0_393] : memref<1x128xf32, #tpu.memory_space<vmem>>, vector<1x128xf32>
    %507 = vector.broadcast %506 : vector<1x128xf32> to vector<8x128xf32>
    %508 = arith.addf %505, %507 : vector<8x128xf32>
    %c0_394 = arith.constant 0 : index
    %c0_395 = arith.constant 0 : index
    %c0_396 = arith.constant 0 : index
    %509 = vector.load %arg25[%c0_394, %c0_395, %c0_396] : memref<1x8x128xf32, #tpu.memory_space<vmem>>, vector<1x8x128xf32>
    %510 = vector.shape_cast %509 : vector<1x8x128xf32> to vector<8x128xf32>
    %511 = vector.shape_cast %508 : vector<8x128xf32> to vector<1x8x128xf32>
    tpu.vector_store %arg25[%c0_394, %c0_395, %c0_396], %511 {strides = array<i32>} : memref<1x8x128xf32, #tpu.memory_space<vmem>>, vector<1x8x128xf32>,
    return
  }
  func.func @transform_0(%arg0: i32) -> (i32, i32, i32) {
    %c0_i32 = arith.constant 0 : i32
    %c0_i32_0 = arith.constant 0 : i32
    %c0_i32_1 = arith.constant 0 : i32
    return %arg0, %c0_i32, %c0_i32_0 : i32, i32, i32
  }
  func.func @transform_1(%arg0: i32) -> (i32, i32, i32) {
    %c0_i32 = arith.constant 0 : i32
    %c0_i32_0 = arith.constant 0 : i32
    %c0_i32_1 = arith.constant 0 : i32
    return %arg0, %c0_i32, %c0_i32_0 : i32, i32, i32
  }
  func.func @transform_2(%arg0: i32) -> (i32, i32) {
    %c0_i32 = arith.constant 0 : i32
    %c0_i32_0 = arith.constant 0 : i32
    %c0_i32_1 = arith.constant 0 : i32
    return %c0_i32, %c0_i32_0 : i32, i32
  }
  func.func @transform_3(%arg0: i32) -> (i32, i32) {
    %c0_i32 = arith.constant 0 : i32
    %c0_i32_0 = arith.constant 0 : i32
    %c0_i32_1 = arith.constant 0 : i32
    return %c0_i32, %c0_i32_0 : i32, i32
  }
  func.func @transform_4(%arg0: i32) -> (i32, i32, i32, i32) {
    %c0_i32 = arith.constant 0 : i32
    %c0_i32_0 = arith.constant 0 : i32
    %c0_i32_1 = arith.constant 0 : i32
    %c0_i32_2 = arith.constant 0 : i32
    %c0_i32_3 = arith.constant 0 : i32
    return %c0_i32, %c0_i32_0, %c0_i32_1, %c0_i32_2 : i32, i32, i32, i32
  }
  func.func @transform_5(%arg0: i32) -> (i32, i32, i32, i32) {
    %c0_i32 = arith.constant 0 : i32
    %c0_i32_0 = arith.constant 0 : i32
    %c0_i32_1 = arith.constant 0 : i32
    %c0_i32_2 = arith.constant 0 : i32
    %c0_i32_3 = arith.constant 0 : i32
    return %c0_i32, %c0_i32_0, %c0_i32_1, %c0_i32_2 : i32, i32, i32, i32
  }
  func.func @transform_6(%arg0: i32) -> (i32, i32, i32, i32) {
    %c0_i32 = arith.constant 0 : i32
    %c0_i32_0 = arith.constant 0 : i32
    %c0_i32_1 = arith.constant 0 : i32
    %c0_i32_2 = arith.constant 0 : i32
    %c0_i32_3 = arith.constant 0 : i32
    return %c0_i32, %c0_i32_0, %c0_i32_1, %c0_i32_2 : i32, i32, i32, i32
  }
  func.func @transform_7(%arg0: i32) -> (i32, i32, i32, i32) {
    %c0_i32 = arith.constant 0 : i32
    %c0_i32_0 = arith.constant 0 : i32
    %c0_i32_1 = arith.constant 0 : i32
    %c0_i32_2 = arith.constant 0 : i32
    %c0_i32_3 = arith.constant 0 : i32
    return %c0_i32, %c0_i32_0, %c0_i32_1, %c0_i32_2 : i32, i32, i32, i32
  }
  func.func @transform_8(%arg0: i32) -> (i32, i32, i32, i32) {
    %c0_i32 = arith.constant 0 : i32
    %c0_i32_0 = arith.constant 0 : i32
    %c0_i32_1 = arith.constant 0 : i32
    %c0_i32_2 = arith.constant 0 : i32
    %c0_i32_3 = arith.constant 0 : i32
    return %c0_i32, %c0_i32_0, %c0_i32_1, %c0_i32_2 : i32, i32, i32, i32
  }
  func.func @transform_9(%arg0: i32) -> (i32, i32, i32, i32) {
    %c0_i32 = arith.constant 0 : i32
    %c0_i32_0 = arith.constant 0 : i32
    %c0_i32_1 = arith.constant 0 : i32
    %c0_i32_2 = arith.constant 0 : i32
    %c0_i32_3 = arith.constant 0 : i32
    return %c0_i32, %c0_i32_0, %c0_i32_1, %c0_i32_2 : i32, i32, i32, i32
  }
  func.func @transform_10(%arg0: i32) -> (i32, i32, i32, i32) {
    %c0_i32 = arith.constant 0 : i32
    %c0_i32_0 = arith.constant 0 : i32
    %c0_i32_1 = arith.constant 0 : i32
    %c0_i32_2 = arith.constant 0 : i32
    %c0_i32_3 = arith.constant 0 : i32
    return %c0_i32, %c0_i32_0, %c0_i32_1, %c0_i32_2 : i32, i32, i32, i32
  }
  func.func @transform_11(%arg0: i32) -> (i32, i32, i32) {
    %c0_i32 = arith.constant 0 : i32
    %c0_i32_0 = arith.constant 0 : i32
    %c0_i32_1 = arith.constant 0 : i32
    %c0_i32_2 = arith.constant 0 : i32
    return %c0_i32, %c0_i32_0, %c0_i32_1 : i32, i32, i32
  }
  func.func @transform_12(%arg0: i32) -> (i32, i32, i32) {
    %c0_i32 = arith.constant 0 : i32
    %c0_i32_0 = arith.constant 0 : i32
    %c0_i32_1 = arith.constant 0 : i32
    %c0_i32_2 = arith.constant 0 : i32
    return %c0_i32, %c0_i32_0, %c0_i32_1 : i32, i32, i32
  }
  func.func @transform_13(%arg0: i32) -> (i32, i32, i32) {
    %c0_i32 = arith.constant 0 : i32
    %c0_i32_0 = arith.constant 0 : i32
    %c0_i32_1 = arith.constant 0 : i32
    %c0_i32_2 = arith.constant 0 : i32
    return %c0_i32, %c0_i32_0, %c0_i32_1 : i32, i32, i32
  }
  func.func @transform_14(%arg0: i32) -> (i32, i32, i32) {
    %c0_i32 = arith.constant 0 : i32
    %c0_i32_0 = arith.constant 0 : i32
    %c0_i32_1 = arith.constant 0 : i32
    %c0_i32_2 = arith.constant 0 : i32
    return %c0_i32, %c0_i32_0, %c0_i32_1 : i32, i32, i32
  }
  func.func @transform_15(%arg0: i32) -> (i32, i32, i32) {
    %c0_i32 = arith.constant 0 : i32
    %c0_i32_0 = arith.constant 0 : i32
    %c0_i32_1 = arith.constant 0 : i32
    %c0_i32_2 = arith.constant 0 : i32
    return %c0_i32, %c0_i32_0, %c0_i32_1 : i32, i32, i32
  }
  func.func @transform_16(%arg0: i32) -> (i32, i32, i32) {
    %c0_i32 = arith.constant 0 : i32
    %c0_i32_0 = arith.constant 0 : i32
    %c0_i32_1 = arith.constant 0 : i32
    %c0_i32_2 = arith.constant 0 : i32
    return %c0_i32, %c0_i32_0, %c0_i32_1 : i32, i32, i32
  }
  func.func @transform_17(%arg0: i32) -> (i32, i32, i32) {
    %c0_i32 = arith.constant 0 : i32
    %c0_i32_0 = arith.constant 0 : i32
    %c0_i32_1 = arith.constant 0 : i32
    %c0_i32_2 = arith.constant 0 : i32
    return %c0_i32, %c0_i32_0, %c0_i32_1 : i32, i32, i32
  }
  func.func @transform_18(%arg0: i32) -> (i32, i32, i32) {
    %c0_i32 = arith.constant 0 : i32
    %c0_i32_0 = arith.constant 0 : i32
    %c0_i32_1 = arith.constant 0 : i32
    %c0_i32_2 = arith.constant 0 : i32
    return %c0_i32, %c0_i32_0, %c0_i32_1 : i32, i32, i32
  }
  func.func @transform_19(%arg0: i32) -> (i32, i32, i32) {
    %c0_i32 = arith.constant 0 : i32
    %c0_i32_0 = arith.constant 0 : i32
    %c0_i32_1 = arith.constant 0 : i32
    %c0_i32_2 = arith.constant 0 : i32
    return %c0_i32, %c0_i32_0, %c0_i32_1 : i32, i32, i32
  }
  func.func @transform_20(%arg0: i32) -> (i32, i32) {
    %c0_i32 = arith.constant 0 : i32
    %c0_i32_0 = arith.constant 0 : i32
    %c0_i32_1 = arith.constant 0 : i32
    return %c0_i32, %c0_i32_0 : i32, i32
  }
  func.func @transform_21(%arg0: i32) -> (i32, i32) {
    %c0_i32 = arith.constant 0 : i32
    %c0_i32_0 = arith.constant 0 : i32
    %c0_i32_1 = arith.constant 0 : i32
    return %c0_i32, %c0_i32_0 : i32, i32
  }
  func.func @transform_22(%arg0: i32) -> (i32, i32) {
    %c0_i32 = arith.constant 0 : i32
    %c0_i32_0 = arith.constant 0 : i32
    %c0_i32_1 = arith.constant 0 : i32
    return %c0_i32, %c0_i32_0 : i32, i32
  }
  func.func @transform_23(%arg0: i32) -> (i32, i32) {
    %c0_i32 = arith.constant 0 : i32
    %c0_i32_0 = arith.constant 0 : i32
    %c0_i32_1 = arith.constant 0 : i32
    return %c0_i32, %c0_i32_0 : i32, i32
  }
  func.func @transform_24(%arg0: i32) -> (i32, i32, i32) {
    %c0_i32 = arith.constant 0 : i32
    %c0_i32_0 = arith.constant 0 : i32
    %c0_i32_1 = arith.constant 0 : i32
    return %arg0, %c0_i32, %c0_i32_0 : i32, i32, i32
  }
}

</mosaic_0001>

<bundles_post_ra>
// kernel: sentiment_classifier_forward.1
= control target key start
LH: loop header
LB: loop body
LE: loop exit
PB: predicated region body
PF: predicated region fallthrough
CT: control target
= control target key end

     0   :  { %s7611_s0 = inlined_call_operand.vmem [shape: f32[2,8,32], index: 0, kind: input, shape index: {}]   ;;  %s7612_s1 = inlined_call_operand.vmem [shape: f32[2,1,8], index: 1, kind: input, shape index: {}]   ;;  %s7613_s2 = inlined_call_operand.vmem [shape: f32[1,32], index: 2, kind: input, shape index: {}]   ;;  %s7614_s3 = inlined_call_operand.vmem [shape: f32[1,32], index: 3, kind: input, shape index: {}]   ;;  %s7615_s4 = inlined_call_operand.vmem [shape: f32[2,4,32,8], index: 4, kind: input, shape index: {}]   ;;  %s7616_s5 = inlined_call_operand.vmem [shape: f32[2,4,1,8], index: 5, kind: input, shape index: {}]   ;;  %s7617_s6 = inlined_call_operand.vmem [shape: f32[2,4,32,8], index: 6, kind: input, shape index: {}]   ;;  %s7618_s7 = inlined_call_operand.vmem [shape: f32[2,4,1,8], index: 7, kind: input, shape index: {}]   ;;  %s7619_s8 = inlined_call_operand.vmem [shape: f32[2,4,32,8], index: 8, kind: input, shape index: {}]   ;;  %s7620_s9 = inlined_call_operand.vmem [shape: f32[2,4,1,8], index: 9, kind: input, shape index: {}]   ;;  %s7621_s10 = inlined_call_operand.vmem [shape: f32[2,4,8,32], index: 10, kind: input, shape index: {}]   ;;  %s7622_s11 = inlined_call_operand.vmem [shape: f32[2,1,32], index: 11, kind: input, shape index: {}]   ;;  %s7623_s12 = inlined_call_operand.vmem [shape: f32[2,1,32], index: 12, kind: input, shape index: {}]   ;;  %s7624_s13 = inlined_call_operand.vmem [shape: f32[2,1,32], index: 13, kind: input, shape index: {}]   ;;  %s7625_s14 = inlined_call_operand.vmem [shape: f32[2,32,64], index: 14, kind: input, shape index: {}]   ;;  %s7626_s15 = inlined_call_operand.vmem [shape: f32[2,1,64], index: 15, kind: input, shape index: {}]   ;;  %s7627_s16 = inlined_call_operand.vmem [shape: f32[2,64,32], index: 16, kind: input, shape index: {}]   ;;  %s7628_s17 = inlined_call_operand.vmem [shape: f32[2,1,32], index: 17, kind: input, shape index: {}]   ;;  %s7629_s18 = inlined_call_operand.vmem [shape: f32[2,1,32], index: 18, kind: input, shape index: {}]   ;;  %s7630_s19 = inlined_call_operand.vmem [shape: f32[2,1,32], index: 19, kind: input, shape index: {}]   ;;  %s7631_s20 = inlined_call_operand.vmem [shape: f32[32,32], index: 20, kind: input, shape index: {}]   ;;  %s7632_s21 = inlined_call_operand.vmem [shape: f32[1,32], index: 21, kind: input, shape index: {}]   ;;  %s7633_s22 = inlined_call_operand.vmem [shape: f32[32,128], index: 22, kind: input, shape index: {}]   ;;  %s7634_s23 = inlined_call_operand.vmem [shape: f32[1,128], index: 23, kind: input, shape index: {}]   ;;  %s7635_s24 = inlined_call_operand.vmem [shape: f32[2,8,128], index: 24, kind: output, shape index: {}]  }
   0x1   :  { %7643 = sst [smem:[#allocation3_spill]] %s7611_s0 }
   0x2   :  { %7644 = sst [smem:[#allocation4_spill]] %s7612_s1 }
   0x3   :  { %7645 = sst [smem:[#allocation5_spill]] %s7613_s2 }
   0x4   :  { %7646 = sst [smem:[#allocation6_spill]] %s7614_s3 }
   0x5   :  { %7647 = sst [smem:[#allocation7_spill]] %s7615_s4 }
   0x6   :  { %7648 = sst [smem:[#allocation8_spill]] %s7616_s5  ;;  %s6707_s5 = smov 0  }
   0x7   :  { %7649 = sst [smem:[#allocation9_spill]] %s7617_s6 }
   0x8   :  { %7650 = sst [smem:[#allocation10_spill]] %s7618_s7 }
   0x9   :  { %7651 = sst [smem:[#allocation11_spill]] %s7619_s8 }
   0xa   :  { %7652 = sst [smem:[#allocation12_spill]] %s7634_s23 }
   0xb   :  { %7653 = sst [smem:[#allocation13_spill]] %s7635_s24 }
   0xc LB: > { %7654 = sst [smem:[#allocation2_spill]] %s6577_s5  ;;  %s5402_s26 = sadd.s32 4294967295, %s6577_s5   ;;  %s6577_s5 = sphi %s6707_s5, %s34_s5  }
   0xd   : > { %p5406_p0 = scmp.ge.s32.totalorder %s6577_s5, 1  ;;  %p669_p1 = scmp.lt.s32.totalorder %s6577_s5, 3 }
   0xf   : > { %p670_p2 = pnand %p5406_p0, %p669_p1 }
  0x10   : > { %p736_p3 = scmp.lt.s32.totalorder (!%p670_p2), %s5402_s26, 1  ;;  %vm751_vm0 = vcmask (!%p670_p2), 261120   ;;  %s7655_s2 = sld [smem:[#allocation3_spill]] (!%p670_p2)  ;;  %v6579_v12 = vmov (!%p670_p2), 0.0|0.0   ;;  %vm6580_vm1 = vmmov (!%p670_p2), 0   ;;  %v6581_v20 = vmov (!%p670_p2), 0.0  }
  0x11   : > { %673 = sbr.rel (%p670_p2) target bundleno = 10668 (0x29ac), region = 116  ;;  %s7656_s30 = sld [smem:[#allocation7_spill]] (!%p670_p2)  ;;  %6319 = vmatprep.subr.bf16.mxu0 (!%p670_p2), %v6579_v12  ;;  %6325 = vmatprep.subr.bf16.mxu1 (!%p670_p2), %v6579_v12  ;;  %vm1032_vm2 = vcmask (!%p670_p2), 64512   ;;  %vm2867_vm3 = vcmask (!%p670_p2), 523264  }
  0x12   : > { %s7657_s1 = sld [smem:[#allocation9_spill]] (!%p670_p2)  ;;  %5861 = vmatprep.mubr.msk.f32.mxu0 (!%p670_p2), %vm6580_vm1, %v6581_v20  ;;  %5872 = vmatprep.mubr.msk.f32.mxu1 (!%p670_p2), %vm6580_vm1, %v6581_v20  ;;  %s7659_s7 = sld [smem:[#allocation11_spill]] (!%p670_p2) }
  0x13   : > { %s7661_s5 = sld [smem:[#allocation10_spill]] (!%p670_p2)  ;;  %s7663_s25 = sld [smem:[#allocation8_spill]] (!%p670_p2) }
  0x14   : > { %s7665_s4 = sld [smem:[#allocation12_spill]] (!%p670_p2) }
  0x17   : > { %v780_v7 = vld [vmem:[%s7656_s30] sm:$0xff] (!%p670_p2)  ;;  %v781_v8 = vld [vmem:[%s7656_s30 + $0x8] sm:$0xff] (!%p670_p2)  ;;  %v782_v14 = vld [vmem:[%s7656_s30 + $0x10] sm:$0xff] (!%p670_p2) }
  0x18   : > { %s7670_s26 = smov (!%p736_p3, %s5402_s26), 1  ;;  %v6320_v9 = vpack.c.bf16 %v781_v8, %v780_v7  ;;  %v864_v10 = vld [vmem:[%s7657_s1] sm:$0xff]  ;;  %v865_v11 = vld [vmem:[%s7657_s1 + $0x8] sm:$0xff]  ;;  %v783_v15 = vld [vmem:[%s7656_s30 + $0x18] sm:$0xff] }
  0x19   : > { %s7641_s27 = sshll.u32 %s7670_s26, 3  ;;  %v6326_v13 = vpack.c.bf16 %v865_v11, %v864_v10  ;;  %v6323_v16 = vpack.c.bf16 %v783_v15, %v782_v14  ;;  %v866_v17 = vld [vmem:[%s7657_s1 + $0x10] sm:$0xff]  ;;  %v867_v18 = vld [vmem:[%s7657_s1 + $0x18] sm:$0xff]  ;;  %v945_v27 = vld [vmem:[%s7659_s7] sm:$0xff]  ;;  %s7666_s28 = sshll.u32 %s7670_s26, 3 }
  0x1a   : > { %s739_s29 = scalar_lea.vmem %s7655_s2, %s7641_s27  ;;  %6321 = vmatpush3.bf16.msra.mxu0 %v6320_v9  ;;  %v6329_v19 = vpack.c.bf16 %v867_v18, %v866_v17  ;;  %s7658_s2 = sld [smem:[#allocation5_spill]]  ;;  %v946_v28 = vld [vmem:[%s7659_s7 + $0x8] sm:$0xff]  ;;  %v947_v33 = vld [vmem:[%s7659_s7 + $0x10] sm:$0xff]  ;;  %v948_v34 = vld [vmem:[%s7659_s7 + $0x18] sm:$0xff] }
  0x1b   : > { %v747_v0 = vld [vmem:[%s739_s29] sm:$0xff]  ;;  %6327 = vmatpush3.bf16.msra.mxu1 %v6326_v13  ;;  %6322 = vmatprep.subr.bf16.mxu0 %v6579_v12  ;;  %s7660_s27 = sld [smem:[#allocation6_spill]]  ;;  %v6332_v31 = vpack.c.bf16 %v946_v28, %v945_v27  ;;  %v6335_v35 = vpack.c.bf16 %v948_v34, %v947_v33  ;;  %v5422_v37 = vld [vmem:[%s7656_s30 + $0x28] sm:$0xff]  ;;  %v5423_v39 = vld [vmem:[%s7656_s30 + $0x30] sm:$0xff]  ;;  %s7662_s29 = smov %s7661_s5 }
  0x1c   : > { %v752_v1 = vsel %vm751_vm0, %v747_v0, 0.0  ;;  %6328 = vmatprep.subr.bf16.mxu1 %v6579_v12  ;;  %v5421_v36 = vld [vmem:[%s7656_s30 + $0x20] sm:$0xff]  ;;  %v5424_v40 = vld [vmem:[%s7656_s30 + $0x38] sm:$0xff]  ;;  %v5436_v43 = vld [vmem:[%s7659_s7 + $0x28] sm:$0xff] }
  0x1d   : > { %753 = vadd.xlane.f32.xlu0 %v752_v1  ;;  %v6338_v38 = vpack.c.bf16 %v5422_v37, %v5421_v36  ;;  %v6341_v41 = vpack.c.bf16 %v5424_v40, %v5423_v39  ;;  %v5435_v42 = vld [vmem:[%s7659_s7 + $0x20] sm:$0xff]  ;;  %v5437_v45 = vld [vmem:[%s7659_s7 + $0x30] sm:$0xff]  ;;  %v5438_v46 = vld [vmem:[%s7659_s7 + $0x38] sm:$0xff] }
  0x1e   : > { %6324 = vmatpush3.bf16.msra.mxu0 %v6323_v16  ;;  %v6350_v44 = vpack.c.bf16 %v5436_v43, %v5435_v42  ;;  %v6353_v47 = vpack.c.bf16 %v5438_v46, %v5437_v45  ;;  %v5448_v48 = vld [vmem:[%s7656_s30 + $0x40] sm:$0xff]  ;;  %v5449_v49 = vld [vmem:[%s7656_s30 + $0x48] sm:$0xff]  ;;  %v5450_v51 = vld [vmem:[%s7656_s30 + $0x50] sm:$0xff] }
  0x1f   : > { %6330 = vmatpush3.bf16.msra.mxu1 %v6329_v19  ;;  %6331 = vmatprep.subr.bf16.mxu0 %v6579_v12  ;;  %v6356_v50 = vpack.c.bf16 %v5449_v49, %v5448_v48  ;;  %v5451_v52 = vld [vmem:[%s7656_s30 + $0x58] sm:$0xff]  ;;  %v5462_v54 = vld [vmem:[%s7659_s7 + $0x40] sm:$0xff]  ;;  %v5463_v55 = vld [vmem:[%s7659_s7 + $0x48] sm:$0xff] }
  0x20   : > { %5886 = vmatprep.subr.mxu1 %v6581_v20  ;;  %v5409_v25 = vld [vmem:[%s7658_s2] ss:$0 sm:$0xff]  ;;  %v6359_v53 = vpack.c.bf16 %v5451_v52, %v5450_v51  ;;  %v6368_v56 = vpack.c.bf16 %v5463_v55, %v5462_v54  ;;  %v5464_v57 = vld [vmem:[%s7659_s7 + $0x50] sm:$0xff]  ;;  %v5465_v58 = vld [vmem:[%s7659_s7 + $0x58] sm:$0xff]  ;;  %s7664_s2 = sld [smem:[#allocation4_spill]] }
  0x21   : > { %v5410_v29 = vld [vmem:[%s7660_s27] ss:$0 sm:$0xff]  ;;  %v6371_v59 = vpack.c.bf16 %v5465_v58, %v5464_v57  ;;  %v5431_v36 = vld [vmem:[%s7657_s1 + $0x38] sm:$0xff]  ;;  %v5433_v40 = vld [vmem:[%s7662_s29 + $0x1] ss:$0 sm:$0xff] }
  0x22   : > { %v5413_v60 = vld [vmem:[%s7661_s5] ss:$0 sm:$0xff]  ;;  %v5426_v42 = vld [vmem:[%s7663_s25 + $0x1] ss:$0 sm:$0xff] }
  0x23   : > { %v5411_v63 = vld [vmem:[%s7663_s25] ss:$0 sm:$0xff]  ;;  %v5440_v45 = vld [vmem:[%s7620_s9 + $0x1] ss:$0 sm:$0xff] }
  0x26   : > { %s6888_s27 = scalar_lea.vmem %s7664_s2, %s7670_s26  ;;  %s7667_s2 = sld [smem:[#allocation13_spill]] }
  0x27   : > { %v6891_v17 = vld [vmem:[%s6888_s27] ss:$0 sm:$0xff] }
  0x2c   : > { %s746_s5 = scalar_lea.vmem %s7667_s2, %s7666_s28 }
  0xaa   : > { %v754_v2 = vpop.xlane.xlu0 %753 }
  0xab   : > { %v756_v3 = vmul.f32 0.03125, %v754_v2 }
  0xad   : > { %v757_v4 = vsub.f32 %v747_v0, %v756_v3 }
  0xaf   : > { %v758_v5 = vmul.f32 %v757_v4, %v757_v4 }
  0xb1   : > { %v759_v6 = vsel %vm751_vm0, %v758_v5, 0.0 }
  0xb2   : > { %760 = vadd.xlane.f32.xlu0 %v759_v6 }
 0x13f   : > { %v761_v21 = vpop.xlane.xlu0 %760 }
 0x140   : > { %v762_v22 = vmul.f32 0.03125, %v761_v21 }
 0x142   : > { %v763_v23 = vadd.f32 1e-05, %v762_v22 }
 0x144   : > { %6522 = vrsqrt.f32 %v763_v23 }
 0x14e   : > { %v6523_v24 = vpop.eup %6522 }
 0x14f   : > { %v765_v26 = vmul.f32 %v6523_v24, %v757_v4  ;;  %v5415_v4 = vld [vmem:[%s7620_s9] ss:$0 sm:$0xff] }
 0x151   : > { %v772_v30 = vmul.f32 %v5409_v25, %v765_v26 }
 0x153   : > { %v6771_v32 = vadd.f32 %v5410_v29, %v772_v30  ;;  %v5428_v29 = vld [vmem:[%s7657_s1 + $0x20] sm:$0xff]  ;;  %v5429_v30 = vld [vmem:[%s7657_s1 + $0x28] sm:$0xff] }
 0x154   : > { %v6344_v33 = vpack.c.bf16 %v5429_v30, %v5428_v29 }
 0x155   : > { %5862 = vmatmul.mubr.msk.f32.vlgmr.msra.gmra.mrb[0].mxu0 %vm751_vm0, %v6771_v32  ;;  %5873 = vmatmul.mubr.msk.f32.vlgmr.msra.gmra.mrb[0].mxu1 %vm751_vm0, %v6771_v32 }
 0x156   : > { %6333 = vmatpush3.bf16.msra.mxu0 %v6332_v31  ;;  %5883 = vmatprep.mubr.msk.f32.mxu0 %vm6580_vm1, %v6581_v20 }
 0x157   : > { %6334 = vmatprep.subr.bf16.mxu0 %v6579_v12  ;;  %5888 = vmatprep.mubr.msk.f32.mxu1 %vm6580_vm1, %v6581_v20 }
 0x15a   : > { %6336 = vmatpush3.bf16.msra.mxu0 %v6335_v35  ;;  %v5430_v35 = vld [vmem:[%s7657_s1 + $0x30] sm:$0xff] }
 0x15b   : > { %6337 = vmatprep.subr.bf16.mxu0 %v6579_v12  ;;  %v6347_v37 = vpack.c.bf16 %v5431_v36, %v5430_v35  ;;  %v5475_v35 = vld [vmem:[%s7656_s30 + $0x68] sm:$0xff] }
 0x15d   : > { %5884 = vmatmul.mubr.msk.f32.vlgmr.msra.gmra.mrb[2].mxu0 %vm751_vm0, %v6771_v32 }
 0x15e   : > { %6339 = vmatpush3.bf16.msra.mxu0 %v6338_v38  ;;  %5904 = vmatprep.mubr.msk.f32.mxu0 %vm6580_vm1, %v6581_v20 }
 0x15f   : > { %6340 = vmatprep.subr.bf16.mxu0 %v6579_v12 }
 0x162   : > { %6342 = vmatpush3.bf16.msra.mxu0 %v6341_v41 }
 0x163   : > { %6349 = vmatprep.subr.bf16.mxu0 %v6579_v12 }
 0x165   : > { %5905 = vmatmul.mubr.msk.f32.vlgmr.msra.gmra.mrb[4].mxu0 %vm751_vm0, %v6771_v32 }
 0x166   : > { %6351 = vmatpush3.bf16.msra.mxu0 %v6350_v44  ;;  %5926 = vmatprep.mubr.msk.f32.mxu0 %vm6580_vm1, %v6581_v20 }
 0x167   : > { %6352 = vmatprep.subr.bf16.mxu0 %v6579_v12 }
 0x16a   : > { %6354 = vmatpush3.bf16.msra.mxu0 %v6353_v47 }
 0x16b   : > { %6355 = vmatprep.subr.bf16.mxu0 %v6579_v12 }
 0x16d   : > { %5927 = vmatmul.mubr.msk.f32.vlgmr.msra.gmra.mrb[6].mxu0 %vm751_vm0, %v6771_v32 }
 0x16e   : > { %6357 = vmatpush3.bf16.msra.mxu0 %v6356_v50  ;;  %5957 = vmatprep.mubr.msk.f32.mxu0 %vm6580_vm1, %v6581_v20 }
 0x16f   : > { %6358 = vmatprep.subr.bf16.mxu0 %v6579_v12 }
 0x172   : > { %6360 = vmatpush3.bf16.msra.mxu0 %v6359_v53 }
 0x173   : > { %6367 = vmatprep.subr.bf16.mxu0 %v6579_v12 }
 0x175   : > { %5958 = vmatmul.mubr.msk.f32.vlgmr.msra.gmra.mrb[8].mxu0 %vm751_vm0, %v6771_v32 }
 0x176   : > { %6369 = vmatpush3.bf16.msra.mxu0 %v6368_v56  ;;  %5979 = vmatprep.mubr.msk.f32.mxu0 %vm6580_vm1, %v6581_v20 }
 0x177   : > { %6370 = vmatprep.subr.bf16.mxu0 %v6579_v12 }
 0x17a   : > { %6372 = vmatpush3.bf16.msra.mxu0 %v6371_v59 }
 0x17b   : > { %5992 = vmatprep.subr.mxu0 %v6581_v20 }
 0x17d   : > { %5980 = vmatmul.mubr.msk.f32.vlgmr.msra.gmra.mrb[10].mxu0 %vm751_vm0, %v6771_v32 }
 0x17e   : > { %5994 = vmatprep.mubr.msk.f32.mxu0 %vm6580_vm1, %v6581_v20 }
 0x228   : > { %v860_v61 = vpop.f32.mrb[0].mxu0  ;;  %v941_v62 = vpop.f32.mrb[0].mxu1 }
 0x229   : > { %v942_v0 = vadd.f32 %v5413_v60, %v941_v62  ;;  %v5863_v1 = vpop.f32.mrb[1].mxu0  ;;  %v5874_v2 = vpop.f32.mrb[1].mxu1  ;;  %v861_v3 = vadd.f32 %v5411_v63, %v860_v61  ;;  %v5445_v60 = vld [vmem:[%s7621_s10 + $0x8] sm:$0xff]  ;;  %v1193_v61 = vld [vmem:[%s7621_s10] sm:$0xff] }
 0x22a   : > { %v5455_v62 = vld [vmem:[%s7657_s1 + $0x40] sm:$0xff]  ;;  %v5456_v63 = vld [vmem:[%s7657_s1 + $0x48] sm:$0xff] }
 0x22b   : > { %5887 = vmatpush3.xpose.msk.msra.mxu1 %vm1032_vm2, %v942_v0  ;;  %v6362_v2 = vpack.c.bf16 %v5456_v63, %v5455_v62  ;;  %v5486_v63 = vld [vmem:[%s7662_s29 + $0x3] ss:$0 sm:$0xff] }
 0x22c   : > { %5891 = vmatprep.subr.mxu1 %v6581_v20 }
 0x22e   : > { %5889 = vmatmul.mubr.msk.f32.vlgmr.msra.gmra.mrb[2].mxu1 %vm1032_vm2, %v861_v3  ;;  %v5457_v3 = vld [vmem:[%s7657_s1 + $0x50] sm:$0xff] }
 0x22f   : > { %5893 = vmatprep.mubr.msk.f32.mxu1 %vm6580_vm1, %v6581_v20 }
 0x230   : > { %v1022_v5 = vpop.f32.mrb[2].mxu0 }
 0x231   : > { %v1023_v6 = vadd.f32 %v5415_v4, %v1022_v5  ;;  %v5885_v7 = vpop.f32.mrb[3].mxu0  ;;  %v5458_v4 = vld [vmem:[%s7657_s1 + $0x58] sm:$0xff] }
 0x232   : > { %v6365_v5 = vpack.c.bf16 %v5458_v4, %v5457_v3  ;;  %v5493_v4 = vld [vmem:[%s7620_s9 + $0x3] ss:$0 sm:$0xff] }
 0x233   : > { %5892 = vmatpush3.msra.mxu1 %v1023_v6 }
 0x234   : > { %6343 = vmatprep.subr.bf16.mxu1 %v6579_v12 }
 0x238   : > { %v1273_v8 = vpop.f32.mrb[4].mxu0 }
 0x239   : > { %v5906_v9 = vpop.f32.mrb[5].mxu0  ;;  %v1274_v46 = vadd.f32 %v5426_v42, %v1273_v8  ;;  %v5488_v42 = vld [vmem:[%s7659_s7 + $0x60] sm:$0xff] }
 0x240   : > { %v1439_v10 = vpop.f32.mrb[6].mxu0 }
 0x241   : > { %v5928_v11 = vpop.f32.mrb[7].mxu0  ;;  %v1440_v47 = vadd.f32 %v5440_v45, %v1439_v10  ;;  %v5490_v45 = vld [vmem:[%s7659_s7 + $0x70] sm:$0xff] }
 0x242   : > { %v5460_v11 = vld [vmem:[%s7662_s29 + $0x2] ss:$0 sm:$0xff] }
 0x248   : > { %v6880_v13 = vpop.f32.mrb[8].mxu0 }
 0x249   : > { %v5959_v14 = vpop.f32.mrb[9].mxu0 }
 0x250   : > { %v6882_v15 = vpop.f32.mrb[10].mxu0 }
 0x251   : > { %v5981_v16 = vpop.f32.mrb[11].mxu0 }
 0x252   : > { %v5453_v16 = vld [vmem:[%s7663_s25 + $0x2] ss:$0 sm:$0xff] }
 0x301   : > { %v1105_v18 = vpop.f32.mrb[2].mxu1 }
 0x302   : > { %v1106_v19 = vadd.f32 %v6891_v17, %v1105_v18  ;;  %v5890_v21 = vpop.f32.mrb[3].mxu1 }
 0x303   : > { %v5467_v21 = vld [vmem:[%s7620_s9 + $0x2] ss:$0 sm:$0xff] }
 0x304   : > { %v1109_v22 = vsel %vm1032_vm2, %v1106_v19, -inf }
 0x305   : > { %1110 = vmax.xlane.f32.xlu1 %v1109_v22  ;;  %v1831_v22 = vadd.f32 %v5453_v16, %v6880_v13 }
 0x392   : > { %v1111_v23 = vpop.xlane.xlu1 %1110 }
 0x393   : > { %v1112_v24 = vsub.f32 %v1106_v19, %v1111_v23  ;;  %v1997_v23 = vadd.f32 %v5467_v21, %v6882_v15  ;;  %v5498_v21 = vld [vmem:[%s7621_s10 + $0x18] sm:$0xff] }
 0x395   : > { %v1113_v25 = vmul.f32 1.442695, %v1112_v24 }
 0x397   : > { %6524 = vpow2.f32 %v1113_v25 }
 0x3a1   : > { %v6525_v26 = vpop.eup %6524 }
 0x3a2   : > { %v1115_v27 = vsel %vm1032_vm2, %v6525_v26, 0.0 }
 0x3a3   : > { %1116 = vadd.xlane.f32.xlu1 %v1115_v27 }
 0x430   : > { %v1117_v28 = vpop.xlane.xlu1 %1116 }
 0x431   : > { %6526 = vrcp.f32 %v1117_v28 }
 0x43b   : > { %v6527_v31 = vpop.eup %6526 }
 0x43c   : > { %v1119_v34 = vmul.f32 %v6527_v31, %v6525_v26  ;;  %v5472_v31 = vld [vmem:[%s7621_s10 + $0x10] sm:$0xff] }
 0x43d   : > { %5993 = vmatpush3.msra.mxu0 %v5472_v31 }
 0x43e   : > { %5894 = vmatmul.mubr.msk.f32.vlgmr.msra.gmra.mrb[4].mxu1 %vm1032_vm2, %v1119_v34  ;;  %6379 = vmatprep.subr.bf16.mxu0 %v6579_v12  ;;  %v5474_v34 = vld [vmem:[%s7656_s30 + $0x60] sm:$0xff] }
 0x43f   : > { %6345 = vmatpush3.bf16.msra.mxu1 %v6344_v33  ;;  %5915 = vmatprep.mubr.msk.f32.mxu1 %vm6580_vm1, %v6581_v20 }
 0x440   : > { %6346 = vmatprep.subr.bf16.mxu1 %v6579_v12 }
 0x443   : > { %6348 = vmatpush3.bf16.msra.mxu1 %v6347_v37  ;;  %v6374_v37 = vpack.c.bf16 %v5475_v35, %v5474_v34 }
 0x444   : > { %5929 = vmatprep.subr.mxu1 %v6581_v20 }
 0x446   : > { %5916 = vmatmul.mubr.msk.f32.vlgmr.msra.gmra.mrb[6].mxu1 %vm751_vm0, %v6771_v32 }
 0x447   : > { %5931 = vmatprep.mubr.msk.f32.mxu1 %vm6580_vm1, %v6581_v20 }
 0x511   : > { %v1189_v38 = vpop.f32.mrb[4].mxu1 }
 0x512   : > { %v5895_v39 = vpop.f32.mrb[5].mxu1 }
 0x513   : > { %v5476_v39 = vld [vmem:[%s7656_s30 + $0x70] sm:$0xff] }
 0x519   : > { %v1356_v41 = vpop.f32.mrb[6].mxu1 }
 0x51a   : > { %v1357_v43 = vadd.f32 %v5433_v40, %v1356_v41  ;;  %v5917_v44 = vpop.f32.mrb[7].mxu1  ;;  %v5477_v40 = vld [vmem:[%s7656_s30 + $0x78] sm:$0xff] }
 0x51b   : > { %v6377_v41 = vpack.c.bf16 %v5477_v40, %v5476_v39  ;;  %v2760_v39 = vld [vmem:[%s7625_s14 + $0x8] sm:$0xff] }
 0x51c   : > { %5930 = vmatpush3.xpose.msk.msra.mxu1 %vm1032_vm2, %v1357_v43  ;;  %v5489_v43 = vld [vmem:[%s7659_s7 + $0x68] sm:$0xff] }
 0x51d   : > { %5934 = vmatprep.subr.mxu1 %v6581_v20  ;;  %v6386_v44 = vpack.c.bf16 %v5489_v43, %v5488_v42 }
 0x51f   : > { %5932 = vmatmul.mubr.msk.f32.vlgmr.msra.gmra.mrb[8].mxu1 %vm1032_vm2, %v1274_v46  ;;  %v5491_v46 = vld [vmem:[%s7659_s7 + $0x78] sm:$0xff] }
 0x520   : > { %5935 = vmatpush3.msra.mxu1 %v1440_v47  ;;  %5936 = vmatprep.mubr.msk.f32.mxu1 %vm6580_vm1, %v6581_v20  ;;  %v6389_v47 = vpack.c.bf16 %v5491_v46, %v5490_v45 }
 0x521   : > { %5939 = vmatprep.subr.mxu1 %v6581_v20 }
 0x5f2   : > { %v1515_v48 = vpop.f32.mrb[8].mxu1 }
 0x5f3   : > { %v1516_v49 = vadd.f32 %v6891_v17, %v1515_v48  ;;  %v5933_v50 = vpop.f32.mrb[9].mxu1  ;;  %v5481_v48 = vld [vmem:[%s7657_s1 + $0x60] sm:$0xff] }
 0x5f5   : > { %v1519_v51 = vsel %vm1032_vm2, %v1516_v49, -inf }
 0x5f6   : > { %1520 = vmax.xlane.f32.xlu0 %v1519_v51  ;;  %v5483_v51 = vld [vmem:[%s7657_s1 + $0x70] sm:$0xff] }
 0x683   : > { %v1521_v52 = vpop.xlane.xlu0 %1520 }
 0x684   : > { %v1522_v53 = vsub.f32 %v1516_v49, %v1521_v52  ;;  %v5482_v49 = vld [vmem:[%s7657_s1 + $0x68] sm:$0xff]  ;;  %v5484_v52 = vld [vmem:[%s7657_s1 + $0x78] sm:$0xff] }
 0x685   : > { %v6380_v50 = vpack.c.bf16 %v5482_v49, %v5481_v48  ;;  %v5502_v49 = vld [vmem:[%s7624_s13] ss:$0 sm:$0xff] }
 0x686   : > { %v1523_v54 = vmul.f32 1.442695, %v1522_v53 }
 0x688   : > { %6528 = vpow2.f32 %v1523_v54 }
 0x692   : > { %v6529_v55 = vpop.eup %6528 }
 0x693   : > { %v1525_v56 = vsel %vm1032_vm2, %v6529_v55, 0.0 }
 0x694   : > { %1526 = vadd.xlane.f32.xlu1 %v1525_v56 }
 0x721   : > { %v1527_v57 = vpop.xlane.xlu1 %1526 }
 0x722   : > { %6530 = vrcp.f32 %v1527_v57 }
 0x72c   : > { %v6531_v58 = vpop.eup %6530 }
 0x72d   : > { %v1529_v59 = vmul.f32 %v6531_v58, %v6529_v55  ;;  %v6383_v55 = vpack.c.bf16 %v5484_v52, %v5483_v51  ;;  %v2852_v52 = vld [vmem:[%s7627_s16] sm:$0xff] }
 0x72f   : > { %5937 = vmatmul.mubr.msk.f32.vlgmr.msra.gmra.mrb[10].mxu1 %vm1032_vm2, %v1529_v59 }
 0x730   : > { %5940 = vmatpush3.msra.mxu1 %v5445_v60  ;;  %5941 = vmatprep.mubr.msk.f32.mxu1 %vm6580_vm1, %v6581_v20 }
 0x731   : > { %5944 = vmatprep.subr.mxu1 %v6581_v20 }
 0x802   : > { %v1599_v0 = vpop.f32.mrb[10].mxu1 }
 0x803   : > { %v5938_v1 = vpop.f32.mrb[11].mxu1  ;;  %5942 = vmatmul.mubr.msk.f32.vlgmr.msra.gmra.mrb[12].mxu1 %vm1032_vm2, %v1599_v0 }
 0x804   : > { %5945 = vmatpush3.msra.mxu1 %v1193_v61  ;;  %5946 = vmatprep.mubr.msk.f32.mxu1 %vm6580_vm1, %v6581_v20  ;;  %v5479_v1 = vld [vmem:[%s7663_s25 + $0x3] ss:$0 sm:$0xff] }
 0x805   : > { %6361 = vmatprep.subr.bf16.mxu1 %v6579_v12 }
 0x807   : > { %5947 = vmatmul.mubr.msk.f32.vlgmr.msra.gmra.mrb[14].mxu1 %vm1032_vm2, %v1189_v38 }
 0x808   : > { %6363 = vmatpush3.bf16.msra.mxu1 %v6362_v2  ;;  %5968 = vmatprep.mubr.msk.f32.mxu1 %vm6580_vm1, %v6581_v20 }
 0x809   : > { %6364 = vmatprep.subr.bf16.mxu1 %v6579_v12 }
 0x80c   : > { %6366 = vmatpush3.bf16.msra.mxu1 %v6365_v5 }
 0x80d   : > { %5982 = vmatprep.subr.mxu1 %v6581_v20 }
 0x80f   : > { %5969 = vmatmul.mubr.msk.f32.vlgmr.msra.gmra.mrb[16].mxu1 %vm751_vm0, %v6771_v32 }
 0x810   : > { %5984 = vmatprep.mubr.msk.f32.mxu1 %vm6580_vm1, %v6581_v20 }
 0x8d6   : > { %v1674_v6 = vpop.f32.mrb[12].mxu1 }
 0x8d7   : > { %v5943_v7 = vpop.f32.mrb[13].mxu1 }
 0x8da   : > { %v1747_v8 = vpop.f32.mrb[14].mxu1 }
 0x8db   : > { %v6970_v9 = vadd.f32 %v1747_v8, %v1674_v6  ;;  %v5948_v10 = vpop.f32.mrb[15].mxu1 }
 0x8e2   : > { %v1913_v14 = vpop.f32.mrb[16].mxu1 }
 0x8e3   : > { %v1914_v18 = vadd.f32 %v5460_v11, %v1913_v14  ;;  %v5970_v19 = vpop.f32.mrb[17].mxu1 }
 0x8e5   : > { %5983 = vmatpush3.xpose.msk.msra.mxu1 %vm1032_vm2, %v1914_v18 }
 0x8e6   : > { %5987 = vmatprep.subr.mxu1 %v6581_v20 }
 0x8e8   : > { %5985 = vmatmul.mubr.msk.f32.vlgmr.msra.gmra.mrb[18].mxu1 %vm1032_vm2, %v1831_v22 }
 0x8e9   : > { %5988 = vmatpush3.msra.mxu1 %v1997_v23  ;;  %5989 = vmatprep.mubr.msk.f32.mxu1 %vm6580_vm1, %v6581_v20 }
 0x8ea   : > { %6373 = vmatprep.subr.bf16.mxu1 %v6579_v12 }
 0x9bb   : > { %v2072_v24 = vpop.f32.mrb[18].mxu1 }
 0x9bc   : > { %v2073_v25 = vadd.f32 %v6891_v17, %v2072_v24  ;;  %v5986_v26 = vpop.f32.mrb[19].mxu1 }
 0x9be   : > { %v2076_v27 = vsel %vm1032_vm2, %v2073_v25, -inf }
 0x9bf   : > { %2077 = vmax.xlane.f32.xlu0 %v2076_v27 }
 0xa4c   : > { %v2078_v13 = vpop.xlane.xlu0 %2077 }
 0xa4d   : > { %v2079_v28 = vsub.f32 %v2073_v25, %v2078_v13  ;;  %v5500_v13 = vld [vmem:[%s7622_s11] ss:$0 sm:$0xff] }
 0xa4f   : > { %v2080_v29 = vmul.f32 1.442695, %v2079_v28 }
 0xa51   : > { %6532 = vpow2.f32 %v2080_v29 }
 0xa5b   : > { %v6533_v15 = vpop.eup %6532 }
 0xa5c   : > { %v2082_v30 = vsel %vm1032_vm2, %v6533_v15, 0.0 }
 0xa5d   : > { %2083 = vadd.xlane.f32.xlu1 %v2082_v30 }
 0xaea   : > { %v2084_v33 = vpop.xlane.xlu1 %2083 }
 0xaeb   : > { %6534 = vrcp.f32 %v2084_v33 }
 0xaf5   : > { %v6535_v36 = vpop.eup %6534 }
 0xaf6   : > { %v2086_v38 = vmul.f32 %v6535_v36, %v6533_v15 }
 0xaf8   : > { %5990 = vmatmul.mubr.msk.f32.vlgmr.msra.gmra.mrb[20].mxu1 %vm1032_vm2, %v2086_v38  ;;  %v2759_v38 = vld [vmem:[%s7625_s14] sm:$0xff] }
 0xaf9   : > { %6375 = vmatpush3.bf16.msra.mxu1 %v6374_v37  ;;  %6005 = vmatprep.mubr.msk.f32.mxu1 %vm6580_vm1, %v6581_v20  ;;  %v6392_v40 = vpack.c.bf16 %v2760_v39, %v2759_v38  ;;  %v5526_v38 = vld [vmem:[%s7659_s7 + $0x98] sm:$0xff] }
 0xafa   : > { %6376 = vmatprep.subr.bf16.mxu1 %v6579_v12 }
 0xafd   : > { %6378 = vmatpush3.bf16.msra.mxu1 %v6377_v41  ;;  %v2762_v41 = vld [vmem:[%s7625_s14 + $0x18] sm:$0xff] }
 0xafe   : > { %6385 = vmatprep.subr.bf16.mxu1 %v6579_v12 }
 0xb00   : > { %6006 = vmatmul.mubr.msk.f32.vlgmr.msra.gmra.mrb[22].mxu1 %vm751_vm0, %v6771_v32 }
 0xb01   : > { %6387 = vmatpush3.bf16.msra.mxu1 %v6386_v44  ;;  %6027 = vmatprep.mubr.msk.f32.mxu1 %vm6580_vm1, %v6581_v20 }
 0xb02   : > { %6388 = vmatprep.subr.bf16.mxu1 %v6579_v12 }
 0xb05   : > { %6390 = vmatpush3.bf16.msra.mxu1 %v6389_v47  ;;  %v5501_v47 = vld [vmem:[%s7623_s12] ss:$0 sm:$0xff] }
 0xb06   : > { %6040 = vmatprep.subr.mxu1 %v6581_v20 }
 0xb08   : > { %6028 = vmatmul.mubr.msk.f32.vlgmr.msra.gmra.mrb[24].mxu1 %vm751_vm0, %v6771_v32 }
 0xb09   : > { %6042 = vmatprep.mubr.msk.f32.mxu1 %vm6580_vm1, %v6581_v20  ;;  %6041 = vmatpush3.msra.mxu1 %v5498_v21 }
 0xb0a   : > { %6397 = vmatprep.subr.bf16.mxu1 %v6579_v12 }
 0xbcb   : > { %v2156_v53 = vpop.f32.mrb[20].mxu1 }
 0xbcc   : > { %v5991_v54 = vpop.f32.mrb[21].mxu1  ;;  %5995 = vmatmul.mubr.msk.f32.vlgmr.msra.gmra.mrb[12].mxu0 %vm1032_vm2, %v2156_v53  ;;  %v2853_v53 = vld [vmem:[%s7627_s16 + $0x8] sm:$0xff] }
 0xbcd   : > { %6381 = vmatpush3.bf16.msra.mxu0 %v6380_v50  ;;  %6016 = vmatprep.mubr.msk.f32.mxu0 %vm6580_vm1, %v6581_v20  ;;  %v6398_v54 = vpack.c.bf16 %v2853_v53, %v2852_v52  ;;  %v5519_v52 = vld [vmem:[%s7657_s1 + $0x98] sm:$0xff] }
 0xbce   : > { %6382 = vmatprep.subr.bf16.mxu0 %v6579_v12 }
 0xbd1   : > { %6384 = vmatpush3.bf16.msra.mxu0 %v6383_v55  ;;  %v2854_v55 = vld [vmem:[%s7627_s16 + $0x10] sm:$0xff] }
 0xbd2   : > { %6030 = vmatprep.subr.mxu0 %v6581_v20 }
 0xbd3   : > { %v2315_v56 = vpop.f32.mrb[22].mxu1 }
 0xbd4   : > { %v6007_v57 = vpop.f32.mrb[23].mxu1  ;;  %6017 = vmatmul.mubr.msk.f32.vlgmr.msra.gmra.mrb[14].mxu0 %vm751_vm0, %v6771_v32  ;;  %v2316_v5 = vadd.f32 %v5479_v1, %v2315_v56  ;;  %v2855_v56 = vld [vmem:[%s7627_s16 + $0x18] sm:$0xff] }
 0xbd5   : > { %6032 = vmatprep.mubr.msk.f32.mxu0 %vm6580_vm1, %v6581_v20  ;;  %v6401_v57 = vpack.c.bf16 %v2855_v56, %v2854_v55 }
 0xbdb   : > { %v2481_v58 = vpop.f32.mrb[24].mxu1 }
 0xbdc   : > { %v6029_v59 = vpop.f32.mrb[25].mxu1  ;;  %v2482_v6 = vadd.f32 %v5493_v4, %v2481_v58  ;;  %v2856_v58 = vld [vmem:[%s7627_s16 + $0x20] sm:$0xff] }
 0xbdd   : > { %v2857_v59 = vld [vmem:[%s7627_s16 + $0x28] sm:$0xff] }
 0xc9f   : > { %v2231_v60 = vpop.f32.mrb[12].mxu0 }
 0xca0   : > { %v2235_v61 = vadd.f32 %v2231_v60, %v6970_v9  ;;  %v5996_v62 = vpop.f32.mrb[13].mxu0  ;;  %v6404_v60 = vpack.c.bf16 %v2857_v59, %v2856_v58 }
 0xca1   : > { %v2859_v62 = vld [vmem:[%s7627_s16 + $0x38] sm:$0xff] }
 0xca7   : > { %v2398_v0 = vpop.f32.mrb[14].mxu0 }
 0xca8   : > { %v2399_v2 = vadd.f32 %v5486_v63, %v2398_v0  ;;  %v6018_v3 = vpop.f32.mrb[15].mxu0  ;;  %v5503_v0 = vld [vmem:[%s7626_s15] ss:$0 sm:$0xff] }
 0xcaa   : > { %6031 = vmatpush3.xpose.msk.msra.mxu0 %vm1032_vm2, %v2399_v2 }
 0xcab   : > { %6035 = vmatprep.subr.mxu0 %v6581_v20 }
 0xcad   : > { %6033 = vmatmul.mubr.msk.f32.vlgmr.msra.gmra.mrb[16].mxu0 %vm1032_vm2, %v2316_v5 }
 0xcae   : > { %6036 = vmatpush3.msra.mxu0 %v2482_v6  ;;  %6037 = vmatprep.mubr.msk.f32.mxu0 %vm6580_vm1, %v6581_v20 }
 0xcaf   : > { %6391 = vmatprep.subr.bf16.mxu0 %v6579_v12 }
 0xd80   : > { %v2557_v7 = vpop.f32.mrb[16].mxu0 }
 0xd81   : > { %v2558_v8 = vadd.f32 %v6891_v17, %v2557_v7  ;;  %v6034_v9 = vpop.f32.mrb[17].mxu0 }
 0xd83   : > { %v2561_v10 = vsel %vm1032_vm2, %v2558_v8, -inf }
 0xd84   : > { %2562 = vmax.xlane.f32.xlu0 %v2561_v10 }
 0xe11   : > { %v2563_v11 = vpop.xlane.xlu0 %2562 }
 0xe12   : > { %v2564_v14 = vsub.f32 %v2558_v8, %v2563_v11 }
 0xe14   : > { %v2565_v16 = vmul.f32 1.442695, %v2564_v14 }
 0xe16   : > { %6536 = vpow2.f32 %v2565_v16  ;;  %v5505_v16 = vld [vmem:[%s7628_s17] ss:$0 sm:$0xff] }
 0xe20   : > { %v6537_v18 = vpop.eup %6536 }
 0xe21   : > { %v2567_v19 = vsel %vm1032_vm2, %v6537_v18, 0.0 }
 0xe22   : > { %2568 = vadd.xlane.f32.xlu1 %v2567_v19 }
 0xeaf   : > { %v2569_v22 = vpop.xlane.xlu1 %2568 }
 0xeb0   : > { %6538 = vrcp.f32 %v2569_v22 }
 0xeba   : > { %v6539_v23 = vpop.eup %6538 }
 0xebb   : > { %v2571_v24 = vmul.f32 %v6539_v23, %v6537_v18 }
 0xebd   : > { %6038 = vmatmul.mubr.msk.f32.vlgmr.msra.gmra.mrb[18].mxu0 %vm1032_vm2, %v2571_v24 }
 0xebe   : > { %6053 = vmatprep.mubr.msk.f32.mxu0 %vm6580_vm1, %v6581_v20  ;;  %6393 = vmatpush3.bf16.msra.mxu0 %v6392_v40 }
 0xebf   : > { %6394 = vmatprep.subr.bf16.mxu0 %v6579_v12 }
 0xf90   : > { %v2641_v25 = vpop.f32.mrb[18].mxu0 }
 0xf91   : > { %v6039_v26 = vpop.f32.mrb[19].mxu0  ;;  %6043 = vmatmul.mubr.msk.f32.vlgmr.msra.gmra.mrb[26].mxu1 %vm1032_vm2, %v2641_v25 }
 0xf92   : > { %6072 = vmatprep.mubr.msk.f32.mxu1 %vm6580_vm1, %v6581_v20  ;;  %6399 = vmatpush3.bf16.msra.mxu1 %v6398_v54  ;;  %v5528_v54 = vld [vmem:[%s7620_s9 + $0x4] ss:$0 sm:$0xff] }
 0xf93   : > { %6400 = vmatprep.subr.bf16.mxu1 %v6579_v12 }
 0xf96   : > { %6402 = vmatpush3.bf16.msra.mxu1 %v6401_v57 }
 0xf97   : > { %6403 = vmatprep.subr.bf16.mxu1 %v6579_v12 }
 0xf9a   : > { %6405 = vmatpush3.bf16.msra.mxu1 %v6404_v60  ;;  %v5521_v60 = vld [vmem:[%s7662_s29 + $0x4] ss:$0 sm:$0xff] }
 0xf9b   : > { %6406 = vmatprep.subr.bf16.mxu1 %v6579_v12 }
0x1064   : > { %v2716_v27 = vpop.f32.mrb[26].mxu1 }
0x1065   : > { %v2720_v28 = vadd.f32 %v2716_v27, %v2235_v61  ;;  %v6044_v29 = vpop.f32.mrb[27].mxu1  ;;  %v2858_v61 = vld [vmem:[%s7627_s16 + $0x30] sm:$0xff] }
0x1066   : > { %v6407_v63 = vpack.c.bf16 %v2859_v62, %v2858_v61  ;;  %v5510_v29 = vld [vmem:[%s7656_s30 + $0x88] sm:$0xff]  ;;  %v5534_v62 = vld [vmem:[%s7656_s30 + $0xa0] sm:$0xff] }
0x1067   : > { %v2728_v15 = vadd.f32 %v5500_v13, %v2720_v28  ;;  %v5509_v28 = vld [vmem:[%s7656_s30 + $0x80] sm:$0xff] }
0x1068   : > { %6408 = vmatpush3.bf16.msra.mxu1 %v6407_v63  ;;  %v5535_v63 = vld [vmem:[%s7656_s30 + $0xa8] sm:$0xff] }
0x1069   : > { %v2729_v30 = vadd.f32 %v2728_v15, %v6771_v32  ;;  %v2761_v32 = vld [vmem:[%s7625_s14 + $0x10] sm:$0xff]  ;;  %6421 = vmatprep.subr.bf16.mxu1 %v6579_v12  ;;  %v6410_v15 = vpack.c.bf16 %v5510_v29, %v5509_v28 }
0x106a   : > { %v6395_v42 = vpack.c.bf16 %v2762_v41, %v2761_v32 }
0x106b   : > { %v2732_v31 = vsel %vm751_vm0, %v2729_v30, 0.0 }
0x106c   : > { %2733 = vadd.xlane.f32.xlu0 %v2732_v31  ;;  %6396 = vmatpush3.bf16.msra.mxu0 %v6395_v42  ;;  %v5524_v31 = vld [vmem:[%s7659_s7 + $0x88] sm:$0xff] }
0x106d   : > { %6409 = vmatprep.subr.bf16.mxu0 %v6579_v12 }
0x10f9   : > { %v2734_v33 = vpop.xlane.xlu0 %2733 }
0x10fa   : > { %v2735_v34 = vmul.f32 0.03125, %v2734_v33 }
0x10fc   : > { %v2736_v35 = vsub.f32 %v2729_v30, %v2735_v34  ;;  %v5523_v30 = vld [vmem:[%s7659_s7 + $0x80] sm:$0xff]  ;;  %v5511_v34 = vld [vmem:[%s7656_s30 + $0x90] sm:$0xff] }
0x10fd   : > { %v6422_v33 = vpack.c.bf16 %v5524_v31, %v5523_v30  ;;  %v5541_v31 = vld [vmem:[%s7657_s1 + $0xa0] sm:$0xff] }
0x10fe   : > { %v2737_v36 = vmul.f32 %v2736_v35, %v2736_v35 }
0x1100   : > { %v2738_v37 = vsel %vm751_vm0, %v2737_v36, 0.0 }
0x1101   : > { %2739 = vadd.xlane.f32.xlu1 %v2738_v37  ;;  %v5525_v37 = vld [vmem:[%s7659_s7 + $0x90] sm:$0xff] }
0x1102   : > { %v6425_v39 = vpack.c.bf16 %v5526_v38, %v5525_v37  ;;  %v5543_v37 = vld [vmem:[%s7657_s1 + $0xb0] sm:$0xff]  ;;  %v5544_v38 = vld [vmem:[%s7657_s1 + $0xb8] sm:$0xff] }
0x118e   : > { %v2740_v43 = vpop.xlane.xlu1 %2739 }
0x118f   : > { %v2741_v44 = vmul.f32 0.03125, %v2740_v43  ;;  %v5507_v43 = vld [vmem:[%s7629_s18] ss:$0 sm:$0xff] }
0x1191   : > { %v2742_v45 = vadd.f32 1e-05, %v2741_v44 }
0x1193   : > { %6540 = vrsqrt.f32 %v2742_v45  ;;  %v5516_v45 = vld [vmem:[%s7657_s1 + $0x80] sm:$0xff] }
0x119d   : > { %v6541_v46 = vpop.eup %6540 }
0x119e   : > { %v2744_v48 = vmul.f32 %v6541_v46, %v2736_v35  ;;  %v5512_v35 = vld [vmem:[%s7656_s30 + $0x98] sm:$0xff]  ;;  %v5517_v46 = vld [vmem:[%s7657_s1 + $0x88] sm:$0xff] }
0x119f   : > { %v6413_v36 = vpack.c.bf16 %v5512_v35, %v5511_v34 }
0x11a0   : > { %v2751_v50 = vmul.f32 %v5501_v47, %v2744_v48  ;;  %v5508_v47 = vld [vmem:[%s7630_s19] ss:$0 sm:$0xff] }
0x11a2   : > { %v2758_v51 = vadd.f32 %v5502_v49, %v2751_v50  ;;  %v6416_v49 = vpack.c.bf16 %v5517_v46, %v5516_v45  ;;  %v5553_v46 = vld [vmem:[%s7620_s9 + $0x5] ss:$0 sm:$0xff] }
0x11a4   : > { %6054 = vmatmul.mubr.msk.f32.vlgmr.msra.gmra.mrb[20].mxu0 %vm751_vm0, %v2758_v51 }
0x11a5   : > { %6083 = vmatprep.mubr.msk.f32.mxu0 %vm6580_vm1, %v6581_v20  ;;  %6411 = vmatpush3.bf16.msra.mxu0 %v6410_v15 }
0x11a6   : > { %6412 = vmatprep.subr.bf16.mxu0 %v6579_v12 }
0x11a9   : > { %6414 = vmatpush3.bf16.msra.mxu0 %v6413_v36 }
0x11aa   : > { %6415 = vmatprep.subr.bf16.mxu0 %v6579_v12 }
0x1277   : > { %v2839_v1 = vpop.f32.mrb[20].mxu0 }
0x1278   : > { %v2840_v2 = vadd.f32 %v5503_v0, %v2839_v1  ;;  %v6055_v3 = vpop.f32.mrb[21].mxu0  ;;  %v5514_v0 = vld [vmem:[%s7663_s25 + $0x4] ss:$0 sm:$0xff] }
0x1279   : > { %v6428_v3 = vpack.c.bf16 %v5535_v63, %v5534_v62  ;;  %v5533_v62 = vld [vmem:[%s7621_s10 + $0x20] sm:$0xff] }
0x127a   : > { %v2844_v4 = vmul.f32 0.044715, %v2840_v2  ;;  %v2843_v10 = vmul.f32 0.5, %v2840_v2  ;;  %v5568_v63 = vld [vmem:[%s7657_s1 + $0xc0] sm:$0xff] }
0x127c   : > { %v2845_v5 = vmul.f32 %v2844_v4, %v2840_v2 }
0x127e   : > { %v2846_v6 = vmul.f32 %v2845_v5, %v2840_v2  ;;  %v5536_v5 = vld [vmem:[%s7656_s30 + $0xb0] sm:$0xff] }
0x1280   : > { %v2847_v7 = vadd.f32 %v2846_v6, %v2840_v2  ;;  %v5537_v6 = vld [vmem:[%s7656_s30 + $0xb8] sm:$0xff] }
0x1282   : > { %v2848_v8 = vmul.f32 0.7978846, %v2847_v7  ;;  %v6431_v7 = vpack.c.bf16 %v5537_v6, %v5536_v5  ;;  %v5561_v5 = vld [vmem:[%s7656_s30 + $0xc0] sm:$0xff]  ;;  %v5562_v6 = vld [vmem:[%s7656_s30 + $0xc8] sm:$0xff] }
0x1284   : > { %6542 = vtanh.f32 %v2848_v8  ;;  %v5548_v8 = vld [vmem:[%s7659_s7 + $0xa0] sm:$0xff] }
0x128e   : > { %v6543_v9 = vpop.eup %6542 }
0x128f   : > { %v2850_v11 = vadd.f32 1.0, %v6543_v9  ;;  %v5549_v9 = vld [vmem:[%s7659_s7 + $0xa8] sm:$0xff] }
0x1291   : > { %v2851_v14 = vmul.f32 %v2850_v11, %v2843_v10  ;;  %v6440_v10 = vpack.c.bf16 %v5549_v9, %v5548_v8  ;;  %v5550_v11 = vld [vmem:[%s7659_s7 + $0xb0] sm:$0xff]  ;;  %v5564_v9 = vld [vmem:[%s7656_s30 + $0xd8] sm:$0xff] }
0x1292   : > { %v5563_v8 = vld [vmem:[%s7656_s30 + $0xd0] sm:$0xff] }
0x1293   : > { %6073 = vmatmul.mubr.msk.f32.vlgmr.msra.gmra.mrb[28].mxu1 %vm2867_vm3, %v2851_v14  ;;  %v5551_v14 = vld [vmem:[%s7659_s7 + $0xb8] sm:$0xff] }
0x1294   : > { %6105 = vmatprep.mubr.msk.f32.mxu1 %vm6580_vm1, %v6581_v20  ;;  %6423 = vmatpush3.bf16.msra.mxu1 %v6422_v33  ;;  %v5542_v33 = vld [vmem:[%s7657_s1 + $0xa8] sm:$0xff] }
0x1295   : > { %6424 = vmatprep.subr.bf16.mxu1 %v6579_v12  ;;  %v6434_v35 = vpack.c.bf16 %v5542_v33, %v5541_v31  ;;  %v5566_v31 = vld [vmem:[%s7663_s25 + $0x6] ss:$0 sm:$0xff] }
0x1298   : > { %6426 = vmatpush3.bf16.msra.mxu1 %v6425_v39  ;;  %v6437_v39 = vpack.c.bf16 %v5544_v38, %v5543_v37 }
0x1299   : > { %6113 = vmatprep.subr.mxu1 %v6581_v20 }
0x1366   : > { %v2937_v18 = vpop.f32.mrb[28].mxu1 }
0x1367   : > { %v2938_v19 = vadd.f32 %v5505_v16, %v2937_v18  ;;  %v6074_v21 = vpop.f32.mrb[29].mxu1  ;;  %v6443_v16 = vpack.c.bf16 %v5551_v14, %v5550_v11  ;;  %v6449_v14 = vpack.c.bf16 %v5564_v9, %v5563_v8 }
0x1369   : > { %v2941_v22 = vadd.f32 %v2938_v19, %v2758_v51  ;;  %v5518_v51 = vld [vmem:[%s7657_s1 + $0x90] sm:$0xff] }
0x136a   : > { %v6419_v53 = vpack.c.bf16 %v5519_v52, %v5518_v51 }
0x136b   : > { %v2944_v23 = vsel %vm751_vm0, %v2941_v22, 0.0 }
0x136c   : > { %2945 = vadd.xlane.f32.xlu0 %v2944_v23 }
0x13f9   : > { %v2946_v24 = vpop.xlane.xlu0 %2945 }
0x13fa   : > { %v2947_v25 = vmul.f32 0.03125, %v2946_v24 }
0x13fc   : > { %v2948_v26 = vsub.f32 %v2941_v22, %v2947_v25 }
0x13fe   : > { %v2949_v27 = vmul.f32 %v2948_v26, %v2948_v26 }
0x1400   : > { %v2950_v13 = vsel %vm751_vm0, %v2949_v27, 0.0 }
0x1401   : > { %2951 = vadd.xlane.f32.xlu1 %v2950_v13 }
0x148e   : > { %v2952_v40 = vpop.xlane.xlu1 %2951 }
0x148f   : > { %v2953_v32 = vmul.f32 0.03125, %v2952_v40 }
0x1491   : > { %v2954_v41 = vadd.f32 1e-05, %v2953_v32 }
0x1493   : > { %6544 = vrsqrt.f32 %v2954_v41  ;;  %v5546_v41 = vld [vmem:[%s7662_s29 + $0x5] ss:$0 sm:$0xff] }
0x149d   : > { %v6545_v42 = vpop.eup %6544 }
0x149e   : > { %v2956_v44 = vmul.f32 %v6545_v42, %v2948_v26 }
0x14a0   : > { %v2963_v48 = vmul.f32 %v5507_v43, %v2956_v44  ;;  %v5539_v43 = vld [vmem:[%s7663_s25 + $0x5] ss:$0 sm:$0xff] }
0x14a2   : > { %v7193_v50 = vadd.f32 %v5508_v47, %v2963_v48 }
0x14a4   : > { %6084 = vmatmul.mubr.msk.f32.vlgmr.msra.gmra.mrb[22].mxu0 %vm751_vm0, %v7193_v50  ;;  %6106 = vmatmul.mubr.msk.f32.vlgmr.msra.gmra.mrb[30].mxu1 %vm751_vm0, %v7193_v50 }
0x14a5   : > { %6417 = vmatpush3.bf16.msra.mxu0 %v6416_v49  ;;  %6094 = vmatprep.mubr.msk.f32.mxu0 %vm6580_vm1, %v6581_v20 }
0x14a6   : > { %6418 = vmatprep.subr.bf16.mxu0 %v6579_v12  ;;  %6115 = vmatprep.mubr.msk.f32.mxu1 %vm6580_vm1, %v6581_v20 }
0x14a9   : > { %6420 = vmatpush3.bf16.msra.mxu0 %v6419_v53 }
0x14aa   : > { %6108 = vmatprep.subr.mxu0 %v6581_v20 }
0x14ac   : > { %6095 = vmatmul.mubr.msk.f32.vlgmr.msra.gmra.mrb[24].mxu0 %vm751_vm0, %v7193_v50 }
0x14ad   : > { %6110 = vmatprep.mubr.msk.f32.mxu0 %vm6580_vm1, %v6581_v20 }
0x1577   : > { %v3053_v55 = vpop.f32.mrb[22].mxu0  ;;  %v3219_v56 = vpop.f32.mrb[30].mxu1 }
0x1578   : > { %v3220_v57 = vadd.f32 %v5528_v54, %v3219_v56  ;;  %v6085_v58 = vpop.f32.mrb[23].mxu0  ;;  %v6107_v59 = vpop.f32.mrb[31].mxu1  ;;  %v3054_v4 = vadd.f32 %v5514_v0, %v3053_v55  ;;  %v5569_v0 = vld [vmem:[%s7657_s1 + $0xc8] sm:$0xff] }
0x1579   : > { %v5558_v59 = vld [vmem:[%s7621_s10 + $0x28] sm:$0xff] }
0x157a   : > { %6114 = vmatpush3.msra.mxu1 %v3220_v57 }
0x157b   : > { %6433 = vmatprep.subr.bf16.mxu1 %v6579_v12 }
0x157f   : > { %v3136_v61 = vpop.f32.mrb[24].mxu0 }
0x1580   : > { %v3137_v1 = vadd.f32 %v5521_v60, %v3136_v61  ;;  %v6096_v2 = vpop.f32.mrb[25].mxu0 }
0x1581   : > { %v5570_v2 = vld [vmem:[%s7657_s1 + $0xd0] sm:$0xff] }
0x1582   : > { %6109 = vmatpush3.xpose.msk.msra.mxu0 %vm1032_vm2, %v3137_v1  ;;  %v6452_v1 = vpack.c.bf16 %v5569_v0, %v5568_v63  ;;  %v5604_v63 = vld [vmem:[%s7659_s7 + $0xf8] sm:$0xff] }
0x1583   : > { %6427 = vmatprep.subr.bf16.mxu0 %v6579_v12 }
0x1585   : > { %6111 = vmatmul.mubr.msk.f32.vlgmr.msra.gmra.mrb[26].mxu0 %vm1032_vm2, %v3054_v4 }
0x1586   : > { %6429 = vmatpush3.bf16.msra.mxu0 %v6428_v3  ;;  %6126 = vmatprep.mubr.msk.f32.mxu0 %vm6580_vm1, %v6581_v20  ;;  %v5571_v3 = vld [vmem:[%s7657_s1 + $0xd8] sm:$0xff] }
0x1587   : > { %6430 = vmatprep.subr.bf16.mxu0 %v6579_v12  ;;  %v6455_v4 = vpack.c.bf16 %v5571_v3, %v5570_v2  ;;  %v5595_v2 = vld [vmem:[%s7657_s1 + $0xe8] sm:$0xff] }
0x158a   : > { %6432 = vmatpush3.bf16.msra.mxu0 %v6431_v7  ;;  %v6446_v7 = vpack.c.bf16 %v5562_v6, %v5561_v5  ;;  %v5597_v5 = vld [vmem:[%s7657_s1 + $0xf8] sm:$0xff] }
0x158b   : > { %6439 = vmatprep.subr.bf16.mxu0 %v6579_v12 }
0x158d   : > { %6127 = vmatmul.mubr.msk.f32.vlgmr.msra.gmra.mrb[28].mxu0 %vm751_vm0, %v7193_v50 }
0x158e   : > { %6441 = vmatpush3.bf16.msra.mxu0 %v6440_v10  ;;  %6148 = vmatprep.mubr.msk.f32.mxu0 %vm6580_vm1, %v6581_v20 }
0x158f   : > { %6442 = vmatprep.subr.bf16.mxu0 %v6579_v12 }
0x1592   : > { %6444 = vmatpush3.bf16.msra.mxu0 %v6443_v16  ;;  %v5575_v16 = vld [vmem:[%s7659_s7 + $0xc0] sm:$0xff] }
0x1593   : > { %6161 = vmatprep.subr.mxu0 %v6581_v20 }
0x1595   : > { %6149 = vmatmul.mubr.msk.f32.vlgmr.msra.gmra.mrb[30].mxu0 %vm751_vm0, %v7193_v50 }
0x1596   : > { %6163 = vmatprep.mubr.msk.f32.mxu0 %vm6580_vm1, %v6581_v20  ;;  %6162 = vmatpush3.msra.mxu0 %v5558_v59 }
0x1597   : > { %6445 = vmatprep.subr.bf16.mxu0 %v6579_v12 }
0x1658   : > { %v3295_v18 = vpop.f32.mrb[26].mxu0 }
0x1659   : > { %v3296_v19 = vadd.f32 %v6891_v17, %v3295_v18  ;;  %v6112_v21 = vpop.f32.mrb[27].mxu0  ;;  %v5576_v18 = vld [vmem:[%s7659_s7 + $0xc8] sm:$0xff] }
0x165b   : > { %v3299_v22 = vsel %vm1032_vm2, %v3296_v19, -inf }
0x165c   : > { %3300 = vmax.xlane.f32.xlu0 %v3299_v22  ;;  %v6458_v22 = vpack.c.bf16 %v5576_v18, %v5575_v16 }
0x1660   : > { %v3464_v23 = vpop.f32.mrb[28].mxu0 }
0x1661   : > { %v6128_v24 = vpop.f32.mrb[29].mxu0  ;;  %v3465_v47 = vadd.f32 %v5539_v43, %v3464_v23  ;;  %v5577_v23 = vld [vmem:[%s7659_s7 + $0xd0] sm:$0xff] }
0x1662   : > { %v5578_v24 = vld [vmem:[%s7659_s7 + $0xd8] sm:$0xff] }
0x1668   : > { %v3630_v25 = vpop.f32.mrb[30].mxu0 }
0x1669   : > { %v6150_v26 = vpop.f32.mrb[31].mxu0  ;;  %v3631_v48 = vadd.f32 %v5553_v46, %v3630_v25  ;;  %v5573_v25 = vld [vmem:[%s7662_s29 + $0x6] ss:$0 sm:$0xff] }
0x166a   : > { %v6461_v26 = vpack.c.bf16 %v5578_v24, %v5577_v23  ;;  %v5592_v23 = vld [vmem:[%s7663_s25 + $0x7] ss:$0 sm:$0xff] }
0x16e9   : > { %v3301_v27 = vpop.xlane.xlu0 %3300 }
0x16ea   : > { %v3302_v13 = vsub.f32 %v3296_v19, %v3301_v27 }
0x16ec   : > { %v3303_v28 = vmul.f32 1.442695, %v3302_v13 }
0x16ee   : > { %6546 = vpow2.f32 %v3303_v28 }
0x16f8   : > { %v6547_v29 = vpop.eup %6546 }
0x16f9   : > { %v3305_v15 = vsel %vm1032_vm2, %v6547_v29, 0.0 }
0x16fa   : > { %3306 = vadd.xlane.f32.xlu1 %v3305_v15 }
0x1787   : > { %v3307_v30 = vpop.xlane.xlu1 %3306 }
0x1788   : > { %6548 = vrcp.f32 %v3307_v30 }
0x1792   : > { %v6549_v34 = vpop.eup %6548 }
0x1793   : > { %v3309_v36 = vmul.f32 %v6549_v34, %v6547_v29 }
0x1795   : > { %6116 = vmatmul.mubr.msk.f32.vlgmr.msra.gmra.mrb[32].mxu1 %vm1032_vm2, %v3309_v36  ;;  %v5580_v36 = vld [vmem:[%s7620_s9 + $0x6] ss:$0 sm:$0xff] }
0x1796   : > { %6435 = vmatpush3.bf16.msra.mxu1 %v6434_v35  ;;  %6137 = vmatprep.mubr.msk.f32.mxu1 %vm6580_vm1, %v6581_v20 }
0x1797   : > { %6436 = vmatprep.subr.bf16.mxu1 %v6579_v12 }
0x179a   : > { %6438 = vmatpush3.bf16.msra.mxu1 %v6437_v39 }
0x179b   : > { %6151 = vmatprep.subr.mxu1 %v6581_v20 }
0x179d   : > { %6138 = vmatmul.mubr.msk.f32.vlgmr.msra.gmra.mrb[34].mxu1 %vm751_vm0, %v7193_v50 }
0x179e   : > { %6153 = vmatprep.mubr.msk.f32.mxu1 %vm6580_vm1, %v6581_v20 }
0x1868   : > { %v3379_v40 = vpop.f32.mrb[32].mxu1 }
0x1869   : > { %v6117_v32 = vpop.f32.mrb[33].mxu1 }
0x186a   : > { %v7397_v32 = vld [vmem:[%s6888_s27] ss:$0 sm:$0xff] }
0x1870   : > { %v3547_v42 = vpop.f32.mrb[34].mxu1 }
0x1871   : > { %v3548_v44 = vadd.f32 %v5546_v41, %v3547_v42  ;;  %v6139_v45 = vpop.f32.mrb[35].mxu1 }
0x1873   : > { %6152 = vmatpush3.xpose.msk.msra.mxu1 %vm1032_vm2, %v3548_v44 }
0x1874   : > { %6156 = vmatprep.subr.mxu1 %v6581_v20 }
0x1876   : > { %6154 = vmatmul.mubr.msk.f32.vlgmr.msra.gmra.mrb[36].mxu1 %vm1032_vm2, %v3465_v47 }
0x1877   : > { %6157 = vmatpush3.msra.mxu1 %v3631_v48  ;;  %6158 = vmatprep.mubr.msk.f32.mxu1 %vm6580_vm1, %v6581_v20 }
0x1878   : > { %6166 = vmatprep.subr.mxu1 %v6581_v20 }
0x1949   : > { %v3706_v49 = vpop.f32.mrb[36].mxu1 }
0x194a   : > { %v3707_v51 = vadd.f32 %v6891_v17, %v3706_v49  ;;  %v6155_v52 = vpop.f32.mrb[37].mxu1  ;;  %v5585_v49 = vld [vmem:[%s7621_s10 + $0x30] sm:$0xff] }
0x194b   : > { %v5587_v52 = vld [vmem:[%s7656_s30 + $0xe0] sm:$0xff] }
0x194c   : > { %v3710_v53 = vsel %vm1032_vm2, %v3707_v51, -inf }
0x194d   : > { %3711 = vmax.xlane.f32.xlu0 %v3710_v53  ;;  %v5588_v53 = vld [vmem:[%s7656_s30 + $0xe8] sm:$0xff] }
0x19da   : > { %v3712_v54 = vpop.xlane.xlu0 %3711 }
0x19db   : > { %v3713_v55 = vsub.f32 %v3707_v51, %v3712_v54 }
0x19dd   : > { %v3714_v56 = vmul.f32 1.442695, %v3713_v55  ;;  %v6464_v55 = vpack.c.bf16 %v5588_v53, %v5587_v52 }
0x19df   : > { %6550 = vpow2.f32 %v3714_v56 }
0x19e9   : > { %v6551_v57 = vpop.eup %6550 }
0x19ea   : > { %v3716_v58 = vsel %vm1032_vm2, %v6551_v57, 0.0 }
0x19eb   : > { %3717 = vadd.xlane.f32.xlu1 %v3716_v58  ;;  %v5590_v58 = vld [vmem:[%s7656_s30 + $0xf8] sm:$0xff] }
0x1a78   : > { %v3718_v17 = vpop.xlane.xlu1 %3717 }
0x1a79   : > { %6552 = vrcp.f32 %v3718_v17  ;;  %v5601_v17 = vld [vmem:[%s7659_s7 + $0xe0] sm:$0xff] }
0x1a83   : > { %v6553_v60 = vpop.eup %6552 }
0x1a84   : > { %v3720_v61 = vmul.f32 %v6553_v60, %v6551_v57  ;;  %v5589_v57 = vld [vmem:[%s7656_s30 + $0xf0] sm:$0xff]  ;;  %v5602_v60 = vld [vmem:[%s7659_s7 + $0xe8] sm:$0xff] }
0x1a85   : > { %v6467_v59 = vpack.c.bf16 %v5590_v58, %v5589_v57  ;;  %v5622_v58 = vld [vmem:[%s7625_s14 + $0x38] sm:$0xff] }
0x1a86   : > { %6159 = vmatmul.mubr.msk.f32.vlgmr.msra.gmra.mrb[38].mxu1 %vm1032_vm2, %v3720_v61  ;;  %v6476_v61 = vpack.c.bf16 %v5602_v60, %v5601_v17 }
0x1a87   : > { %6167 = vmatpush3.msra.mxu1 %v5533_v62  ;;  %6168 = vmatprep.mubr.msk.f32.mxu1 %vm6580_vm1, %v6581_v20  ;;  %v5603_v62 = vld [vmem:[%s7659_s7 + $0xf0] sm:$0xff] }
0x1a88   : > { %6451 = vmatprep.subr.bf16.mxu1 %v6579_v12  ;;  %v6479_v0 = vpack.c.bf16 %v5604_v63, %v5603_v62  ;;  %v5617_v63 = vld [vmem:[%s7623_s12 + $0x1] ss:$0 sm:$0xff] }
0x1a8a   : > { %6169 = vmatmul.mubr.msk.f32.vlgmr.msra.gmra.mrb[40].mxu1 %vm1032_vm2, %v3379_v40 }
0x1a8b   : > { %6453 = vmatpush3.bf16.msra.mxu1 %v6452_v1  ;;  %6190 = vmatprep.mubr.msk.f32.mxu1 %vm6580_vm1, %v6581_v20  ;;  %v5594_v1 = vld [vmem:[%s7657_s1 + $0xe0] sm:$0xff] }
0x1a8c   : > { %6454 = vmatprep.subr.bf16.mxu1 %v6579_v12  ;;  %v6470_v3 = vpack.c.bf16 %v5595_v2, %v5594_v1  ;;  %v5618_v1 = vld [vmem:[%s7624_s13 + $0x1] ss:$0 sm:$0xff] }
0x1a8f   : > { %6456 = vmatpush3.bf16.msra.mxu1 %v6455_v4  ;;  %v5596_v4 = vld [vmem:[%s7657_s1 + $0xf0] sm:$0xff] }
0x1a90   : > { %6204 = vmatprep.subr.mxu1 %v6581_v20  ;;  %v6473_v8 = vpack.c.bf16 %v5597_v5, %v5596_v4  ;;  %v5626_v4 = vld [vmem:[%s7627_s16 + $0x40] sm:$0xff]  ;;  %v5627_v5 = vld [vmem:[%s7627_s16 + $0x48] sm:$0xff] }
0x1a92   : > { %6191 = vmatmul.mubr.msk.f32.vlgmr.msra.gmra.mrb[42].mxu1 %vm751_vm0, %v7193_v50 }
0x1a93   : > { %6206 = vmatprep.mubr.msk.f32.mxu1 %vm6580_vm1, %v6581_v20 }
0x1b59   : > { %v3790_v10 = vpop.f32.mrb[38].mxu1 }
0x1b5a   : > { %v6160_v11 = vpop.f32.mrb[39].mxu1  ;;  %6164 = vmatmul.mubr.msk.f32.vlgmr.msra.gmra.mrb[32].mxu0 %vm1032_vm2, %v3790_v10 }
0x1b5b   : > { %6447 = vmatpush3.bf16.msra.mxu0 %v6446_v7  ;;  %6179 = vmatprep.mubr.msk.f32.mxu0 %vm6580_vm1, %v6581_v20 }
0x1b5c   : > { %6448 = vmatprep.subr.bf16.mxu0 %v6579_v12 }
0x1b5d   : > { %v3938_v19 = vpop.f32.mrb[40].mxu1 }
0x1b5e   : > { %v6170_v21 = vpop.f32.mrb[41].mxu1 }
0x1b5f   : > { %6450 = vmatpush3.bf16.msra.mxu0 %v6449_v14  ;;  %v5599_v21 = vld [vmem:[%s7662_s29 + $0x7] ss:$0 sm:$0xff] }
0x1b60   : > { %6457 = vmatprep.subr.bf16.mxu0 %v6579_v12 }
0x1b62   : > { %6180 = vmatmul.mubr.msk.f32.vlgmr.msra.gmra.mrb[34].mxu0 %vm751_vm0, %v7193_v50 }
0x1b63   : > { %6459 = vmatpush3.bf16.msra.mxu0 %v6458_v22  ;;  %6201 = vmatprep.mubr.msk.f32.mxu0 %vm6580_vm1, %v6581_v20 }
0x1b64   : > { %6460 = vmatprep.subr.bf16.mxu0 %v6579_v12 }
0x1b65   : > { %v4104_v27 = vpop.f32.mrb[42].mxu1 }
0x1b66   : > { %v4105_v13 = vadd.f32 %v5573_v25, %v4104_v27  ;;  %v6192_v28 = vpop.f32.mrb[43].mxu1 }
0x1b67   : > { %6462 = vmatpush3.bf16.msra.mxu0 %v6461_v26  ;;  %v5606_v26 = vld [vmem:[%s7620_s9 + $0x7] ss:$0 sm:$0xff] }
0x1b68   : > { %6205 = vmatpush3.xpose.msk.msra.mxu1 %vm1032_vm2, %v4105_v13  ;;  %6214 = vmatprep.subr.mxu0 %v6581_v20 }
0x1b69   : > { %6209 = vmatprep.subr.mxu1 %v6581_v20 }
0x1b6a   : > { %6202 = vmatmul.mubr.msk.f32.vlgmr.msra.gmra.mrb[36].mxu0 %vm751_vm0, %v7193_v50 }
0x1b6b   : > { %6216 = vmatprep.mubr.msk.f32.mxu0 %vm6580_vm1, %v6581_v20  ;;  %6215 = vmatpush3.msra.mxu0 %v5585_v49 }
0x1b6c   : > { %6469 = vmatprep.subr.bf16.mxu0 %v6579_v12 }
0x1c2d   : > { %v3865_v29 = vpop.f32.mrb[32].mxu0 }
0x1c2e   : > { %v7384_v15 = vadd.f32 %v3938_v19, %v3865_v29  ;;  %v6165_v30 = vpop.f32.mrb[33].mxu0 }
0x1c35   : > { %v4021_v33 = vpop.f32.mrb[34].mxu0 }
0x1c36   : > { %v4022_v34 = vadd.f32 %v5566_v31, %v4021_v33  ;;  %v6181_v35 = vpop.f32.mrb[35].mxu0 }
0x1c38   : > { %6207 = vmatmul.mubr.msk.f32.vlgmr.msra.gmra.mrb[44].mxu1 %vm1032_vm2, %v4022_v34 }
0x1c39   : > { %6211 = vmatprep.mubr.msk.f32.mxu1 %vm6580_vm1, %v6581_v20 }
0x1c3d   : > { %v4187_v37 = vpop.f32.mrb[36].mxu0 }
0x1c3e   : > { %v4188_v38 = vadd.f32 %v5580_v36, %v4187_v37  ;;  %v6203_v39 = vpop.f32.mrb[37].mxu0  ;;  %v5611_v37 = vld [vmem:[%s7621_s10 + $0x38] sm:$0xff] }
0x1c40   : > { %6210 = vmatpush3.msra.mxu1 %v4188_v38 }
0x1c41   : > { %6463 = vmatprep.subr.bf16.mxu1 %v6579_v12 }
0x1d0b   : > { %v4263_v40 = vpop.f32.mrb[44].mxu1 }
0x1d0c   : > { %v4264_v41 = vadd.f32 %v7397_v32, %v4263_v40  ;;  %v6208_v42 = vpop.f32.mrb[45].mxu1 }
0x1d0e   : > { %v4267_v43 = vsel %vm1032_vm2, %v4264_v41, -inf }
0x1d0f   : > { %4268 = vmax.xlane.f32.xlu0 %v4267_v43  ;;  %v5614_v43 = vld [vmem:[%s7622_s11 + $0x1] ss:$0 sm:$0xff] }
0x1d9c   : > { %v4269_v44 = vpop.xlane.xlu0 %4268 }
0x1d9d   : > { %v4270_v45 = vsub.f32 %v4264_v41, %v4269_v44 }
0x1d9f   : > { %v4271_v46 = vmul.f32 1.442695, %v4270_v45 }
0x1da1   : > { %6554 = vpow2.f32 %v4271_v46 }
0x1dab   : > { %v6555_v47 = vpop.eup %6554 }
0x1dac   : > { %v4273_v48 = vsel %vm1032_vm2, %v6555_v47, 0.0 }
0x1dad   : > { %4274 = vadd.xlane.f32.xlu1 %v4273_v48 }
0x1e3a   : > { %v4275_v51 = vpop.xlane.xlu1 %4274 }
0x1e3b   : > { %6556 = vrcp.f32 %v4275_v51 }
0x1e45   : > { %v6557_v54 = vpop.eup %6556 }
0x1e46   : > { %v4277_v56 = vmul.f32 %v6557_v54, %v6555_v47 }
0x1e48   : > { %6212 = vmatmul.mubr.msk.f32.vlgmr.msra.gmra.mrb[46].mxu1 %vm1032_vm2, %v4277_v56  ;;  %v5620_v56 = vld [vmem:[%s7625_s14 + $0x28] sm:$0xff] }
0x1e49   : > { %6465 = vmatpush3.bf16.msra.mxu1 %v6464_v55  ;;  %6227 = vmatprep.mubr.msk.f32.mxu1 %vm6580_vm1, %v6581_v20  ;;  %v5619_v55 = vld [vmem:[%s7625_s14 + $0x20] sm:$0xff] }
0x1e4a   : > { %6466 = vmatprep.subr.bf16.mxu1 %v6579_v12  ;;  %v6482_v57 = vpack.c.bf16 %v5620_v56, %v5619_v55  ;;  %v5640_v56 = vld [vmem:[%s7630_s19 + $0x1] ss:$0 sm:$0xff] }
0x1e4d   : > { %6468 = vmatpush3.bf16.msra.mxu1 %v6467_v59 }
0x1e4e   : > { %6475 = vmatprep.subr.bf16.mxu1 %v6579_v12 }
0x1e50   : > { %6228 = vmatmul.mubr.msk.f32.vlgmr.msra.gmra.mrb[48].mxu1 %vm751_vm0, %v7193_v50 }
0x1e51   : > { %6477 = vmatpush3.bf16.msra.mxu1 %v6476_v61  ;;  %6249 = vmatprep.mubr.msk.f32.mxu1 %vm6580_vm1, %v6581_v20 }
0x1e52   : > { %6478 = vmatprep.subr.bf16.mxu1 %v6579_v12 }
0x1e55   : > { %6480 = vmatpush3.bf16.msra.mxu1 %v6479_v0 }
0x1e56   : > { %6262 = vmatprep.subr.mxu1 %v6581_v20 }
0x1e58   : > { %6250 = vmatmul.mubr.msk.f32.vlgmr.msra.gmra.mrb[50].mxu1 %vm751_vm0, %v7193_v50 }
0x1e59   : > { %6264 = vmatprep.mubr.msk.f32.mxu1 %vm6580_vm1, %v6581_v20  ;;  %6263 = vmatpush3.msra.mxu1 %v5611_v37 }
0x1e5a   : > { %6487 = vmatprep.subr.bf16.mxu1 %v6579_v12 }
0x1f1b   : > { %v4347_v6 = vpop.f32.mrb[46].mxu1 }
0x1f1c   : > { %v6213_v7 = vpop.f32.mrb[47].mxu1  ;;  %6217 = vmatmul.mubr.msk.f32.vlgmr.msra.gmra.mrb[38].mxu0 %vm1032_vm2, %v4347_v6  ;;  %v6488_v6 = vpack.c.bf16 %v5627_v5, %v5626_v4 }
0x1f1d   : > { %6471 = vmatpush3.bf16.msra.mxu0 %v6470_v3  ;;  %6238 = vmatprep.mubr.msk.f32.mxu0 %vm6580_vm1, %v6581_v20  ;;  %v5628_v7 = vld [vmem:[%s7627_s16 + $0x50] sm:$0xff] }
0x1f1e   : > { %6472 = vmatprep.subr.bf16.mxu0 %v6579_v12 }
0x1f21   : > { %6474 = vmatpush3.bf16.msra.mxu0 %v6473_v8  ;;  %v5629_v8 = vld [vmem:[%s7627_s16 + $0x58] sm:$0xff] }
0x1f22   : > { %6252 = vmatprep.subr.mxu0 %v6581_v20 }
0x1f23   : > { %v4506_v9 = vpop.f32.mrb[48].mxu1 }
0x1f24   : > { %v6229_v10 = vpop.f32.mrb[49].mxu1  ;;  %6239 = vmatmul.mubr.msk.f32.vlgmr.msra.gmra.mrb[40].mxu0 %vm751_vm0, %v7193_v50  ;;  %v4507_v27 = vadd.f32 %v5592_v23, %v4506_v9  ;;  %v6491_v9 = vpack.c.bf16 %v5629_v8, %v5628_v7 }
0x1f25   : > { %6254 = vmatprep.mubr.msk.f32.mxu0 %vm6580_vm1, %v6581_v20  ;;  %v5630_v10 = vld [vmem:[%s7627_s16 + $0x60] sm:$0xff] }
0x1f2b   : > { %v4672_v11 = vpop.f32.mrb[50].mxu1 }
0x1f2c   : > { %v6251_v14 = vpop.f32.mrb[51].mxu1  ;;  %v4673_v13 = vadd.f32 %v5606_v26, %v4672_v11  ;;  %v5631_v11 = vld [vmem:[%s7627_s16 + $0x68] sm:$0xff] }
0x1f2d   : > { %v6494_v14 = vpack.c.bf16 %v5631_v11, %v5630_v10 }
0x1fef   : > { %v4422_v16 = vpop.f32.mrb[38].mxu0 }
0x1ff0   : > { %v4426_v18 = vadd.f32 %v4422_v16, %v7384_v15  ;;  %v6218_v19 = vpop.f32.mrb[39].mxu0  ;;  %v5632_v16 = vld [vmem:[%s7627_s16 + $0x70] sm:$0xff] }
0x1ff7   : > { %v4589_v22 = vpop.f32.mrb[40].mxu0 }
0x1ff8   : > { %v4590_v24 = vadd.f32 %v5599_v21, %v4589_v22  ;;  %v6240_v25 = vpop.f32.mrb[41].mxu0  ;;  %v5624_v21 = vld [vmem:[%s7626_s15 + $0x1] ss:$0 sm:$0xff] }
0x1ffa   : > { %6253 = vmatpush3.xpose.msk.msra.mxu0 %vm1032_vm2, %v4590_v24 }
0x1ffb   : > { %6257 = vmatprep.subr.mxu0 %v6581_v20 }
0x1ffd   : > { %6255 = vmatmul.mubr.msk.f32.vlgmr.msra.gmra.mrb[42].mxu0 %vm1032_vm2, %v4507_v27 }
0x1ffe   : > { %6258 = vmatpush3.msra.mxu0 %v4673_v13  ;;  %6259 = vmatprep.mubr.msk.f32.mxu0 %vm6580_vm1, %v6581_v20 }
0x1fff   : > { %6481 = vmatprep.subr.bf16.mxu0 %v6579_v12 }
0x20d0   : > { %v4748_v28 = vpop.f32.mrb[42].mxu0 }
0x20d1   : > { %v4749_v29 = vadd.f32 %v7397_v32, %v4748_v28  ;;  %v6256_v15 = vpop.f32.mrb[43].mxu0 }
0x20d3   : > { %v4752_v30 = vsel %vm1032_vm2, %v4749_v29, -inf }
0x20d4   : > { %4753 = vmax.xlane.f32.xlu0 %v4752_v30 }
0x2161   : > { %v4754_v31 = vpop.xlane.xlu0 %4753 }
0x2162   : > { %v4755_v33 = vsub.f32 %v4749_v29, %v4754_v31 }
0x2164   : > { %v4756_v34 = vmul.f32 1.442695, %v4755_v33  ;;  %v5635_v33 = vld [vmem:[%s7628_s17 + $0x1] ss:$0 sm:$0xff] }
0x2166   : > { %6558 = vpow2.f32 %v4756_v34 }
0x2170   : > { %v6559_v35 = vpop.eup %6558 }
0x2171   : > { %v4758_v36 = vsel %vm1032_vm2, %v6559_v35, 0.0 }
0x2172   : > { %4759 = vadd.xlane.f32.xlu1 %v4758_v36 }
0x21ff   : > { %v4760_v38 = vpop.xlane.xlu1 %4759 }
0x2200   : > { %6560 = vrcp.f32 %v4760_v38 }
0x220a   : > { %v6561_v39 = vpop.eup %6560 }
0x220b   : > { %v4762_v40 = vmul.f32 %v6561_v39, %v6559_v35 }
0x220d   : > { %6260 = vmatmul.mubr.msk.f32.vlgmr.msra.gmra.mrb[44].mxu0 %vm1032_vm2, %v4762_v40 }
0x220e   : > { %6275 = vmatprep.mubr.msk.f32.mxu0 %vm6580_vm1, %v6581_v20  ;;  %6483 = vmatpush3.bf16.msra.mxu0 %v6482_v57 }
0x220f   : > { %6484 = vmatprep.subr.bf16.mxu0 %v6579_v12 }
0x22e0   : > { %v4832_v32 = vpop.f32.mrb[44].mxu0 }
0x22e1   : > { %v6261_v41 = vpop.f32.mrb[45].mxu0  ;;  %6265 = vmatmul.mubr.msk.f32.vlgmr.msra.gmra.mrb[52].mxu1 %vm1032_vm2, %v4832_v32 }
0x22e2   : > { %6294 = vmatprep.mubr.msk.f32.mxu1 %vm6580_vm1, %v6581_v20  ;;  %6489 = vmatpush3.bf16.msra.mxu1 %v6488_v6 }
0x22e3   : > { %6490 = vmatprep.subr.bf16.mxu1 %v6579_v12 }
0x22e6   : > { %6492 = vmatpush3.bf16.msra.mxu1 %v6491_v9 }
0x22e7   : > { %6493 = vmatprep.subr.bf16.mxu1 %v6579_v12 }
0x22ea   : > { %6495 = vmatpush3.bf16.msra.mxu1 %v6494_v14 }
0x22eb   : > { %6496 = vmatprep.subr.bf16.mxu1 %v6579_v12 }
0x23b4   : > { %v4907_v42 = vpop.f32.mrb[52].mxu1 }
0x23b5   : > { %v4911_v44 = vadd.f32 %v4907_v42, %v4426_v18  ;;  %v6266_v45 = vpop.f32.mrb[53].mxu1  ;;  %v5633_v18 = vld [vmem:[%s7627_s16 + $0x78] sm:$0xff] }
0x23b6   : > { %v6497_v19 = vpack.c.bf16 %v5633_v18, %v5632_v16 }
0x23b7   : > { %v4920_v46 = vadd.f32 %v5614_v43, %v4911_v44  ;;  %v5170_v43 = vld [vmem:[%s7631_s20] sm:$0xff]  ;;  %v5171_v44 = vld [vmem:[%s7631_s20 + $0x8] sm:$0xff] }
0x23b8   : > { %6498 = vmatpush3.bf16.msra.mxu1 %v6497_v19  ;;  %v6500_v45 = vpack.c.bf16 %v5171_v44, %v5170_v43 }
0x23b9   : > { %v4921_v47 = vadd.f32 %v4920_v46, %v7193_v50  ;;  %v5621_v50 = vld [vmem:[%s7625_s14 + $0x30] sm:$0xff] }
0x23ba   : > { %v6485_v59 = vpack.c.bf16 %v5622_v58, %v5621_v50  ;;  %v5172_v46 = vld [vmem:[%s7631_s20 + $0x10] sm:$0xff]  ;;  %v5255_v58 = vld [vmem:[%s7633_s22] sm:$0xff] }
0x23bb   : > { %v4926_v48 = vsel %vm751_vm0, %v4921_v47, 0.0 }
0x23bc   : > { %4927 = vadd.xlane.f32.xlu0 %v4926_v48  ;;  %6486 = vmatpush3.bf16.msra.mxu0 %v6485_v59  ;;  %v5256_v59 = vld [vmem:[%s7633_s22 + $0x8] sm:$0xff] }
0x23bd   : > { %6499 = vmatprep.subr.bf16.mxu0 %v6579_v12 }
0x2449   : > { %v4928_v49 = vpop.xlane.xlu0 %4927 }
0x244a   : > { %v4929_v51 = vmul.f32 0.03125, %v4928_v49 }
0x244c   : > { %v4930_v52 = vsub.f32 %v4921_v47, %v4929_v51  ;;  %v5173_v47 = vld [vmem:[%s7631_s20 + $0x18] sm:$0xff] }
0x244d   : > { %v6503_v48 = vpack.c.bf16 %v5173_v47, %v5172_v46 }
0x244e   : > { %v4931_v53 = vmul.f32 %v4930_v52, %v4930_v52 }
0x2450   : > { %v4932_v54 = vsel %vm751_vm0, %v4931_v53, 0.0 }
0x2451   : > { %4933 = vadd.xlane.f32.xlu1 %v4932_v54  ;;  %v5639_v54 = vld [vmem:[%s7629_s18 + $0x1] ss:$0 sm:$0xff] }
0x24de   : > { %v4934_v17 = vpop.xlane.xlu1 %4933 }
0x24df   : > { %v4935_v60 = vmul.f32 0.03125, %v4934_v17  ;;  %v5257_v17 = vld [vmem:[%s7633_s22 + $0x10] sm:$0xff] }
0x24e1   : > { %v4936_v61 = vadd.f32 1e-05, %v4935_v60  ;;  %v6506_v60 = vpack.c.bf16 %v5256_v59, %v5255_v58 }
0x24e3   : > { %6562 = vrsqrt.f32 %v4936_v61  ;;  %v5258_v61 = vld [vmem:[%s7633_s22 + $0x18] sm:$0xff] }
0x24ed   : > { %v6563_v62 = vpop.eup %6562 }
0x24ee   : > { %v4938_v0 = vmul.f32 %v6563_v62, %v4930_v52  ;;  %v5641_v62 = vld [vmem:[%s7632_s21] ss:$0 sm:$0xff] }
0x24f0   : > { %v4945_v2 = vmul.f32 %v5617_v63, %v4938_v0 }
0x24f2   : > { %v4952_v3 = vadd.f32 %v5618_v1, %v4945_v2 }
0x24f4   : > { %6276 = vmatmul.mubr.msk.f32.vlgmr.msra.gmra.mrb[46].mxu0 %vm751_vm0, %v4952_v3 }
0x24f5   : > { %6305 = vmatprep.mubr.msk.f32.mxu0 %vm6580_vm1, %v6581_v20  ;;  %6501 = vmatpush3.bf16.msra.mxu0 %v6500_v45 }
0x24f6   : > { %6502 = vmatprep.subr.bf16.mxu0 %v6579_v12 }
0x24f9   : > { %6504 = vmatpush3.bf16.msra.mxu0 %v6503_v48 }
0x24fa   : > { %6505 = vmatprep.subr.bf16.mxu0 %v6579_v12 }
0x25c7   : > { %v5035_v22 = vpop.f32.mrb[46].mxu0 }
0x25c8   : > { %v5036_v23 = vadd.f32 %v5624_v21, %v5035_v22  ;;  %v6277_v24 = vpop.f32.mrb[47].mxu0 }
0x25ca   : > { %v5040_v25 = vmul.f32 0.044715, %v5036_v23  ;;  %v5039_v15 = vmul.f32 0.5, %v5036_v23 }
0x25cc   : > { %v5041_v26 = vmul.f32 %v5040_v25, %v5036_v23 }
0x25ce   : > { %v5042_v27 = vmul.f32 %v5041_v26, %v5036_v23 }
0x25d0   : > { %v5043_v13 = vadd.f32 %v5042_v27, %v5036_v23 }
0x25d2   : > { %v5044_v28 = vmul.f32 0.7978846, %v5043_v13 }
0x25d4   : > { %6564 = vtanh.f32 %v5044_v28 }
0x25de   : > { %v6565_v29 = vpop.eup %6564 }
0x25df   : > { %v5046_v30 = vadd.f32 1.0, %v6565_v29 }
0x25e1   : > { %v5047_v31 = vmul.f32 %v5046_v30, %v5039_v15 }
0x25e3   : > { %6295 = vmatmul.mubr.msk.f32.vlgmr.msra.gmra.mrb[54].mxu1 %vm2867_vm3, %v5047_v31 }
0x26b6   : > { %v5134_v34 = vpop.f32.mrb[54].mxu1 }
0x26b7   : > { %v5135_v35 = vadd.f32 %v5635_v33, %v5134_v34  ;;  %v6296_v36 = vpop.f32.mrb[55].mxu1 }
0x26b9   : > { %v5138_v37 = vadd.f32 %v5135_v35, %v4952_v3  ;;  %v5643_v3 = vld [vmem:[%s7665_s4] ss:$0 sm:$0xff] }
0x26bb   : > { %v5143_v38 = vsel %vm751_vm0, %v5138_v37, 0.0 }
0x26bc   : > { %5144 = vadd.xlane.f32.xlu0 %v5143_v38 }
0x2749   : > { %v5145_v39 = vpop.xlane.xlu0 %5144 }
0x274a   : > { %v5146_v40 = vmul.f32 0.03125, %v5145_v39 }
0x274c   : > { %v5147_v32 = vsub.f32 %v5138_v37, %v5146_v40 }
0x274e   : > { %v5148_v41 = vmul.f32 %v5147_v32, %v5147_v32 }
0x2750   : > { %v5149_v42 = vsel %vm751_vm0, %v5148_v41, 0.0 }
0x2751   : > { %5150 = vadd.xlane.f32.xlu1 %v5149_v42 }
0x27de   : > { %v5151_v49 = vpop.xlane.xlu1 %5150 }
0x27df   : > { %v5152_v51 = vmul.f32 0.03125, %v5151_v49 }
0x27e1   : > { %v5153_v52 = vadd.f32 1e-05, %v5152_v51 }
0x27e3   : > { %6566 = vrsqrt.f32 %v5153_v52 }
0x27ed   : > { %v6567_v53 = vpop.eup %6566 }
0x27ee   : > { %v5155_v55 = vmul.f32 %v6567_v53, %v5147_v32 }
0x27f0   : > { %v5162_v57 = vmul.f32 %v5639_v54, %v5155_v55 }
0x27f2   : > { %v5169_v50 = vadd.f32 %v5640_v56, %v5162_v57 }
0x27f4   : > { %6306 = vmatmul.mubr.msk.f32.vlgmr.msra.gmra.mrb[48].mxu0 %vm751_vm0, %v5169_v50 }
0x27f5   : > { %6316 = vmatprep.mubr.msk.f32.mxu0 %vm6580_vm1, %v6581_v20  ;;  %6507 = vmatpush3.bf16.msra.mxu0 %v6506_v60  ;;  %v6509_v20 = vpack.c.bf16 %v5258_v61, %v5257_v17 }
0x27f6   : > { %6508 = vmatprep.subr.bf16.mxu0 %v6579_v12 }
0x27f9   : > { %6510 = vmatpush3.bf16.msra.mxu0 %v6509_v20 }
0x28c7   : > { %v5250_v63 = vpop.f32.mrb[48].mxu0 }
0x28c8   : > { %v5251_v0 = vadd.f32 %v5641_v62, %v5250_v63  ;;  %v6307_v1 = vpop.f32.mrb[49].mxu0 }
0x28ca   : > { %6568 = vtanh.f32 %v5251_v0 }
0x28d4   : > { %v6569_v2 = vpop.eup %6568 }
0x28d5   : > { %6317 = vmatmul.mubr.msk.f32.vlgmr.msra.gmra.mrb[50].mxu0 %vm751_vm0, %v6569_v2 }
0x29a8   : > { %v5335_v12 = vpop.f32.mrb[50].mxu0 }
0x29a9   : > { %v5336_v4 = vadd.f32 %v5643_v3, %v5335_v12  ;;  %v6318_v5 = vpop.f32.mrb[51].mxu0 }
0x29ab   : > { %5339 = vst [vmem:[%s746_s5] sm:$0xff] %v5336_v4 }
0x29ac PF: > { %s7668_s0 = sld [smem:[#allocation2_spill]] }
0x29b2   : > { %s34_s5 = sadd.s32 1, %s7668_s0  }
0x29b3   : > { %p31_p4 = scmp.ge.s32.totalorder %s34_s5, 4  }
0x29b5   :  { %33 = sbr.rel (!%p31_p4) target bundleno = 12 (0xc), region = 207 }

</bundles_post_ra>
